<compile_context>
chip_gen: v7x
topology: tpu7x:2x2x1
jax: 0.10.0
libtpu: 0.0.40
codegen_flags: <defaults>
</compile_context>

<pallas_src>
import functools
import numpy as np
import jax
import jax.numpy as jnp
from jax import lax
from jax.experimental import pallas as pl
from jax.experimental.pallas import tpu as pltpu

_EPS = 1e-5


def _vmem_budget_bytes():
    """Per-generation VMEM budget: ~96 MiB on v5e/v6e (128 MiB phys),
    ~48 MiB on v7x (64 MiB phys).  Conservative fallback if query fails."""
    try:
        cap = pltpu.get_tpu_info().vmem_capacity_bytes
    except Exception:
        cap = 64 << 20
    return int(min(cap * 3 // 4, 100 << 20))


_VMEM_LIMIT = _vmem_budget_bytes()


# --------------------------------------------------------------------------
# helpers
# --------------------------------------------------------------------------

def _pick_row_tile(H, bytes_per_row, budget, max_tile=128):
    """Largest divisor of H (<= max_tile) whose per-step working set fits ~budget/8
    (double-buffered inputs + im2col + accumulator headroom)."""
    target = max(budget // 8, 1 << 20)
    cap = max(1, min(target // max(1, bytes_per_row), max_tile, H))
    best = 1
    for t in range(1, int(cap) + 1):
        if H % t == 0:
            best = t
    return best


def _upsample_matrix(n_in, n_out, pad_lo):
    """(n_out, n_in) x2 bilinear (align_corners=True) matrix; zero rows encode
    the F.pad border."""
    n_up = 2 * n_in
    A = np.zeros((n_out, n_in), np.float32)
    for o in range(n_out):
        u = o - pad_lo
        if 0 <= u < n_up:
            src = u * (n_in - 1) / (n_up - 1) if n_up > 1 else 0.0
            l = min(max(int(np.floor(src)), 0), n_in - 1)
            h = min(l + 1, n_in - 1)
            f = src - l
            A[o, l] += 1.0 - f
            A[o, h] += f
    return jnp.asarray(A)


# --------------------------------------------------------------------------
# fused 3x3 conv kernel:
#   - row-block tiled, halo rows via clamped 1-row BlockSpecs
#   - optional up-branch: bilinear-upsampled x1 built in-register (fuses
#     Upsample + F.pad + channel concat into conv1's input path)
#   - optional fused input BatchNorm+ReLU (previous layer's BN folded in)
#   - one fat im2col MXU dot (K = 9*Cin, bf16 in / f32 acc)
#   - per-tile (sum, sum_sq) partial BatchNorm statistics
# --------------------------------------------------------------------------

def _make_conv_kernel(TH, W, Cin, Cout, *, up_cfg=None, bnrelu=False):
    T2 = TH + 2

    def kernel(*refs):
        idx = 0
        xt_ref = refs[idx]; idx += 1
        xm_ref = refs[idx]; idx += 1
        xb_ref = refs[idx]; idx += 1
        if up_cfg is not None:
            x1_ref = refs[idx]; idx += 1
            ah_ref = refs[idx]; idx += 1
            awt_ref = refs[idx]; idx += 1
        if bnrelu:
            sc_ref = refs[idx]; idx += 1
            sh_ref = refs[idx]; idx += 1
        w_ref = refs[idx]; idx += 1
        y_ref = refs[idx]; idx += 1
        st_ref = refs[idx]; idx += 1

        hb = pl.program_id(1)
        nb = pl.num_programs(1)

        # --- branch A: the directly-loaded input (x2 for conv1, y1 for conv2) ---
        top = xt_ref[0, 0].astype(jnp.float32)          # (W, Cx) halo row above
        mid = xm_ref[0].astype(jnp.float32)             # (TH, W, Cx)
        bot = xb_ref[0, 0].astype(jnp.float32)          # (W, Cx) halo row below
        if bnrelu:                                      # previous layer's BN+ReLU
            sc = sc_ref[0]
            sh = sh_ref[0]
            top = jnp.maximum(top * sc + sh, 0.0)
            mid = jnp.maximum(mid * sc + sh, 0.0)
            bot = jnp.maximum(bot * sc + sh, 0.0)
        # zero-pad at image top/bottom (halo rows were clamped)
        ft = (hb > 0).astype(jnp.float32)
        fb = (hb < nb - 1).astype(jnp.float32)
        slab = jnp.concatenate([(top * ft)[None], mid, (bot * fb)[None]], axis=0)

        # --- branch B: bilinear-upsampled + padded x1, built in-register ---
        if up_cfg is not None:
            W1, C1 = up_cfg
            # rows [hb*TH-1, hb*TH+TH] of the padded up-output via the padded
            # H-interpolation matrix (zero rows encode F.pad + conv halo).
            ah = ah_ref[pl.ds(hb * TH, T2), :]                              # (T2, H1)
            uph = jnp.dot(ah, x1_ref[0],
                          preferred_element_type=jnp.float32)              # (T2, W1*C1)
            uph = jnp.transpose(uph.reshape(T2, W1, C1), (0, 2, 1))        # (T2, C1, W1)
            upw = jnp.dot(uph.reshape(T2 * C1, W1), awt_ref[...],
                          preferred_element_type=jnp.float32)              # (T2*C1, W)
            slab_b = jnp.transpose(upw.reshape(T2, C1, W), (0, 2, 1))      # (T2, W, C1)
            # torch.cat([x2, up(x1)], dim=channel)
            slab = jnp.concatenate([slab, slab_b], axis=-1)                # (T2, W, Cin)

        # zero-pad left/right, cast once to bf16 for the MXU
        zcol = jnp.zeros((T2, 1, Cin), jnp.float32)
        slab = jnp.concatenate([zcol, slab, zcol], axis=1).astype(jnp.bfloat16)

        # fused im2col: one fat dot, K = 9*Cin, f32 accumulation
        cols = jnp.concatenate(
            [slab[dy:dy + TH, dx:dx + W, :].reshape(TH * W, Cin)
             for dy in range(3) for dx in range(3)], axis=-1)              # (TH*W, 9*Cin)
        acc = jnp.dot(cols, w_ref[...], preferred_element_type=jnp.float32)  # (TH*W, Cout)

        y_ref[0] = acc.reshape(TH, W, Cout).astype(y_ref.dtype)
        # partial BatchNorm statistics (f32)
        s1 = jnp.sum(acc, axis=0, keepdims=True)
        s2 = jnp.sum(acc * acc, axis=0, keepdims=True)
        st_ref[0, 0] = jnp.concatenate([s1, s2], axis=0)                   # (2, Cout)

    return kernel


def _conv3x3_bn_stats(x, w_flat, Cout, *, x1_flat=None, ah=None, awt=None,
                      up_dims=None, scale=None, shift=None,
                      out_dtype=jnp.float32):
    """3x3 same-conv (no bias) over NHWC x with optional fused up-branch and
    optional fused input BN+ReLU.  Returns pre-BN conv output and per-(image,
    row-block) partial (sum, sum_sq)."""
    N, H, W, Cx = x.shape
    if up_dims is not None:
        W1, C1 = up_dims
        Cin = Cx + C1
    else:
        Cin = Cx

    # per-row working set: f32 slab + bf16 im2col cols + f32 accumulator
    row_bytes = W * (Cin * 4 + Cin * 9 * 2 + Cout * 4)
    TH = _pick_row_tile(H, row_bytes, _VMEM_LIMIT)
    nb = H // TH

    kernel = _make_conv_kernel(TH, W, Cin, Cout,
                               up_cfg=up_dims, bnrelu=scale is not None)

    in_specs = [
        # halo row above (clamped; zero-masked in-kernel at the image border)
        pl.BlockSpec((1, 1, W, Cx),
                     lambda n, hb: (n, jnp.maximum(hb * TH - 1, 0), 0, 0)),
        # main row block
        pl.BlockSpec((1, TH, W, Cx), lambda n, hb: (n, hb, 0, 0)),
        # halo row below (clamped; zero-masked in-kernel)
        pl.BlockSpec((1, 1, W, Cx),
                     lambda n, hb: (n, jnp.minimum((hb + 1) * TH, H - 1), 0, 0)),
    ]
    args = [x, x, x]
    if up_dims is not None:
        H1 = x1_flat.shape[1]
        in_specs += [
            # low-res x1, resident per image (re-fetched only when n changes)
            pl.BlockSpec((1, H1, W1 * C1), lambda n, hb: (n, 0, 0)),
            # padded H-interpolation matrix (H+2, H1), resident
            pl.BlockSpec((H + 2, H1), lambda n, hb: (0, 0)),
            # transposed W-interpolation matrix (W1, W), resident
            pl.BlockSpec((W1, W), lambda n, hb: (0, 0)),
        ]
        args += [x1_flat, ah, awt]
    if scale is not None:
        in_specs += [pl.BlockSpec((1, Cx), lambda n, hb: (0, 0)),
                     pl.BlockSpec((1, Cx), lambda n, hb: (0, 0))]
        args += [scale.reshape(1, Cx).astype(jnp.float32),
                 shift.reshape(1, Cx).astype(jnp.float32)]
    # VMEM-resident flattened weights (9*Cin, Cout), bf16
    in_specs += [pl.BlockSpec((9 * Cin, Cout), lambda n, hb: (0, 0))]
    args += [w_flat]

    y, st = pl.pallas_call(
        kernel,
        out_shape=(jax.ShapeDtypeStruct((N, H, W, Cout), out_dtype),
                   jax.ShapeDtypeStruct((N, nb, 2, Cout), jnp.float32)),
        grid=(N, nb),
        in_specs=in_specs,
        out_specs=(pl.BlockSpec((1, TH, W, Cout), lambda n, hb: (n, hb, 0, 0)),
                   pl.BlockSpec((1, 1, 2, Cout), lambda n, hb: (n, hb, 0, 0))),
        compiler_params=pltpu.CompilerParams(
            dimension_semantics=("parallel", "parallel"),
            vmem_limit_bytes=_VMEM_LIMIT),
    )(*args)
    return y, st


def _bn_affine(stats, gamma, beta, count):
    """Fold training-mode BatchNorm (batch stats, biased var) into scale/shift."""
    s = jnp.sum(stats[:, :, 0, :], axis=(0, 1))
    ss = jnp.sum(stats[:, :, 1, :], axis=(0, 1))
    mean = s / count
    var = jnp.maximum(ss / count - mean * mean, 0.0)
    scale = gamma * lax.rsqrt(var + _EPS)
    shift = beta - mean * scale
    return scale, shift


# --------------------------------------------------------------------------
# final BatchNorm + ReLU epilogue (tiled elementwise)
# --------------------------------------------------------------------------

def _bn_relu_kernel(y_ref, sc_ref, sh_ref, o_ref):
    o_ref[...] = jnp.maximum(
        y_ref[...].astype(jnp.float32) * sc_ref[0] + sh_ref[0], 0.0)


def _bn_relu(y, scale, shift):
    N, H, W, C = y.shape
    TH = _pick_row_tile(H, W * C * 8, _VMEM_LIMIT)
    return pl.pallas_call(
        _bn_relu_kernel,
        out_shape=jax.ShapeDtypeStruct((N, H, W, C), jnp.float32),
        grid=(N, H // TH),
        in_specs=[pl.BlockSpec((1, TH, W, C), lambda n, hb: (n, hb, 0, 0)),
                  pl.BlockSpec((1, C), lambda n, hb: (0, 0)),
                  pl.BlockSpec((1, C), lambda n, hb: (0, 0))],
        out_specs=pl.BlockSpec((1, TH, W, C), lambda n, hb: (n, hb, 0, 0)),
        compiler_params=pltpu.CompilerParams(
            dimension_semantics=("parallel", "parallel"),
            vmem_limit_bytes=_VMEM_LIMIT),
    )(y, scale.reshape(1, C).astype(jnp.float32),
      shift.reshape(1, C).astype(jnp.float32))


# --------------------------------------------------------------------------
# forward
# --------------------------------------------------------------------------

@jax.jit
def up_forward(params, x1_nchw, x2_nchw):
    # TODO(synk): fold the NCHW<->NHWC transposes into the kernels' index maps.
    x1 = jnp.transpose(x1_nchw, (0, 2, 3, 1)).astype(jnp.float32)   # NHWC
    x2 = jnp.transpose(x2_nchw, (0, 2, 3, 1)).astype(jnp.float32)
    N, H1, W1, C1 = x1.shape
    _, H2, W2, C2 = x2.shape
    Cin = C1 + C2
    cmid = params['w1'].shape[-1]
    cout = params['w2'].shape[-1]
    count = float(N * H2 * W2)

    # interpolation matrices (F.pad border rows/cols are zero rows);
    # Ah gets one extra zero row at each end for the conv's H halo.
    diffY = H2 - 2 * H1
    diffX = W2 - 2 * W1
    ah_core = _upsample_matrix(H1, H2, diffY // 2)                  # (H2, H1)
    ah = jnp.concatenate([jnp.zeros((1, H1), jnp.float32), ah_core,
                          jnp.zeros((1, H1), jnp.float32)], axis=0)  # (H2+2, H1)
    awt = _upsample_matrix(W1, W2, diffX // 2).T                    # (W1, W2)
    x1_flat = x1.reshape(N, H1, W1 * C1)                            # free reshape

    # conv1: upsample + pad + concat fused into the input path; y1 stored bf16
    w1 = params['w1'].reshape(9 * Cin, cmid).astype(jnp.bfloat16)
    y1, st1 = _conv3x3_bn_stats(x2, w1, cmid,
                                x1_flat=x1_flat, ah=ah, awt=awt,
                                up_dims=(W1, C1),
                                out_dtype=jnp.bfloat16)
    sc1, sh1 = _bn_affine(st1, params['g1'], params['b1'], count)

    # conv2: BN1 + ReLU fused onto the loaded y1
    w2 = params['w2'].reshape(9 * cmid, cout).astype(jnp.bfloat16)
    y2, st2 = _conv3x3_bn_stats(y1, w2, cout, scale=sc1, shift=sh1,
                                out_dtype=jnp.float32)
    sc2, sh2 = _bn_affine(st2, params['g2'], params['b2'], count)

    out = _bn_relu(y2, sc2, sh2)                                    # BN2 + ReLU
    return jnp.transpose(out, (0, 3, 1, 2))                         # NCHW


# --------------------------------------------------------------------------
# pure-JAX reference (f32, HIGHEST precision)
# --------------------------------------------------------------------------

def _ref_conv_bn_relu(x_nchw, w_hwio, g, b):
    y = lax.conv_general_dilated(
        x_nchw, w_hwio, (1, 1), ((1, 1), (1, 1)),
        dimension_numbers=('NCHW', 'HWIO', 'NCHW'),
        precision=lax.Precision.HIGHEST)
    mean = y.mean(axis=(0, 2, 3), keepdims=True)
    var = ((y - mean) ** 2).mean(axis=(0, 2, 3), keepdims=True)
    y = (y - mean) * lax.rsqrt(var + _EPS)
    y = y * g.reshape(1, -1, 1, 1) + b.reshape(1, -1, 1, 1)
    return jnp.maximum(y, 0.0)


def reference(params, x1_nchw, x2_nchw):
    x1 = x1_nchw.astype(jnp.float32)
    x2 = x2_nchw.astype(jnp.float32)
    _, _, H1, W1 = x1.shape
    Ah = _upsample_matrix(H1, 2 * H1, 0)
    Aw = _upsample_matrix(W1, 2 * W1, 0)
    up = jnp.einsum('Hh,nchw->ncHw', Ah, x1, precision=lax.Precision.HIGHEST)
    up = jnp.einsum('Ww,ncHw->ncHW', Aw, up, precision=lax.Precision.HIGHEST)
    diffY = x2.shape[2] - up.shape[2]
    diffX = x2.shape[3] - up.shape[3]
    up = jnp.pad(up, ((0, 0), (0, 0),
                      (diffY // 2, diffY - diffY // 2),
                      (diffX // 2, diffX - diffX // 2)))
    x = jnp.concatenate([x2, up], axis=1)
    y = _ref_conv_bn_relu(x, params['w1'], params['g1'], params['b1'])
    y = _ref_conv_bn_relu(y, params['w2'], params['g2'], params['b2'])
    return y


# --------------------------------------------------------------------------
# params
# --------------------------------------------------------------------------

def init_params(key, in_channels, out_channels):
    mid = in_channels // 2       # DoubleConv(in, out, mid=in//2) in bilinear mode
    k1, k2, k3, k4, k5, k6 = jax.random.split(key, 6)
    return {
        # conv weights stored HWIO; equals torch (O,I,3,3).transpose(2,3,1,0)
        'w1': 0.1 * jax.random.normal(k1, (3, 3, in_channels, mid), jnp.float32),
        'g1': 1.0 + 0.1 * jax.random.normal(k2, (mid,), jnp.float32),
        'b1': 0.1 * jax.random.normal(k3, (mid,), jnp.float32),
        'w2': 0.1 * jax.random.normal(k4, (3, 3, mid, out_channels), jnp.float32),
        'g2': 1.0 + 0.1 * jax.random.normal(k5, (out_channels,), jnp.float32),
        'b2': 0.1 * jax.random.normal(k6, (out_channels,), jnp.float32),
    }


if __name__ == "__main__":
    key = jax.random.PRNGKey(0)
    kx1, kx2, kp = jax.random.split(key, 3)

    in_channels, out_channels, N = 8, 4, 2
    # x1: low-res feature map (in_channels//2 ch), x2: skip connection
    x1 = jax.random.normal(kx1, (N, in_channels // 2, 8, 8), jnp.float32)    # NCHW
    x2 = jax.random.normal(kx2, (N, in_channels // 2, 16, 16), jnp.float32)  # NCHW
    params = init_params(kp, in_channels, out_channels)

    out = jax.block_until_ready(up_forward(params, x1, x2))
    assert out.shape == (N, out_channels, 16, 16), out.shape

    ref = jax.block_until_ready(reference(params, x1, x2))
    # The kernels run the conv MXU dots in bf16 (f32 accumulation) and store y1
    # in bf16 per the perf review, while BatchNorm (training-mode batch stats)
    # amplifies those quantization errors; the reference is full f32 HIGHEST.
    # Observed worst-case deviation is ~1.5e-2 absolute on a handful of
    # elements, so the tolerance carries ~3x margin over that.
    np.testing.assert_allclose(np.asarray(out), np.asarray(ref), rtol=5e-2, atol=5e-2)

    print("KERNEL_OK")
</pallas_src>

<mosaic_0001>
module attributes {stable_mosaic.version = 11 : i64} {
  func.func @kernel(%arg0: i32, %arg1: i32, %arg2: memref<1x1x16x4xf32, #tpu.memory_space<vmem>>, %arg3: memref<1x16x16x4xf32, #tpu.memory_space<vmem>>, %arg4: memref<1x1x16x4xf32, #tpu.memory_space<vmem>>, %arg5: memref<1x8x32xf32, #tpu.memory_space<vmem>>, %arg6: memref<18x8xf32, #tpu.memory_space<vmem>>, %arg7: memref<8x16xf32, #tpu.memory_space<vmem>>, %arg8: memref<72x4xbf16, #tpu.memory_space<vmem>>, %arg9: memref<1x16x16x4xbf16, #tpu.memory_space<vmem>>, %arg10: memref<1x1x2x4xf32, #tpu.memory_space<vmem>>) attributes {dimension_semantics = [#tpu.dimension_semantics<parallel>, #tpu.dimension_semantics<parallel>], iteration_bounds = array<i64: 2, 1>, scalar_prefetch = 0 : i64, scratch_operands = 0 : i64, tpu.core_type = #tpu.core_type<tc>, window_params = [{transform_indices = @transform_0, window_bounds = array<i64: 1, 1, 16, 4>}, {transform_indices = @transform_1, window_bounds = array<i64: 1, 16, 16, 4>}, {transform_indices = @transform_2, window_bounds = array<i64: 1, 1, 16, 4>}, {transform_indices = @transform_3, window_bounds = array<i64: 1, 8, 32>}, {pipeline_mode = #tpu.pipeline_mode<synchronous>, transform_indices = @transform_4, window_bounds = array<i64: 18, 8>}, {pipeline_mode = #tpu.pipeline_mode<synchronous>, transform_indices = @transform_5, window_bounds = array<i64: 8, 16>}, {pipeline_mode = #tpu.pipeline_mode<synchronous>, transform_indices = @transform_6, window_bounds = array<i64: 72, 4>}, {transform_indices = @transform_7, window_bounds = array<i64: 1, 16, 16, 4>}, {transform_indices = @transform_8, window_bounds = array<i64: 1, 1, 2, 4>}]} {
    %c0 = arith.constant 0 : index
    %c0_0 = arith.constant 0 : index
    %c0_1 = arith.constant 0 : index
    %c0_2 = arith.constant 0 : index
    %0 = vector.load %arg2[%c0, %c0_0, %c0_1, %c0_2] : memref<1x1x16x4xf32, #tpu.memory_space<vmem>>, vector<1x1x16x4xf32>
    %1 = vector.shape_cast %0 : vector<1x1x16x4xf32> to vector<16x4xf32>
    %c0_3 = arith.constant 0 : index
    %c0_4 = arith.constant 0 : index
    %c0_5 = arith.constant 0 : index
    %c0_6 = arith.constant 0 : index
    %2 = vector.load %arg3[%c0_3, %c0_4, %c0_5, %c0_6] : memref<1x16x16x4xf32, #tpu.memory_space<vmem>>, vector<1x16x16x4xf32>
    %3 = vector.shape_cast %2 : vector<1x16x16x4xf32> to vector<16x16x4xf32>
    %c0_7 = arith.constant 0 : index
    %c0_8 = arith.constant 0 : index
    %c0_9 = arith.constant 0 : index
    %c0_10 = arith.constant 0 : index
    %4 = vector.load %arg4[%c0_7, %c0_8, %c0_9, %c0_10] : memref<1x1x16x4xf32, #tpu.memory_space<vmem>>, vector<1x1x16x4xf32>
    %5 = vector.shape_cast %4 : vector<1x1x16x4xf32> to vector<16x4xf32>
    %c0_i32 = arith.constant 0 : i32
    %6 = arith.cmpi sgt, %arg1, %c0_i32 : i32
    %7 = arith.extui %6 : i1 to i32
    %8 = arith.sitofp %7 : i32 to f32
    %c0_i32_11 = arith.constant 0 : i32
    %9 = arith.cmpi slt, %arg1, %c0_i32_11 : i32
    %10 = arith.extui %9 : i1 to i32
    %11 = arith.sitofp %10 : i32 to f32
    %12 = vector.broadcast %8 : f32 to vector<16x4xf32>
    %13 = arith.mulf %1, %12 : vector<16x4xf32>
    %14 = vector.shape_cast %13 : vector<16x4xf32> to vector<1x16x4xf32>
    %15 = vector.broadcast %11 : f32 to vector<16x4xf32>
    %16 = arith.mulf %5, %15 : vector<16x4xf32>
    %17 = vector.shape_cast %16 : vector<16x4xf32> to vector<1x16x4xf32>
    %18 = tpu.concatenate %14, %3, %17 in 0 : vector<1x16x4xf32>, vector<16x16x4xf32>, vector<1x16x4xf32> -> vector<18x16x4xf32>
    %c16_i32 = arith.constant 16 : i32
    %19 = arith.muli %arg1, %c16_i32 : i32
    %20 = arith.index_cast %19 : i32 to index
    %c0_12 = arith.constant 0 : index
    %21 = vector.load %arg6[%20, %c0_12] : memref<18x8xf32, #tpu.memory_space<vmem>>, vector<18x8xf32>
    %c0_13 = arith.constant 0 : index
    %c0_14 = arith.constant 0 : index
    %c0_15 = arith.constant 0 : index
    %22 = vector.load %arg5[%c0_13, %c0_14, %c0_15] : memref<1x8x32xf32, #tpu.memory_space<vmem>>, vector<1x8x32xf32>
    %23 = vector.shape_cast %22 : vector<1x8x32xf32> to vector<8x32xf32>
    %cst = arith.constant dense<0.000000e+00> : vector<18x32xf32>
    %24 = tpu.matmul %21, %23, %cst {dimension_numbers = #tpu.dot_dimension_numbers<[1], [0], [0], [1], [0, 0, 1, 1], [], []>} : vector<18x8xf32>, vector<8x32xf32>, vector<18x32xf32> -> vector<18x32xf32>
    %25 = vector.shape_cast %24 : vector<18x32xf32> to vector<18x8x4xf32>
    %26 = tpu.transpose %25, [0, 2, 1] : vector<18x8x4xf32> -> vector<18x4x8xf32>
    %27 = vector.shape_cast %26 : vector<18x4x8xf32> to vector<72x8xf32>
    %c0_16 = arith.constant 0 : index
    %c0_17 = arith.constant 0 : index
    %28 = vector.load %arg7[%c0_16, %c0_17] : memref<8x16xf32, #tpu.memory_space<vmem>>, vector<8x16xf32>
    %cst_18 = arith.constant dense<0.000000e+00> : vector<72x16xf32>
    %29 = tpu.matmul %27, %28, %cst_18 {dimension_numbers = #tpu.dot_dimension_numbers<[1], [0], [0], [1], [0, 0, 1, 1], [], []>} : vector<72x8xf32>, vector<8x16xf32>, vector<72x16xf32> -> vector<72x16xf32>
    %30 = vector.shape_cast %29 : vector<72x16xf32> to vector<18x4x16xf32>
    %31 = tpu.transpose %30, [0, 2, 1] : vector<18x4x16xf32> -> vector<18x16x4xf32>
    %32 = tpu.concatenate %18, %31 in 2 : vector<18x16x4xf32>, vector<18x16x4xf32> -> vector<18x16x8xf32>
    %cst_19 = arith.constant 0.000000e+00 : f32
    %33 = vector.broadcast %cst_19 : f32 to vector<18x1x8xf32>
    %34 = tpu.concatenate %33, %32, %33 in 1 : vector<18x1x8xf32>, vector<18x16x8xf32>, vector<18x1x8xf32> -> vector<18x18x8xf32>
    %35 = arith.truncf %34 : vector<18x18x8xf32> to vector<18x18x8xbf16>
    %36 = vector.extract_strided_slice %35 {offsets = [0, 0, 0], sizes = [16, 16, 8], strides = [1, 1, 1]} : vector<18x18x8xbf16> to vector<16x16x8xbf16>
    %37 = vector.shape_cast %36 : vector<16x16x8xbf16> to vector<256x8xbf16>
    %38 = vector.extract_strided_slice %35 {offsets = [0, 1, 0], sizes = [16, 16, 8], strides = [1, 1, 1]} : vector<18x18x8xbf16> to vector<16x16x8xbf16>
    %39 = vector.shape_cast %38 : vector<16x16x8xbf16> to vector<256x8xbf16>
    %40 = vector.extract_strided_slice %35 {offsets = [0, 2, 0], sizes = [16, 16, 8], strides = [1, 1, 1]} : vector<18x18x8xbf16> to vector<16x16x8xbf16>
    %41 = vector.shape_cast %40 : vector<16x16x8xbf16> to vector<256x8xbf16>
    %42 = vector.extract_strided_slice %35 {offsets = [1, 0, 0], sizes = [16, 16, 8], strides = [1, 1, 1]} : vector<18x18x8xbf16> to vector<16x16x8xbf16>
    %43 = vector.shape_cast %42 : vector<16x16x8xbf16> to vector<256x8xbf16>
    %44 = vector.extract_strided_slice %35 {offsets = [1, 1, 0], sizes = [16, 16, 8], strides = [1, 1, 1]} : vector<18x18x8xbf16> to vector<16x16x8xbf16>
    %45 = vector.shape_cast %44 : vector<16x16x8xbf16> to vector<256x8xbf16>
    %46 = vector.extract_strided_slice %35 {offsets = [1, 2, 0], sizes = [16, 16, 8], strides = [1, 1, 1]} : vector<18x18x8xbf16> to vector<16x16x8xbf16>
    %47 = vector.shape_cast %46 : vector<16x16x8xbf16> to vector<256x8xbf16>
    %48 = vector.extract_strided_slice %35 {offsets = [2, 0, 0], sizes = [16, 16, 8], strides = [1, 1, 1]} : vector<18x18x8xbf16> to vector<16x16x8xbf16>
    %49 = vector.shape_cast %48 : vector<16x16x8xbf16> to vector<256x8xbf16>
    %50 = vector.extract_strided_slice %35 {offsets = [2, 1, 0], sizes = [16, 16, 8], strides = [1, 1, 1]} : vector<18x18x8xbf16> to vector<16x16x8xbf16>
    %51 = vector.shape_cast %50 : vector<16x16x8xbf16> to vector<256x8xbf16>
    %52 = vector.extract_strided_slice %35 {offsets = [2, 2, 0], sizes = [16, 16, 8], strides = [1, 1, 1]} : vector<18x18x8xbf16> to vector<16x16x8xbf16>
    %53 = vector.shape_cast %52 : vector<16x16x8xbf16> to vector<256x8xbf16>
    %54 = tpu.concatenate %37, %39, %41, %43, %45, %47, %49, %51, %53 in 1 : vector<256x8xbf16>, vector<256x8xbf16>, vector<256x8xbf16>, vector<256x8xbf16>, vector<256x8xbf16>, vector<256x8xbf16>, vector<256x8xbf16>, vector<256x8xbf16>, vector<256x8xbf16> -> vector<256x72xbf16>
    %c0_20 = arith.constant 0 : index
    %c0_21 = arith.constant 0 : index
    %55 = vector.load %arg8[%c0_20, %c0_21] : memref<72x4xbf16, #tpu.memory_space<vmem>>, vector<72x4xbf16>
    %cst_22 = arith.constant dense<0.000000e+00> : vector<256x4xf32>
    %56 = tpu.matmul %54, %55, %cst_22 {dimension_numbers = #tpu.dot_dimension_numbers<[1], [0], [0], [1], [0, 0, 1, 1], [], []>} : vector<256x72xbf16>, vector<72x4xbf16>, vector<256x4xf32> -> vector<256x4xf32>
    %57 = vector.shape_cast %56 : vector<256x4xf32> to vector<16x16x4xf32>
    %58 = arith.truncf %57 : vector<16x16x4xf32> to vector<16x16x4xbf16>
    %c0_23 = arith.constant 0 : index
    %c0_24 = arith.constant 0 : index
    %c0_25 = arith.constant 0 : index
    %c0_26 = arith.constant 0 : index
    %59 = vector.load %arg9[%c0_23, %c0_24, %c0_25, %c0_26] : memref<1x16x16x4xbf16, #tpu.memory_space<vmem>>, vector<1x16x16x4xbf16>
    %60 = vector.shape_cast %59 : vector<1x16x16x4xbf16> to vector<16x16x4xbf16>
    %61 = vector.shape_cast %58 : vector<16x16x4xbf16> to vector<1x16x16x4xbf16>
    tpu.vector_store %arg9[%c0_23, %c0_24, %c0_25, %c0_26], %61 {strides = array<i32>} : memref<1x16x16x4xbf16, #tpu.memory_space<vmem>>, vector<1x16x16x4xbf16>,
    %cst_27 = arith.constant dense<0.000000e+00> : vector<4xf32>
    %62 = vector.multi_reduction <add>, %56, %cst_27 [0] : vector<256x4xf32> to vector<4xf32>
    %63 = vector.shape_cast %62 : vector<4xf32> to vector<1x4xf32>
    %64 = arith.mulf %56, %56 : vector<256x4xf32>
    %cst_28 = arith.constant dense<0.000000e+00> : vector<4xf32>
    %65 = vector.multi_reduction <add>, %64, %cst_28 [0] : vector<256x4xf32> to vector<4xf32>
    %66 = vector.shape_cast %65 : vector<4xf32> to vector<1x4xf32>
    %67 = tpu.concatenate %63, %66 in 0 : vector<1x4xf32>, vector<1x4xf32> -> vector<2x4xf32>
    %c0_29 = arith.constant 0 : index
    %c0_30 = arith.constant 0 : index
    %c0_31 = arith.constant 0 : index
    %c0_32 = arith.constant 0 : index
    %68 = vector.load %arg10[%c0_29, %c0_30, %c0_31, %c0_32] : memref<1x1x2x4xf32, #tpu.memory_space<vmem>>, vector<1x1x2x4xf32>
    %69 = vector.shape_cast %68 : vector<1x1x2x4xf32> to vector<2x4xf32>
    %70 = vector.shape_cast %67 : vector<2x4xf32> to vector<1x1x2x4xf32>
    tpu.vector_store %arg10[%c0_29, %c0_30, %c0_31, %c0_32], %70 {strides = array<i32>} : memref<1x1x2x4xf32, #tpu.memory_space<vmem>>, vector<1x1x2x4xf32>,
    return
  }
  func.func @transform_0(%arg0: i32, %arg1: i32) -> (i32, i32, i32, i32) {
    %c16_i32 = arith.constant 16 : i32
    %0 = arith.muli %arg1, %c16_i32 : i32
    %c1_i32 = arith.constant 1 : i32
    %1 = arith.subi %0, %c1_i32 : i32
    %c0_i32 = arith.constant 0 : i32
    %2 = arith.maxsi %1, %c0_i32 : i32
    %c0_i32_0 = arith.constant 0 : i32
    %c0_i32_1 = arith.constant 0 : i32
    %c0_i32_2 = arith.constant 0 : i32
    return %arg0, %2, %c0_i32_0, %c0_i32_1 : i32, i32, i32, i32
  }
  func.func @transform_1(%arg0: i32, %arg1: i32) -> (i32, i32, i32, i32) {
    %c0_i32 = arith.constant 0 : i32
    %c0_i32_0 = arith.constant 0 : i32
    %c0_i32_1 = arith.constant 0 : i32
    return %arg0, %arg1, %c0_i32, %c0_i32_0 : i32, i32, i32, i32
  }
  func.func @transform_2(%arg0: i32, %arg1: i32) -> (i32, i32, i32, i32) {
    %c1_i32 = arith.constant 1 : i32
    %0 = arith.addi %arg1, %c1_i32 : i32
    %c16_i32 = arith.constant 16 : i32
    %1 = arith.muli %0, %c16_i32 : i32
    %c15_i32 = arith.constant 15 : i32
    %2 = arith.minsi %1, %c15_i32 : i32
    %c0_i32 = arith.constant 0 : i32
    %c0_i32_0 = arith.constant 0 : i32
    %c0_i32_1 = arith.constant 0 : i32
    return %arg0, %2, %c0_i32, %c0_i32_0 : i32, i32, i32, i32
  }
  func.func @transform_3(%arg0: i32, %arg1: i32) -> (i32, i32, i32) {
    %c0_i32 = arith.constant 0 : i32
    %c0_i32_0 = arith.constant 0 : i32
    %c0_i32_1 = arith.constant 0 : i32
    return %arg0, %c0_i32, %c0_i32_0 : i32, i32, i32
  }
  func.func @transform_4(%arg0: i32, %arg1: i32) -> (i32, i32) {
    %c0_i32 = arith.constant 0 : i32
    %c0_i32_0 = arith.constant 0 : i32
    %c0_i32_1 = arith.constant 0 : i32
    return %c0_i32, %c0_i32_0 : i32, i32
  }
  func.func @transform_5(%arg0: i32, %arg1: i32) -> (i32, i32) {
    %c0_i32 = arith.constant 0 : i32
    %c0_i32_0 = arith.constant 0 : i32
    %c0_i32_1 = arith.constant 0 : i32
    return %c0_i32, %c0_i32_0 : i32, i32
  }
  func.func @transform_6(%arg0: i32, %arg1: i32) -> (i32, i32) {
    %c0_i32 = arith.constant 0 : i32
    %c0_i32_0 = arith.constant 0 : i32
    %c0_i32_1 = arith.constant 0 : i32
    return %c0_i32, %c0_i32_0 : i32, i32
  }
  func.func @transform_7(%arg0: i32, %arg1: i32) -> (i32, i32, i32, i32) {
    %c0_i32 = arith.constant 0 : i32
    %c0_i32_0 = arith.constant 0 : i32
    %c0_i32_1 = arith.constant 0 : i32
    return %arg0, %arg1, %c0_i32, %c0_i32_0 : i32, i32, i32, i32
  }
  func.func @transform_8(%arg0: i32, %arg1: i32) -> (i32, i32, i32, i32) {
    %c0_i32 = arith.constant 0 : i32
    %c0_i32_0 = arith.constant 0 : i32
    %c0_i32_1 = arith.constant 0 : i32
    return %arg0, %arg1, %c0_i32, %c0_i32_0 : i32, i32, i32, i32
  }
}

module attributes {stable_mosaic.version = 11 : i64} {
  func.func @_bn_relu_kernel(%arg0: i32, %arg1: i32, %arg2: memref<1x16x16x4xf32, #tpu.memory_space<vmem>>, %arg3: memref<1x4xf32, #tpu.memory_space<vmem>>, %arg4: memref<1x4xf32, #tpu.memory_space<vmem>>, %arg5: memref<1x16x16x4xf32, #tpu.memory_space<vmem>>) attributes {dimension_semantics = [#tpu.dimension_semantics<parallel>, #tpu.dimension_semantics<parallel>], iteration_bounds = array<i64: 2, 1>, scalar_prefetch = 0 : i64, scratch_operands = 0 : i64, tpu.core_type = #tpu.core_type<tc>, window_params = [{transform_indices = @transform_0, window_bounds = array<i64: 1, 16, 16, 4>}, {pipeline_mode = #tpu.pipeline_mode<synchronous>, transform_indices = @transform_1, window_bounds = array<i64: 1, 4>}, {pipeline_mode = #tpu.pipeline_mode<synchronous>, transform_indices = @transform_2, window_bounds = array<i64: 1, 4>}, {transform_indices = @transform_3, window_bounds = array<i64: 1, 16, 16, 4>}]} {
    %c0 = arith.constant 0 : index
    %c0_0 = arith.constant 0 : index
    %c0_1 = arith.constant 0 : index
    %c0_2 = arith.constant 0 : index
    %0 = vector.load %arg2[%c0, %c0_0, %c0_1, %c0_2] : memref<1x16x16x4xf32, #tpu.memory_space<vmem>>, vector<1x16x16x4xf32>
    %c0_3 = arith.constant 0 : index
    %c0_4 = arith.constant 0 : index
    %1 = vector.load %arg3[%c0_3, %c0_4] : memref<1x4xf32, #tpu.memory_space<vmem>>, vector<1x4xf32>
    %2 = vector.shape_cast %1 : vector<1x4xf32> to vector<4xf32>
    %3 = vector.shape_cast %2 : vector<4xf32> to vector<1x1x1x4xf32>
    %4 = vector.broadcast %3 : vector<1x1x1x4xf32> to vector<1x16x16x4xf32>
    %5 = arith.mulf %0, %4 : vector<1x16x16x4xf32>
    %c0_5 = arith.constant 0 : index
    %c0_6 = arith.constant 0 : index
    %6 = vector.load %arg4[%c0_5, %c0_6] : memref<1x4xf32, #tpu.memory_space<vmem>>, vector<1x4xf32>
    %7 = vector.shape_cast %6 : vector<1x4xf32> to vector<4xf32>
    %8 = vector.shape_cast %7 : vector<4xf32> to vector<1x1x1x4xf32>
    %9 = vector.broadcast %8 : vector<1x1x1x4xf32> to vector<1x16x16x4xf32>
    %10 = arith.addf %5, %9 : vector<1x16x16x4xf32>
    %cst = arith.constant 0.000000e+00 : f32
    %11 = vector.broadcast %cst : f32 to vector<1x16x16x4xf32>
    %12 = arith.maximumf %10, %11 : vector<1x16x16x4xf32>
    %c0_7 = arith.constant 0 : index
    %c0_8 = arith.constant 0 : index
    %c0_9 = arith.constant 0 : index
    %c0_10 = arith.constant 0 : index
    %13 = vector.load %arg5[%c0_7, %c0_8, %c0_9, %c0_10] : memref<1x16x16x4xf32, #tpu.memory_space<vmem>>, vector<1x16x16x4xf32>
    tpu.vector_store %arg5[%c0_7, %c0_8, %c0_9, %c0_10], %12 {strides = array<i32>} : memref<1x16x16x4xf32, #tpu.memory_space<vmem>>, vector<1x16x16x4xf32>,
    return
  }
  func.func @transform_0(%arg0: i32, %arg1: i32) -> (i32, i32, i32, i32) {
    %c0_i32 = arith.constant 0 : i32
    %c0_i32_0 = arith.constant 0 : i32
    %c0_i32_1 = arith.constant 0 : i32
    return %arg0, %arg1, %c0_i32, %c0_i32_0 : i32, i32, i32, i32
  }
  func.func @transform_1(%arg0: i32, %arg1: i32) -> (i32, i32) {
    %c0_i32 = arith.constant 0 : i32
    %c0_i32_0 = arith.constant 0 : i32
    %c0_i32_1 = arith.constant 0 : i32
    return %c0_i32, %c0_i32_0 : i32, i32
  }
  func.func @transform_2(%arg0: i32, %arg1: i32) -> (i32, i32) {
    %c0_i32 = arith.constant 0 : i32
    %c0_i32_0 = arith.constant 0 : i32
    %c0_i32_1 = arith.constant 0 : i32
    return %c0_i32, %c0_i32_0 : i32, i32
  }
  func.func @transform_3(%arg0: i32, %arg1: i32) -> (i32, i32, i32, i32) {
    %c0_i32 = arith.constant 0 : i32
    %c0_i32_0 = arith.constant 0 : i32
    %c0_i32_1 = arith.constant 0 : i32
    return %arg0, %arg1, %c0_i32, %c0_i32_0 : i32, i32, i32, i32
  }
}

module attributes {stable_mosaic.version = 11 : i64} {
  func.func @kernel(%arg0: i32, %arg1: i32, %arg2: memref<1x1x16x4xbf16, #tpu.memory_space<vmem>>, %arg3: memref<1x16x16x4xbf16, #tpu.memory_space<vmem>>, %arg4: memref<1x1x16x4xbf16, #tpu.memory_space<vmem>>, %arg5: memref<1x4xf32, #tpu.memory_space<vmem>>, %arg6: memref<1x4xf32, #tpu.memory_space<vmem>>, %arg7: memref<36x4xbf16, #tpu.memory_space<vmem>>, %arg8: memref<1x16x16x4xf32, #tpu.memory_space<vmem>>, %arg9: memref<1x1x2x4xf32, #tpu.memory_space<vmem>>) attributes {dimension_semantics = [#tpu.dimension_semantics<parallel>, #tpu.dimension_semantics<parallel>], iteration_bounds = array<i64: 2, 1>, scalar_prefetch = 0 : i64, scratch_operands = 0 : i64, tpu.core_type = #tpu.core_type<tc>, window_params = [{transform_indices = @transform_0, window_bounds = array<i64: 1, 1, 16, 4>}, {transform_indices = @transform_1, window_bounds = array<i64: 1, 16, 16, 4>}, {transform_indices = @transform_2, window_bounds = array<i64: 1, 1, 16, 4>}, {pipeline_mode = #tpu.pipeline_mode<synchronous>, transform_indices = @transform_3, window_bounds = array<i64: 1, 4>}, {pipeline_mode = #tpu.pipeline_mode<synchronous>, transform_indices = @transform_4, window_bounds = array<i64: 1, 4>}, {pipeline_mode = #tpu.pipeline_mode<synchronous>, transform_indices = @transform_5, window_bounds = array<i64: 36, 4>}, {transform_indices = @transform_6, window_bounds = array<i64: 1, 16, 16, 4>}, {transform_indices = @transform_7, window_bounds = array<i64: 1, 1, 2, 4>}]} {
    %c0 = arith.constant 0 : index
    %c0_0 = arith.constant 0 : index
    %c0_1 = arith.constant 0 : index
    %c0_2 = arith.constant 0 : index
    %0 = vector.load %arg2[%c0, %c0_0, %c0_1, %c0_2] : memref<1x1x16x4xbf16, #tpu.memory_space<vmem>>, vector<1x1x16x4xbf16>
    %1 = vector.shape_cast %0 : vector<1x1x16x4xbf16> to vector<16x4xbf16>
    %2 = arith.extf %1 : vector<16x4xbf16> to vector<16x4xf32>
    %c0_3 = arith.constant 0 : index
    %c0_4 = arith.constant 0 : index
    %c0_5 = arith.constant 0 : index
    %c0_6 = arith.constant 0 : index
    %3 = vector.load %arg3[%c0_3, %c0_4, %c0_5, %c0_6] : memref<1x16x16x4xbf16, #tpu.memory_space<vmem>>, vector<1x16x16x4xbf16>
    %4 = vector.shape_cast %3 : vector<1x16x16x4xbf16> to vector<16x16x4xbf16>
    %5 = arith.extf %4 : vector<16x16x4xbf16> to vector<16x16x4xf32>
    %c0_7 = arith.constant 0 : index
    %c0_8 = arith.constant 0 : index
    %c0_9 = arith.constant 0 : index
    %c0_10 = arith.constant 0 : index
    %6 = vector.load %arg4[%c0_7, %c0_8, %c0_9, %c0_10] : memref<1x1x16x4xbf16, #tpu.memory_space<vmem>>, vector<1x1x16x4xbf16>
    %7 = vector.shape_cast %6 : vector<1x1x16x4xbf16> to vector<16x4xbf16>
    %8 = arith.extf %7 : vector<16x4xbf16> to vector<16x4xf32>
    %c0_11 = arith.constant 0 : index
    %c0_12 = arith.constant 0 : index
    %9 = vector.load %arg5[%c0_11, %c0_12] : memref<1x4xf32, #tpu.memory_space<vmem>>, vector<1x4xf32>
    %10 = vector.shape_cast %9 : vector<1x4xf32> to vector<4xf32>
    %c0_13 = arith.constant 0 : index
    %c0_14 = arith.constant 0 : index
    %11 = vector.load %arg6[%c0_13, %c0_14] : memref<1x4xf32, #tpu.memory_space<vmem>>, vector<1x4xf32>
    %12 = vector.shape_cast %11 : vector<1x4xf32> to vector<4xf32>
    %13 = vector.shape_cast %10 : vector<4xf32> to vector<1x4xf32>
    %14 = vector.broadcast %13 : vector<1x4xf32> to vector<16x4xf32>
    %15 = arith.mulf %2, %14 : vector<16x4xf32>
    %16 = vector.shape_cast %12 : vector<4xf32> to vector<1x4xf32>
    %17 = vector.broadcast %16 : vector<1x4xf32> to vector<16x4xf32>
    %18 = arith.addf %15, %17 : vector<16x4xf32>
    %cst = arith.constant 0.000000e+00 : f32
    %19 = vector.broadcast %cst : f32 to vector<16x4xf32>
    %20 = arith.maximumf %18, %19 : vector<16x4xf32>
    %21 = vector.shape_cast %10 : vector<4xf32> to vector<1x1x4xf32>
    %22 = vector.broadcast %21 : vector<1x1x4xf32> to vector<16x16x4xf32>
    %23 = arith.mulf %5, %22 : vector<16x16x4xf32>
    %24 = vector.shape_cast %12 : vector<4xf32> to vector<1x1x4xf32>
    %25 = vector.broadcast %24 : vector<1x1x4xf32> to vector<16x16x4xf32>
    %26 = arith.addf %23, %25 : vector<16x16x4xf32>
    %cst_15 = arith.constant 0.000000e+00 : f32
    %27 = vector.broadcast %cst_15 : f32 to vector<16x16x4xf32>
    %28 = arith.maximumf %26, %27 : vector<16x16x4xf32>
    %29 = vector.shape_cast %10 : vector<4xf32> to vector<1x4xf32>
    %30 = vector.broadcast %29 : vector<1x4xf32> to vector<16x4xf32>
    %31 = arith.mulf %8, %30 : vector<16x4xf32>
    %32 = vector.shape_cast %12 : vector<4xf32> to vector<1x4xf32>
    %33 = vector.broadcast %32 : vector<1x4xf32> to vector<16x4xf32>
    %34 = arith.addf %31, %33 : vector<16x4xf32>
    %cst_16 = arith.constant 0.000000e+00 : f32
    %35 = vector.broadcast %cst_16 : f32 to vector<16x4xf32>
    %36 = arith.maximumf %34, %35 : vector<16x4xf32>
    %c0_i32 = arith.constant 0 : i32
    %37 = arith.cmpi sgt, %arg1, %c0_i32 : i32
    %38 = arith.extui %37 : i1 to i32
    %39 = arith.sitofp %38 : i32 to f32
    %c0_i32_17 = arith.constant 0 : i32
    %40 = arith.cmpi slt, %arg1, %c0_i32_17 : i32
    %41 = arith.extui %40 : i1 to i32
    %42 = arith.sitofp %41 : i32 to f32
    %43 = vector.broadcast %39 : f32 to vector<16x4xf32>
    %44 = arith.mulf %20, %43 : vector<16x4xf32>
    %45 = vector.shape_cast %44 : vector<16x4xf32> to vector<1x16x4xf32>
    %46 = vector.broadcast %42 : f32 to vector<16x4xf32>
    %47 = arith.mulf %36, %46 : vector<16x4xf32>
    %48 = vector.shape_cast %47 : vector<16x4xf32> to vector<1x16x4xf32>
    %49 = tpu.concatenate %45, %28, %48 in 0 : vector<1x16x4xf32>, vector<16x16x4xf32>, vector<1x16x4xf32> -> vector<18x16x4xf32>
    %cst_18 = arith.constant 0.000000e+00 : f32
    %50 = vector.broadcast %cst_18 : f32 to vector<18x1x4xf32>
    %51 = tpu.concatenate %50, %49, %50 in 1 : vector<18x1x4xf32>, vector<18x16x4xf32>, vector<18x1x4xf32> -> vector<18x18x4xf32>
    %52 = arith.truncf %51 : vector<18x18x4xf32> to vector<18x18x4xbf16>
    %53 = vector.extract_strided_slice %52 {offsets = [0, 0, 0], sizes = [16, 16, 4], strides = [1, 1, 1]} : vector<18x18x4xbf16> to vector<16x16x4xbf16>
    %54 = vector.shape_cast %53 : vector<16x16x4xbf16> to vector<256x4xbf16>
    %55 = vector.extract_strided_slice %52 {offsets = [0, 1, 0], sizes = [16, 16, 4], strides = [1, 1, 1]} : vector<18x18x4xbf16> to vector<16x16x4xbf16>
    %56 = vector.shape_cast %55 : vector<16x16x4xbf16> to vector<256x4xbf16>
    %57 = vector.extract_strided_slice %52 {offsets = [0, 2, 0], sizes = [16, 16, 4], strides = [1, 1, 1]} : vector<18x18x4xbf16> to vector<16x16x4xbf16>
    %58 = vector.shape_cast %57 : vector<16x16x4xbf16> to vector<256x4xbf16>
    %59 = vector.extract_strided_slice %52 {offsets = [1, 0, 0], sizes = [16, 16, 4], strides = [1, 1, 1]} : vector<18x18x4xbf16> to vector<16x16x4xbf16>
    %60 = vector.shape_cast %59 : vector<16x16x4xbf16> to vector<256x4xbf16>
    %61 = vector.extract_strided_slice %52 {offsets = [1, 1, 0], sizes = [16, 16, 4], strides = [1, 1, 1]} : vector<18x18x4xbf16> to vector<16x16x4xbf16>
    %62 = vector.shape_cast %61 : vector<16x16x4xbf16> to vector<256x4xbf16>
    %63 = vector.extract_strided_slice %52 {offsets = [1, 2, 0], sizes = [16, 16, 4], strides = [1, 1, 1]} : vector<18x18x4xbf16> to vector<16x16x4xbf16>
    %64 = vector.shape_cast %63 : vector<16x16x4xbf16> to vector<256x4xbf16>
    %65 = vector.extract_strided_slice %52 {offsets = [2, 0, 0], sizes = [16, 16, 4], strides = [1, 1, 1]} : vector<18x18x4xbf16> to vector<16x16x4xbf16>
    %66 = vector.shape_cast %65 : vector<16x16x4xbf16> to vector<256x4xbf16>
    %67 = vector.extract_strided_slice %52 {offsets = [2, 1, 0], sizes = [16, 16, 4], strides = [1, 1, 1]} : vector<18x18x4xbf16> to vector<16x16x4xbf16>
    %68 = vector.shape_cast %67 : vector<16x16x4xbf16> to vector<256x4xbf16>
    %69 = vector.extract_strided_slice %52 {offsets = [2, 2, 0], sizes = [16, 16, 4], strides = [1, 1, 1]} : vector<18x18x4xbf16> to vector<16x16x4xbf16>
    %70 = vector.shape_cast %69 : vector<16x16x4xbf16> to vector<256x4xbf16>
    %71 = tpu.concatenate %54, %56, %58, %60, %62, %64, %66, %68, %70 in 1 : vector<256x4xbf16>, vector<256x4xbf16>, vector<256x4xbf16>, vector<256x4xbf16>, vector<256x4xbf16>, vector<256x4xbf16>, vector<256x4xbf16>, vector<256x4xbf16>, vector<256x4xbf16> -> vector<256x36xbf16>
    %c0_19 = arith.constant 0 : index
    %c0_20 = arith.constant 0 : index
    %72 = vector.load %arg7[%c0_19, %c0_20] : memref<36x4xbf16, #tpu.memory_space<vmem>>, vector<36x4xbf16>
    %cst_21 = arith.constant dense<0.000000e+00> : vector<256x4xf32>
    %73 = tpu.matmul %71, %72, %cst_21 {dimension_numbers = #tpu.dot_dimension_numbers<[1], [0], [0], [1], [0, 0, 1, 1], [], []>} : vector<256x36xbf16>, vector<36x4xbf16>, vector<256x4xf32> -> vector<256x4xf32>
    %74 = vector.shape_cast %73 : vector<256x4xf32> to vector<16x16x4xf32>
    %c0_22 = arith.constant 0 : index
    %c0_23 = arith.constant 0 : index
    %c0_24 = arith.constant 0 : index
    %c0_25 = arith.constant 0 : index
    %75 = vector.load %arg8[%c0_22, %c0_23, %c0_24, %c0_25] : memref<1x16x16x4xf32, #tpu.memory_space<vmem>>, vector<1x16x16x4xf32>
    %76 = vector.shape_cast %75 : vector<1x16x16x4xf32> to vector<16x16x4xf32>
    %77 = vector.shape_cast %74 : vector<16x16x4xf32> to vector<1x16x16x4xf32>
    tpu.vector_store %arg8[%c0_22, %c0_23, %c0_24, %c0_25], %77 {strides = array<i32>} : memref<1x16x16x4xf32, #tpu.memory_space<vmem>>, vector<1x16x16x4xf32>,
    %cst_26 = arith.constant dense<0.000000e+00> : vector<4xf32>
    %78 = vector.multi_reduction <add>, %73, %cst_26 [0] : vector<256x4xf32> to vector<4xf32>
    %79 = vector.shape_cast %78 : vector<4xf32> to vector<1x4xf32>
    %80 = arith.mulf %73, %73 : vector<256x4xf32>
    %cst_27 = arith.constant dense<0.000000e+00> : vector<4xf32>
    %81 = vector.multi_reduction <add>, %80, %cst_27 [0] : vector<256x4xf32> to vector<4xf32>
    %82 = vector.shape_cast %81 : vector<4xf32> to vector<1x4xf32>
    %83 = tpu.concatenate %79, %82 in 0 : vector<1x4xf32>, vector<1x4xf32> -> vector<2x4xf32>
    %c0_28 = arith.constant 0 : index
    %c0_29 = arith.constant 0 : index
    %c0_30 = arith.constant 0 : index
    %c0_31 = arith.constant 0 : index
    %84 = vector.load %arg9[%c0_28, %c0_29, %c0_30, %c0_31] : memref<1x1x2x4xf32, #tpu.memory_space<vmem>>, vector<1x1x2x4xf32>
    %85 = vector.shape_cast %84 : vector<1x1x2x4xf32> to vector<2x4xf32>
    %86 = vector.shape_cast %83 : vector<2x4xf32> to vector<1x1x2x4xf32>
    tpu.vector_store %arg9[%c0_28, %c0_29, %c0_30, %c0_31], %86 {strides = array<i32>} : memref<1x1x2x4xf32, #tpu.memory_space<vmem>>, vector<1x1x2x4xf32>,
    return
  }
  func.func @transform_0(%arg0: i32, %arg1: i32) -> (i32, i32, i32, i32) {
    %c16_i32 = arith.constant 16 : i32
    %0 = arith.muli %arg1, %c16_i32 : i32
    %c1_i32 = arith.constant 1 : i32
    %1 = arith.subi %0, %c1_i32 : i32
    %c0_i32 = arith.constant 0 : i32
    %2 = arith.maxsi %1, %c0_i32 : i32
    %c0_i32_0 = arith.constant 0 : i32
    %c0_i32_1 = arith.constant 0 : i32
    %c0_i32_2 = arith.constant 0 : i32
    return %arg0, %2, %c0_i32_0, %c0_i32_1 : i32, i32, i32, i32
  }
  func.func @transform_1(%arg0: i32, %arg1: i32) -> (i32, i32, i32, i32) {
    %c0_i32 = arith.constant 0 : i32
    %c0_i32_0 = arith.constant 0 : i32
    %c0_i32_1 = arith.constant 0 : i32
    return %arg0, %arg1, %c0_i32, %c0_i32_0 : i32, i32, i32, i32
  }
  func.func @transform_2(%arg0: i32, %arg1: i32) -> (i32, i32, i32, i32) {
    %c1_i32 = arith.constant 1 : i32
    %0 = arith.addi %arg1, %c1_i32 : i32
    %c16_i32 = arith.constant 16 : i32
    %1 = arith.muli %0, %c16_i32 : i32
    %c15_i32 = arith.constant 15 : i32
    %2 = arith.minsi %1, %c15_i32 : i32
    %c0_i32 = arith.constant 0 : i32
    %c0_i32_0 = arith.constant 0 : i32
    %c0_i32_1 = arith.constant 0 : i32
    return %arg0, %2, %c0_i32, %c0_i32_0 : i32, i32, i32, i32
  }
  func.func @transform_3(%arg0: i32, %arg1: i32) -> (i32, i32) {
    %c0_i32 = arith.constant 0 : i32
    %c0_i32_0 = arith.constant 0 : i32
    %c0_i32_1 = arith.constant 0 : i32
    return %c0_i32, %c0_i32_0 : i32, i32
  }
  func.func @transform_4(%arg0: i32, %arg1: i32) -> (i32, i32) {
    %c0_i32 = arith.constant 0 : i32
    %c0_i32_0 = arith.constant 0 : i32
    %c0_i32_1 = arith.constant 0 : i32
    return %c0_i32, %c0_i32_0 : i32, i32
  }
  func.func @transform_5(%arg0: i32, %arg1: i32) -> (i32, i32) {
    %c0_i32 = arith.constant 0 : i32
    %c0_i32_0 = arith.constant 0 : i32
    %c0_i32_1 = arith.constant 0 : i32
    return %c0_i32, %c0_i32_0 : i32, i32
  }
  func.func @transform_6(%arg0: i32, %arg1: i32) -> (i32, i32, i32, i32) {
    %c0_i32 = arith.constant 0 : i32
    %c0_i32_0 = arith.constant 0 : i32
    %c0_i32_1 = arith.constant 0 : i32
    return %arg0, %arg1, %c0_i32, %c0_i32_0 : i32, i32, i32, i32
  }
  func.func @transform_7(%arg0: i32, %arg1: i32) -> (i32, i32, i32, i32) {
    %c0_i32 = arith.constant 0 : i32
    %c0_i32_0 = arith.constant 0 : i32
    %c0_i32_1 = arith.constant 0 : i32
    return %arg0, %arg1, %c0_i32, %c0_i32_0 : i32, i32, i32, i32
  }
}

</mosaic_0001>

<bundles_post_ra>
// kernel: up_forward.5
= control target key start
LH: loop header
LB: loop body
LE: loop exit
PB: predicated region body
PF: predicated region fallthrough
CT: control target
= control target key end

     0   :  { %s569_s12 = smov 0   ;;  %s571_s13 = smov 0   ;;  %s776_s0 = inlined_call_operand.vmem [shape: f32[2,16,16,4], index: 0, kind: input, shape index: {}]   ;;  %s777_s1 = inlined_call_operand.vmem [shape: f32[1,4], index: 1, kind: input, shape index: {}]   ;;  %s778_s2 = inlined_call_operand.vmem [shape: f32[1,4], index: 2, kind: input, shape index: {}]   ;;  %s779_s3 = inlined_call_operand.vmem [shape: f32[2,16,16,4], index: 3, kind: output, shape index: {}]  }
   0x1   :  { %s573_s14 = smov 0  }
   0x2 LB: > { %s25_s15 = sadd.s32 1, %s543_s13  ;;  %p490_p0 = scmp.ge.s32.totalorder %s547_s14, 1  ;;  %s547_s14 = sphi %s573_s14, %s13_s14   ;;  %s543_s13 = sphi %s571_s13, %s781_s13   ;;  %s539_s12 = sphi %s569_s12, %s780_s12  }
   0x3   : > { %p27_p1 = scmp.ge.s32.totalorder %s25_s15, 2  ;;  %p159_p2 = scmp.lt.s32.totalorder %s547_s14, 3 }
   0x5   : > { %s783_s15 = smov (%p27_p1, %s25_s15), 0  ;;  %p160_p3 = pnand %p490_p0, %p159_p2 }
   0x6   : > { %p194_p4 = scmp.lt.s32.totalorder (!%p160_p3), %s539_s12, 1  ;;  %v590_v0 = vld [vmem:[%s777_s1] ss:$0 sm:$0xff] (!%p160_p3)  ;;  %vm357_vm0 = vcmask (!%p160_p3), 31744  }
   0x7   : > { %163 = sbr.rel (%p160_p3) target bundleno = 47 (0x2f), region = 32  ;;  %v600_v1 = vld [vmem:[%s778_s2] ss:$0 sm:$0xff] (!%p160_p3) }
   0xe   : > { %s785_s12 = smov (!%p194_p4, %s539_s12), 1 }
   0xf   : > { %s499_s16 = sshll.u32 %s785_s12, 8 }
  0x10   : > { %s595_s21 = scalar_lea.vmem %s776_s0, %s499_s16  ;;  %s623_s26 = scalar_lea.vmem %s779_s3, %s499_s16 }
  0x11   : > { %v215_v2 = vld [vmem:[%s595_s21] sm:$0xff]  ;;  %v216_v3 = vld [vmem:[%s595_s21 + $0x8] sm:$0xff]  ;;  %v217_v4 = vld [vmem:[%s595_s21 + $0x10] sm:$0xff] }
  0x12   : > { %v254_v5 = vmul.f32 %v590_v0, %v215_v2  ;;  %v255_v6 = vmul.f32 %v590_v0, %v216_v3  ;;  %v256_v7 = vmul.f32 %v590_v0, %v217_v4  ;;  %v218_v8 = vld [vmem:[%s595_s21 + $0x18] sm:$0xff]  ;;  %v219_v9 = vld [vmem:[%s595_s21 + $0x20] sm:$0xff]  ;;  %v220_v10 = vld [vmem:[%s595_s21 + $0x28] sm:$0xff] }
  0x13   : > { %v257_v11 = vmul.f32 %v590_v0, %v218_v8  ;;  %v258_v12 = vmul.f32 %v590_v0, %v219_v9  ;;  %v259_v13 = vmul.f32 %v590_v0, %v220_v10  ;;  %v221_v14 = vld [vmem:[%s595_s21 + $0x30] sm:$0xff]  ;;  %v222_v15 = vld [vmem:[%s595_s21 + $0x38] sm:$0xff]  ;;  %v223_v24 = vld [vmem:[%s595_s21 + $0x40] sm:$0xff] }
  0x14   : > { %v293_v16 = vadd.f32 %v600_v1, %v254_v5  ;;  %v294_v17 = vadd.f32 %v600_v1, %v255_v6  ;;  %v295_v18 = vadd.f32 %v600_v1, %v256_v7  ;;  %v260_v19 = vmul.f32 %v590_v0, %v221_v14  ;;  %v224_v25 = vld [vmem:[%s595_s21 + $0x48] sm:$0xff]  ;;  %v225_v26 = vld [vmem:[%s595_s21 + $0x50] sm:$0xff]  ;;  %v226_v31 = vld [vmem:[%s595_s21 + $0x58] sm:$0xff] }
  0x15   : > { %v296_v20 = vadd.f32 %v600_v1, %v257_v11  ;;  %v297_v21 = vadd.f32 %v600_v1, %v258_v12  ;;  %v298_v22 = vadd.f32 %v600_v1, %v259_v13  ;;  %v261_v23 = vmul.f32 %v590_v0, %v222_v15  ;;  %v227_v32 = vld [vmem:[%s595_s21 + $0x60] sm:$0xff]  ;;  %v228_v33 = vld [vmem:[%s595_s21 + $0x68] sm:$0xff]  ;;  %v229_v38 = vld [vmem:[%s595_s21 + $0x70] sm:$0xff] }
  0x16   : > { %v325_v27 = vmax.f32 %v293_v16, 0.0  ;;  %v326_v28 = vmax.f32 %v294_v17, 0.0  ;;  %v327_v29 = vmax.f32 %v295_v18, 0.0  ;;  %v299_v30 = vadd.f32 %v600_v1, %v260_v19  ;;  %v230_v43 = vld [vmem:[%s595_s21 + $0x78] sm:$0xff]  ;;  %v231_v56 = vld [vmem:[%s595_s21 + $0x80] sm:$0xff]  ;;  %v232_v57 = vld [vmem:[%s595_s21 + $0x88] sm:$0xff] }
  0x17   : > { %v328_v34 = vmax.f32 %v296_v20, 0.0  ;;  %v329_v35 = vmax.f32 %v297_v21, 0.0  ;;  %v330_v36 = vmax.f32 %v298_v22, 0.0  ;;  %v300_v37 = vadd.f32 %v600_v1, %v261_v23  ;;  %v233_v58 = vld [vmem:[%s595_s21 + $0x90] sm:$0xff]  ;;  %v234_v63 = vld [vmem:[%s595_s21 + $0x98] sm:$0xff]  ;;  %v235_v2 = vld [vmem:[%s595_s21 + $0xa0] sm:$0xff] }
  0x18   : > { %358 = vst.msk [vmem:[%s623_s26] sm:$0xff] %vm357_vm0, %v325_v27  ;;  %359 = vst.msk [vmem:[%s623_s26 + $0x8] sm:$0xff] %vm357_vm0, %v326_v28  ;;  %v331_v39 = vmax.f32 %v299_v30, 0.0  ;;  %v262_v40 = vmul.f32 %v590_v0, %v223_v24  ;;  %v263_v41 = vmul.f32 %v590_v0, %v224_v25  ;;  %v264_v42 = vmul.f32 %v590_v0, %v225_v26  ;;  %v236_v3 = vld [vmem:[%s595_s21 + $0xa8] sm:$0xff]  ;;  %v237_v8 = vld [vmem:[%s595_s21 + $0xb0] sm:$0xff] }
  0x19   : > { %360 = vst.msk [vmem:[%s623_s26 + $0x10] sm:$0xff] %vm357_vm0, %v327_v29  ;;  %361 = vst.msk [vmem:[%s623_s26 + $0x18] sm:$0xff] %vm357_vm0, %v328_v34  ;;  %v332_v44 = vmax.f32 %v300_v37, 0.0  ;;  %v265_v45 = vmul.f32 %v590_v0, %v226_v31  ;;  %v266_v46 = vmul.f32 %v590_v0, %v227_v32  ;;  %v267_v47 = vmul.f32 %v590_v0, %v228_v33  ;;  %v238_v13 = vld [vmem:[%s595_s21 + $0xb8] sm:$0xff]  ;;  %v239_v26 = vld [vmem:[%s595_s21 + $0xc0] sm:$0xff] }
  0x1a   : > { %362 = vst.msk [vmem:[%s623_s26 + $0x20] sm:$0xff] %vm357_vm0, %v329_v35  ;;  %363 = vst.msk [vmem:[%s623_s26 + $0x28] sm:$0xff] %vm357_vm0, %v330_v36  ;;  %v301_v48 = vadd.f32 %v600_v1, %v262_v40  ;;  %v302_v49 = vadd.f32 %v600_v1, %v263_v41  ;;  %v303_v50 = vadd.f32 %v600_v1, %v264_v42  ;;  %v240_v27 = vld [vmem:[%s595_s21 + $0xc8] sm:$0xff]  ;;  %v241_v28 = vld [vmem:[%s595_s21 + $0xd0] sm:$0xff] }
  0x1b   : > { %364 = vst.msk [vmem:[%s623_s26 + $0x30] sm:$0xff] %vm357_vm0, %v331_v39  ;;  %v268_v51 = vmul.f32 %v590_v0, %v229_v38  ;;  %365 = vst.msk [vmem:[%s623_s26 + $0x38] sm:$0xff] %vm357_vm0, %v332_v44  ;;  %v304_v52 = vadd.f32 %v600_v1, %v265_v45  ;;  %v305_v53 = vadd.f32 %v600_v1, %v266_v46  ;;  %v242_v33 = vld [vmem:[%s595_s21 + $0xd8] sm:$0xff]  ;;  %v243_v34 = vld [vmem:[%s595_s21 + $0xe0] sm:$0xff] }
  0x1c   : > { %v306_v54 = vadd.f32 %v600_v1, %v267_v47  ;;  %v269_v55 = vmul.f32 %v590_v0, %v230_v43  ;;  %v333_v59 = vmax.f32 %v301_v48, 0.0  ;;  %v334_v60 = vmax.f32 %v302_v49, 0.0  ;;  %v244_v35 = vld [vmem:[%s595_s21 + $0xe8] sm:$0xff]  ;;  %v245_v40 = vld [vmem:[%s595_s21 + $0xf0] sm:$0xff]  ;;  %v246_v45 = vld [vmem:[%s595_s21 + $0xf8] sm:$0xff] }
  0x1d   : > { %v335_v61 = vmax.f32 %v303_v50, 0.0  ;;  %v307_v62 = vadd.f32 %v600_v1, %v268_v51  ;;  %v336_v4 = vmax.f32 %v304_v52, 0.0  ;;  %v337_v5 = vmax.f32 %v305_v53, 0.0 }
  0x1e   : > { %v338_v6 = vmax.f32 %v306_v54, 0.0  ;;  %v308_v7 = vadd.f32 %v600_v1, %v269_v55  ;;  %366 = vst.msk [vmem:[%s623_s26 + $0x40] sm:$0xff] %vm357_vm0, %v333_v59  ;;  %367 = vst.msk [vmem:[%s623_s26 + $0x48] sm:$0xff] %vm357_vm0, %v334_v60  ;;  %v270_v10 = vmul.f32 %v590_v0, %v231_v56  ;;  %v271_v11 = vmul.f32 %v590_v0, %v232_v57 }
  0x1f   : > { %368 = vst.msk [vmem:[%s623_s26 + $0x50] sm:$0xff] %vm357_vm0, %v335_v61  ;;  %v339_v9 = vmax.f32 %v307_v62, 0.0  ;;  %v272_v12 = vmul.f32 %v590_v0, %v233_v58  ;;  %369 = vst.msk [vmem:[%s623_s26 + $0x58] sm:$0xff] %vm357_vm0, %v336_v4  ;;  %v273_v15 = vmul.f32 %v590_v0, %v234_v63  ;;  %v274_v16 = vmul.f32 %v590_v0, %v235_v2 }
  0x20   : > { %370 = vst.msk [vmem:[%s623_s26 + $0x60] sm:$0xff] %vm357_vm0, %v337_v5  ;;  %371 = vst.msk [vmem:[%s623_s26 + $0x68] sm:$0xff] %vm357_vm0, %v338_v6  ;;  %v340_v14 = vmax.f32 %v308_v7, 0.0  ;;  %v275_v17 = vmul.f32 %v590_v0, %v236_v3  ;;  %v309_v18 = vadd.f32 %v600_v1, %v270_v10  ;;  %v310_v19 = vadd.f32 %v600_v1, %v271_v11 }
  0x21   : > { %372 = vst.msk [vmem:[%s623_s26 + $0x70] sm:$0xff] %vm357_vm0, %v339_v9  ;;  %v311_v20 = vadd.f32 %v600_v1, %v272_v12  ;;  %v276_v21 = vmul.f32 %v590_v0, %v237_v8  ;;  %v312_v22 = vadd.f32 %v600_v1, %v273_v15  ;;  %v313_v23 = vadd.f32 %v600_v1, %v274_v16 }
  0x22   : > { %373 = vst.msk [vmem:[%s623_s26 + $0x78] sm:$0xff] %vm357_vm0, %v340_v14  ;;  %v314_v24 = vadd.f32 %v600_v1, %v275_v17  ;;  %v277_v25 = vmul.f32 %v590_v0, %v238_v13  ;;  %v341_v29 = vmax.f32 %v309_v18, 0.0  ;;  %v342_v30 = vmax.f32 %v310_v19, 0.0 }
  0x23   : > { %v343_v31 = vmax.f32 %v311_v20, 0.0  ;;  %v315_v32 = vadd.f32 %v600_v1, %v276_v21  ;;  %v344_v36 = vmax.f32 %v312_v22, 0.0  ;;  %v345_v37 = vmax.f32 %v313_v23, 0.0 }
  0x24   : > { %v346_v38 = vmax.f32 %v314_v24, 0.0  ;;  %v316_v39 = vadd.f32 %v600_v1, %v277_v25  ;;  %374 = vst.msk [vmem:[%s623_s26 + $0x80] sm:$0xff] %vm357_vm0, %v341_v29  ;;  %375 = vst.msk [vmem:[%s623_s26 + $0x88] sm:$0xff] %vm357_vm0, %v342_v30  ;;  %v278_v42 = vmul.f32 %v590_v0, %v239_v26  ;;  %v279_v43 = vmul.f32 %v590_v0, %v240_v27 }
  0x25   : > { %376 = vst.msk [vmem:[%s623_s26 + $0x90] sm:$0xff] %vm357_vm0, %v343_v31  ;;  %v347_v41 = vmax.f32 %v315_v32, 0.0  ;;  %v280_v44 = vmul.f32 %v590_v0, %v241_v28  ;;  %377 = vst.msk [vmem:[%s623_s26 + $0x98] sm:$0xff] %vm357_vm0, %v344_v36  ;;  %v281_v47 = vmul.f32 %v590_v0, %v242_v33  ;;  %v282_v48 = vmul.f32 %v590_v0, %v243_v34 }
  0x26   : > { %378 = vst.msk [vmem:[%s623_s26 + $0xa0] sm:$0xff] %vm357_vm0, %v345_v37  ;;  %379 = vst.msk [vmem:[%s623_s26 + $0xa8] sm:$0xff] %vm357_vm0, %v346_v38  ;;  %v348_v46 = vmax.f32 %v316_v39, 0.0  ;;  %v283_v49 = vmul.f32 %v590_v0, %v244_v35  ;;  %v317_v50 = vadd.f32 %v600_v1, %v278_v42  ;;  %v318_v51 = vadd.f32 %v600_v1, %v279_v43 }
  0x27   : > { %380 = vst.msk [vmem:[%s623_s26 + $0xb0] sm:$0xff] %vm357_vm0, %v347_v41  ;;  %v319_v52 = vadd.f32 %v600_v1, %v280_v44  ;;  %v284_v53 = vmul.f32 %v590_v0, %v245_v40  ;;  %v320_v54 = vadd.f32 %v600_v1, %v281_v47  ;;  %v321_v55 = vadd.f32 %v600_v1, %v282_v48 }
  0x28   : > { %381 = vst.msk [vmem:[%s623_s26 + $0xb8] sm:$0xff] %vm357_vm0, %v348_v46  ;;  %v322_v56 = vadd.f32 %v600_v1, %v283_v49  ;;  %v285_v57 = vmul.f32 %v590_v0, %v246_v45  ;;  %v349_v58 = vmax.f32 %v317_v50, 0.0  ;;  %v350_v59 = vmax.f32 %v318_v51, 0.0 }
  0x29   : > { %v351_v60 = vmax.f32 %v319_v52, 0.0  ;;  %v323_v61 = vadd.f32 %v600_v1, %v284_v53  ;;  %v352_v62 = vmax.f32 %v320_v54, 0.0  ;;  %v353_v63 = vmax.f32 %v321_v55, 0.0 }
  0x2a   : > { %v354_v2 = vmax.f32 %v322_v56, 0.0  ;;  %v324_v3 = vadd.f32 %v600_v1, %v285_v57  ;;  %382 = vst.msk [vmem:[%s623_s26 + $0xc0] sm:$0xff] %vm357_vm0, %v349_v58  ;;  %383 = vst.msk [vmem:[%s623_s26 + $0xc8] sm:$0xff] %vm357_vm0, %v350_v59 }
  0x2b   : > { %384 = vst.msk [vmem:[%s623_s26 + $0xd0] sm:$0xff] %vm357_vm0, %v351_v60  ;;  %v355_v4 = vmax.f32 %v323_v61, 0.0  ;;  %385 = vst.msk [vmem:[%s623_s26 + $0xd8] sm:$0xff] %vm357_vm0, %v352_v62 }
  0x2c   : > { %386 = vst.msk [vmem:[%s623_s26 + $0xe0] sm:$0xff] %vm357_vm0, %v353_v63  ;;  %387 = vst.msk [vmem:[%s623_s26 + $0xe8] sm:$0xff] %vm357_vm0, %v354_v2  ;;  %v356_v0 = vmax.f32 %v324_v3, 0.0 }
  0x2d   : > { %388 = vst.msk [vmem:[%s623_s26 + $0xf0] sm:$0xff] %vm357_vm0, %v355_v4 }
  0x2e   : > { %389 = vst.msk [vmem:[%s623_s26 + $0xf8] sm:$0xff] %vm357_vm0, %v356_v0 }
  0x2f PF: > { %s13_s14 = sadd.s32 1, %s547_s14   ;;  %s780_s12 = smov %s543_s13 }
  0x30   : > { %p10_p5 = scmp.ge.s32.totalorder %s13_s14, 4   ;;  %s781_s13 = smov %s783_s15 }
  0x32   :  { %12 = sbr.rel (!%p10_p5) target bundleno = 2 (0x2), region = 62 }

// kernel: up_forward.4
= control target key start
LH: loop header
LB: loop body
LE: loop exit
PB: predicated region body
PF: predicated region fallthrough
CT: control target
= control target key end

     0   :  { %s2624_s24 = smov 0   ;;  %s2626_s25 = smov 0   ;;  %s3559_s0 = inlined_call_operand.vmem [shape: bf16[2,16,16,4], index: 0, kind: input, shape index: {}, may-alias: {0,1,2}]   ;;  %s3560_s1 = inlined_call_operand.vmem [shape: bf16[2,16,16,4], index: 1, kind: input, shape index: {}, may-alias: {0,1,2}]   ;;  %s3561_s2 = inlined_call_operand.vmem [shape: bf16[2,16,16,4], index: 2, kind: input, shape index: {}, may-alias: {0,1,2}]   ;;  %s3562_s3 = inlined_call_operand.vmem [shape: f32[1,4], index: 3, kind: input, shape index: {}]   ;;  %s3563_s4 = inlined_call_operand.vmem [shape: f32[1,4], index: 4, kind: input, shape index: {}]   ;;  %s3564_s5 = inlined_call_operand.vmem [shape: bf16[36,4], index: 5, kind: input, shape index: {}]   ;;  %s3565_s6 = inlined_call_operand.vmem [shape: f32[2,16,16,4], index: 6, kind: output, shape index: {0}]   ;;  %s3566_s7 = inlined_call_operand.vmem [shape: f32[2,1,2,4], index: 7, kind: output, shape index: {1}]  }
   0x1   :  { %s2628_s26 = smov 0  }
   0x2 LB: > { %s30_s27 = sadd.s32 1, %s2570_s25  ;;  %p2324_p0 = scmp.ge.s32.totalorder %s2574_s26, 1  ;;  %s2574_s26 = sphi %s2628_s26, %s18_s26   ;;  %s2570_s25 = sphi %s2626_s25, %s3568_s25   ;;  %s2566_s24 = sphi %s2624_s24, %s3567_s24  }
   0x3   : > { %p32_p1 = scmp.ge.s32.totalorder %s30_s27, 2  ;;  %p328_p2 = scmp.lt.s32.totalorder %s2574_s26, 3 }
   0x5   : > { %s3570_s27 = smov (%p32_p1, %s30_s27), 0  ;;  %p329_p3 = pnand %p2324_p0, %p328_p2 }
   0x6   : > { %p407_p4 = scmp.lt.s32.totalorder (!%p329_p3), %s2566_s24, 1  ;;  %v2656_v0 = vld [vmem:[%s3562_s3] ss:$0 sm:$0xff] (!%p329_p3)  ;;  %vm709_vm0 = vcmask (!%p329_p3), 1040384   ;;  %vm1115_vm1 = vcmask (!%p329_p3), 1046528   ;;  %s2576_s16 = smov (!%p329_p3), 12  }
   0x7   : > { %332 = sbr.rel (%p329_p3) target bundleno = 639 (0x27f), region = 44  ;;  %v2668_v8 = vld [vmem:[%s3563_s4] ss:$0 sm:$0xff] (!%p329_p3)  ;;  %s2577_s17 = smov (!%p329_p3), 24   ;;  %vm890_vm2 = vsmask.f32 (!%p329_p3), 7424 }
   0x8   : > { %s2578_s18 = smov (!%p329_p3), 20   ;;  %s2579_s19 = smov (!%p329_p3), 8   ;;  %vm1771_vm3 = vcmask (!%p329_p3), 1041408   ;;  %vm1454_vm4 = vcmask (!%p329_p3), 31744   ;;  %vm1487_vm5 = vcmask (!%p329_p3), 64512   ;;  %vm1520_vm6 = vcmask (!%p329_p3), 97280  }
   0x9   : > { %s2580_s22 = smov (!%p329_p3), 4   ;;  %s2581_s30 = smov (!%p329_p3), 16   ;;  %vm1553_vm7 = vcmask (!%p329_p3), 130048   ;;  %vm1586_vm8 = vcmask (!%p329_p3), 162816   ;;  %vm1619_vm9 = vcmask (!%p329_p3), 195584   ;;  %vm1652_vm10 = vcmask (!%p329_p3), 228352  }
   0xa   : > { %s2582_s9 = smov (!%p329_p3), 28   ;;  %s2583_s10 = smov (!%p329_p3), 32   ;;  %vm1738_vm11 = vcmask (!%p329_p3), 293888   ;;  %vm1685_vm12 = vcmask (!%p329_p3), 261120   ;;  %vm2139_vm13 = vcmask (!%p329_p3), 25600  }
   0xe   : > { %s3572_s24 = smov (!%p407_p4, %s2566_s24), 1 }
   0xf   : > { %s2645_s28 = sshll.u32 %s3572_s24, 7 }
  0x10   : > { %s2651_s8 = scalar_lea.vmem %s3560_s1, %s2645_s28  ;;  %s415_s13 = scalar_lea.vmem %s3559_s0, %s2645_s28 }
  0x11   : > { %v2435_v1 = vld [vmem:[%s2651_s8 + $0x8] sm:$0xff]   ;;  %v2367_v2 = vld [vmem:[%s2651_s8] sm:$0xff]   ;;  %v2436_v3 = vld [vmem:[%s2651_s8 + $0x10] sm:$0xff]   ;;  %s2360_s21 = sadd.s32 120, %s2645_s28  ;;  %s2361_s28 = sshll.u32 %s3572_s24, 8 }
  0x12   : > { %v2372_v4 = vunpack.c.l.bf16 %v2435_v1  ;;  %v2373_v5 = vunpack.c.h.bf16 %v2435_v1  ;;  %v2368_v6 = vunpack.c.l.bf16 %v2367_v2  ;;  %v2369_v7 = vunpack.c.h.bf16 %v2367_v2  ;;  %v2363_v11 = vld [vmem:[%s415_s13] sm:$0xff]   ;;  %s443_s29 = scalar_lea.vmem %s3561_s2, %s2360_s21 }
  0x13   : > { %v2376_v9 = vunpack.c.l.bf16 %v2436_v3  ;;  %v2377_v10 = vunpack.c.h.bf16 %v2436_v3  ;;  %v2364_v18 = vunpack.c.l.bf16 %v2363_v11  ;;  %v2365_v19 = vunpack.c.h.bf16 %v2363_v11 }
  0x14   : > { %v561_v12 = vmul.f32 %v2372_v4, %v2656_v0  ;;  %v562_v13 = vmul.f32 %v2373_v5, %v2656_v0  ;;  %v559_v14 = vmul.f32 %v2368_v6, %v2656_v0  ;;  %v560_v15 = vmul.f32 %v2369_v7, %v2656_v0 }
  0x15   : > { %v563_v16 = vmul.f32 %v2376_v9, %v2656_v0  ;;  %v564_v17 = vmul.f32 %v2377_v10, %v2656_v0  ;;  %v547_v26 = vmul.f32 %v2364_v18, %v2656_v0  ;;  %v548_v27 = vmul.f32 %v2365_v19, %v2656_v0  ;;  %v2437_v10 = vld [vmem:[%s2651_s8 + $0x18] sm:$0xff]  }
  0x16   : > { %v593_v20 = vadd.f32 %v2668_v8, %v561_v12  ;;  %v594_v21 = vadd.f32 %v2668_v8, %v562_v13  ;;  %v591_v22 = vadd.f32 %v2668_v8, %v559_v14  ;;  %v592_v23 = vadd.f32 %v2668_v8, %v560_v15 }
  0x17   : > { %v595_v24 = vadd.f32 %v2668_v8, %v563_v16  ;;  %v596_v25 = vadd.f32 %v2668_v8, %v564_v17  ;;  %v555_v34 = vadd.f32 %v2668_v8, %v547_v26  ;;  %v556_v35 = vadd.f32 %v2668_v8, %v548_v27 }
  0x18   : > { %v625_v28 = vmax.f32 %v593_v20, 0.0  ;;  %v626_v29 = vmax.f32 %v594_v21, 0.0  ;;  %v623_v30 = vmax.f32 %v591_v22, 0.0  ;;  %v624_v31 = vmax.f32 %v592_v23, 0.0 }
  0x19   : > { %v627_v32 = vmax.f32 %v595_v24, 0.0  ;;  %v628_v33 = vmax.f32 %v596_v25, 0.0  ;;  %v557_v42 = vmax.f32 %v555_v34, 0.0  ;;  %v558_v43 = vmax.f32 %v556_v35, 0.0 }
  0x1a   : > { %v716_v36 = vrot.slane %v625_v28, 7  ;;  %v717_v37 = vrot.slane %v626_v29, 7  ;;  %v713_v38 = vrot.slane %v623_v30, 7  ;;  %v714_v39 = vrot.slane %v624_v31, 7  ;;  %v2547_v29 = vld [vmem:[%s3564_s5] sm:$0xff]  }
  0x1b   : > { %v719_v40 = vrot.slane %v627_v32, 7  ;;  %v720_v41 = vrot.slane %v628_v33, 7  ;;  %v668_v54 = vmul.f32 0.0, %v557_v42  ;;  %v669_v61 = vmul.f32 0.0, %v558_v43  ;;  %v2438_v32 = vld [vmem:[%s2651_s8 + $0x20] sm:$0xff]   ;;  %2469 = vmatprep.subr.bf16.mxu0 %v2547_v29  ;;  %2507 = vmatprep.subr.bf16.mxu1 %v2547_v29 }
  0x1c   : > { %v718_v44 = vsel %vm709_vm0, %v716_v36, %v717_v37  ;;  %v820_v45 = vsel %vm709_vm0, 0.0, %v716_v36  ;;  %v715_v46 = vsel %vm709_vm0, %v713_v38, %v714_v39  ;;  %v819_v47 = vsel %vm709_vm0, 0.0, %v713_v38  ;;  %2470 = vmatpush3.bf16.msra.mxu0 %v2547_v29  ;;  %2510 = vmatpush3.bf16.msra.mxu1 %v2547_v29 }
  0x1d   : > { %v2690_v48 = vpack.c.bf16 %v718_v44, %v820_v45  ;;  %v2692_v49 = vpack.c.bf16 %v715_v46, %v819_v47  ;;  %v721_v50 = vsel %vm709_vm0, %v719_v40, %v720_v41  ;;  %v821_v51 = vsel %vm709_vm0, 0.0, %v719_v40  ;;  %v2548_v44 = vld [vmem:[%s3564_s5 + $0x8] sm:$0xff]  }
  0x1e   : > { %v837_v52 = vsel %vm709_vm0, %v714_v39, 0.0  ;;  %v838_v53 = vsel %vm709_vm0, %v717_v37, 0.0  ;;  %v2702_v55 = vpack.c.bf16 %v721_v50, %v821_v51  ;;  %v710_v62 = vrot.slane %v668_v54, 7  ;;  %2471 = vmatprep.subr.bf16.mxu0 %v2548_v44  ;;  %2508 = vmatprep.subr.bf16.mxu1 %v2548_v44 }
  0x1f   : > { %1264 = vrot.lane.b32.xlu1 %v2690_v48, %s2576_s16  ;;  %1262 = vrot.lane.b32.xlu0 %v2692_v49, %s2576_s16  ;;  %v857_v56 = vpack.c.bf16 %v837_v52, %v837_v52  ;;  %v1119_v57 = vrot.slane %v2692_v49, 1  ;;  %v859_v58 = vpack.c.bf16 %v838_v53, %v838_v53  ;;  %v904_v59 = vshrl.u32 %v2692_v49, 16 }
  0x20   : > { %v906_v60 = vshll.u32 %v2692_v49, 16  ;;  %v711_v3 = vrot.slane %v669_v61, 7  ;;  %v818_v4 = vsel %vm709_vm0, 0.0, %v710_v62  ;;  %v1122_v6 = vrot.slane %v2690_v48, 1  ;;  %2472 = vmatpush3.bf16.msra.mxu0 %v2548_v44  ;;  %2511 = vmatpush3.bf16.msra.mxu1 %v2548_v44 }
  0x21   : > { %v1120_v63 = vrot.slane %v857_v56, 1  ;;  %v911_v1 = vshll.u32 %v857_v56, 16  ;;  %v1123_v7 = vrot.slane %v859_v58, 1  ;;  %v918_v9 = vshll.u32 %v2690_v48, 16 }
  0x22   : > { %v908_v2 = vrot.slane %v906_v60, 1  ;;  %v712_v13 = vsel %vm709_vm0, %v710_v62, %v711_v3  ;;  %v836_v14 = vsel %vm709_vm0, %v711_v3, 0.0  ;;  %v839_v17 = vsel %vm709_vm0, %v720_v41, 0.0 }
  0x23   : > { %1360 = vrot.lane.b32.xlu1 %v2702_v55, %s2577_s17  ;;  %1358 = vrot.lane.b32.xlu0 %v2690_v48, %s2577_s17  ;;  %v1121_v5 = vsel %vm1115_vm1, %v1119_v57, %v1120_v63  ;;  %v913_v12 = vrot.slane %v911_v1, 1  ;;  %v2718_v15 = vpack.c.bf16 %v712_v13, %v818_v4  ;;  %v2720_v16 = vpack.c.bf16 %v836_v14, %v836_v14 }
  0x24   : > { %v909_v11 = vor.u32 %v908_v2, %v904_v59  ;;  %v923_v18 = vshll.u32 %v859_v58, 16  ;;  %v2380_v19 = vunpack.c.l.bf16 %v2437_v10  ;;  %v2381_v20 = vunpack.c.h.bf16 %v2437_v10 }
  0x25   : > { %v2726_v21 = vsel %vm1115_vm1, %v1122_v6, %v1123_v7  ;;  %v916_v22 = vshrl.u32 %v2690_v48, 16  ;;  %v920_v23 = vrot.slane %v918_v9, 1  ;;  %v2729_v24 = vpack.c.bf16 %v839_v17, %v839_v17 }
  0x26   : > { %v914_v25 = vsel %vm890_vm2, %v909_v11, %v913_v12  ;;  %v1116_v26 = vrot.slane %v2718_v15, 1  ;;  %v1117_v27 = vrot.slane %v2720_v16, 1  ;;  %v930_v28 = vshll.u32 %v2702_v55, 16 }
  0x27   : > { %1326 = vrot.lane.b32.xlu0 %v1121_v5, %s2578_s18  ;;  %1232 = vrot.lane.b32.xlu1 %v1121_v5, %s2579_s19  ;;  %v925_v30 = vrot.slane %v923_v18, 1  ;;  %v565_v31 = vmul.f32 %v2380_v19, %v2656_v0  ;;  %v921_v33 = vor.u32 %v920_v23, %v916_v22  ;;  %v928_v34 = vshrl.u32 %v2702_v55, 16  ;;  %v2439_v18 = vld [vmem:[%s2651_s8 + $0x28] sm:$0xff]  }
  0x28   : > { %v935_v35 = vshll.u32 %v2729_v24, 16  ;;  %v566_v36 = vmul.f32 %v2381_v20, %v2656_v0  ;;  %v1118_v37 = vsel %vm1115_vm1, %v1116_v26, %v1117_v27  ;;  %v932_v38 = vrot.slane %v930_v28, 1 }
  0x29   : > { %v894_v39 = vshll.u32 %v2718_v15, 16  ;;  %v597_v40 = vadd.f32 %v2668_v8, %v565_v31  ;;  %v2384_v42 = vunpack.c.l.bf16 %v2438_v32  ;;  %v2385_v43 = vunpack.c.h.bf16 %v2438_v32 }
  0x2a   : > { %v598_v41 = vadd.f32 %v2668_v8, %v566_v36  ;;  %v926_v46 = vsel %vm890_vm2, %v921_v33, %v925_v30  ;;  %v892_v47 = vshrl.u32 %v2718_v15, 16  ;;  %v933_v51 = vor.u32 %v932_v38, %v928_v34 }
  0x2b   : > { %1328 = vrot.lane.b32.xlu1 %v2726_v21, %s2578_s18  ;;  %1200 = vrot.lane.b32.xlu0 %v914_v25, %s2580_s22  ;;  %v629_v45 = vmax.f32 %v597_v40, 0.0  ;;  %v937_v52 = vrot.slane %v935_v35, 1  ;;  %v896_v53 = vrot.slane %v894_v39, 1  ;;  %v899_v54 = vshll.u32 %v2720_v16, 16 }
  0x2c   : > { %v630_v50 = vmax.f32 %v598_v41, 0.0  ;;  %v567_v58 = vmul.f32 %v2384_v42, %v2656_v0  ;;  %v568_v59 = vmul.f32 %v2385_v43, %v2656_v0  ;;  %v1125_v5 = vrot.slane %v2702_v55, 1 }
  0x2d   : > { %v722_v56 = vrot.slane %v629_v45, 7  ;;  %v938_v60 = vsel %vm890_vm2, %v933_v51, %v937_v52  ;;  %v897_v61 = vor.u32 %v896_v53, %v892_v47  ;;  %v901_v62 = vrot.slane %v899_v54, 1 }
  0x2e   : > { %v723_v57 = vrot.slane %v630_v50, 7  ;;  %v599_v2 = vadd.f32 %v2668_v8, %v567_v58  ;;  %v600_v3 = vadd.f32 %v2668_v8, %v568_v59  ;;  %v1126_v6 = vrot.slane %v2729_v24, 1  ;;  %v2549_v50 = vld [vmem:[%s3564_s5 + $0x10] ss:$0 sps:$4 sm:$0x33]  }
  0x2f   : > { %1294 = vrot.lane.b32.xlu0 %v914_v25, %s2581_s30  ;;  %1230 = vrot.lane.b32.xlu1 %v1118_v37, %s2579_s19  ;;  %v822_v1 = vsel %vm709_vm0, 0.0, %v722_v56  ;;  %v902_v4 = vsel %vm890_vm2, %v897_v61, %v901_v62  ;;  %v2388_v25 = vunpack.c.l.bf16 %v2439_v18  ;;  %v2389_v26 = vunpack.c.h.bf16 %v2439_v18  ;;  %v2440_v37 = vld [vmem:[%s2651_s8 + $0x30] sm:$0xff]  }
  0x30   : > { %v724_v63 = vsel %vm709_vm0, %v722_v56, %v723_v57  ;;  %v840_v9 = vsel %vm709_vm0, %v723_v57, 0.0  ;;  %v631_v10 = vmax.f32 %v599_v2, 0.0  ;;  %v632_v11 = vmax.f32 %v600_v3, 0.0  ;;  %2513 = vmatprep.subr.msk.bf16.mxu0 %vm1771_vm3, %v2549_v50  ;;  %2514 = vmatprep.subr.msk.bf16.mxu1 %vm1771_vm3, %v2549_v50 }
  0x31   : > { %v2773_v7 = vpack.c.bf16 %v724_v63, %v822_v1  ;;  %v1127_v12 = vsel %vm1115_vm1, %v1125_v5, %v1126_v6  ;;  %v863_v13 = vpack.c.bf16 %v840_v9, %v840_v9  ;;  %v569_v31 = vmul.f32 %v2388_v25, %v2656_v0 }
  0x32   : > { %v725_v16 = vrot.slane %v631_v10, 7  ;;  %v726_v17 = vrot.slane %v632_v11, 7  ;;  %v570_v32 = vmul.f32 %v2389_v26, %v2656_v0  ;;  %v2392_v40 = vunpack.c.l.bf16 %v2440_v37 }
  0x33   : > { %1390 = vrot.lane.b32.xlu0 %v926_v46, %s2582_s9  ;;  %1296 = vrot.lane.b32.xlu1 %v926_v46, %s2581_s30  ;;  %v942_v14 = vshll.u32 %v2773_v7, 16  ;;  %v940_v19 = vshrl.u32 %v2773_v7, 16  ;;  %v947_v22 = vshll.u32 %v863_v13, 16  ;;  %v1128_v33 = vrot.slane %v2773_v7, 1 }
  0x34   : > { %v727_v23 = vsel %vm709_vm0, %v725_v16, %v726_v17  ;;  %v823_v24 = vsel %vm709_vm0, 0.0, %v725_v16  ;;  %v841_v30 = vsel %vm709_vm0, %v726_v17, 0.0  ;;  %v1129_v34 = vrot.slane %v863_v13, 1 }
  0x35   : > { %v944_v20 = vrot.slane %v942_v14, 1  ;;  %v949_v28 = vrot.slane %v947_v22, 1  ;;  %v2789_v29 = vpack.c.bf16 %v727_v23, %v823_v24  ;;  %v865_v35 = vpack.c.bf16 %v841_v30, %v841_v30  ;;  %v2441_v14 = vld [vmem:[%s2651_s8 + $0x38] sm:$0xff]  }
  0x36   : > { %v601_v38 = vadd.f32 %v2668_v8, %v569_v31  ;;  %v602_v39 = vadd.f32 %v2668_v8, %v570_v32  ;;  %v1130_v41 = vsel %vm1115_vm1, %v1128_v33, %v1129_v34  ;;  %v2393_v47 = vunpack.c.h.bf16 %v2440_v37  ;;  %v2442_v37 = vld [vmem:[%s2651_s8 + $0x40] sm:$0xff]  }
  0x37   : > { %1422 = vrot.lane.b32.xlu0 %v2726_v21, %s2583_s10  ;;  %1392 = vrot.lane.b32.xlu1 %v938_v60, %s2582_s9  ;;  %v945_v27 = vor.u32 %v944_v20, %v940_v19  ;;  %v954_v36 = vshll.u32 %v2789_v29, 16  ;;  %v952_v42 = vshrl.u32 %v2789_v29, 16  ;;  %v959_v44 = vshll.u32 %v865_v35, 16 }
  0x38   : > { %v633_v45 = vmax.f32 %v601_v38, 0.0  ;;  %v571_v53 = vmul.f32 %v2392_v40, %v2656_v0  ;;  %v572_v57 = vmul.f32 %v2393_v47, %v2656_v0  ;;  %v1773_v63 = vsel %vm1771_vm3, %v2549_v50, 0 }
  0x39   : > { %v956_v43 = vrot.slane %v954_v36, 1  ;;  %v961_v52 = vrot.slane %v959_v44, 1  ;;  %v1131_v1 = vrot.slane %v2789_v29, 1  ;;  %v1132_v2 = vrot.slane %v865_v35, 1  ;;  %2474 = vmatpush3.bf16.msra.mxu0 %v1773_v63  ;;  %2512 = vmatpush3.bf16.msra.mxu1 %v1773_v63 }
  0x3a   : > { %v728_v54 = vrot.slane %v633_v45, 7  ;;  %v603_v61 = vadd.f32 %v2668_v8, %v571_v53  ;;  %v604_v62 = vadd.f32 %v2668_v8, %v572_v57  ;;  %v2396_v22 = vunpack.c.l.bf16 %v2441_v14 }
  0x3b   : > { %1202 = vrot.lane.b32.xlu1 %v926_v46, %s2580_s22  ;;  %1198 = vrot.lane.b32.xlu0 %v902_v4, %s2580_s22  ;;  %v634_v46 = vmax.f32 %v602_v39, 0.0  ;;  %v957_v51 = vor.u32 %v956_v43, %v952_v42  ;;  %v1133_v9 = vsel %vm1115_vm1, %v1131_v1, %v1132_v2  ;;  %v2397_v23 = vunpack.c.h.bf16 %v2441_v14 }
  0x3c   : > { %v635_v5 = vmax.f32 %v603_v61, 0.0  ;;  %v636_v6 = vmax.f32 %v604_v62, 0.0  ;;  %v2400_v44 = vunpack.c.l.bf16 %v2442_v37  ;;  %v2401_v45 = vunpack.c.h.bf16 %v2442_v37 }
  0x3d   : > { %v729_v56 = vrot.slane %v634_v46, 7  ;;  %v962_v58 = vsel %vm890_vm2, %v957_v51, %v961_v52  ;;  %v574_v30 = vmul.f32 %v2397_v23, %v2656_v0 }
  0x3e   : > { %v732_v13 = vrot.slane %v636_v6, 7  ;;  %v575_v52 = vmul.f32 %v2400_v44, %v2656_v0  ;;  %v576_v53 = vmul.f32 %v2401_v45, %v2656_v0 }
  0x3f   : > { %1204 = vrot.lane.b32.xlu1 %v938_v60, %s2580_s22  ;;  %1424 = vrot.lane.b32.xlu0 %v1127_v12, %s2583_s10  ;;  %v730_v59 = vsel %vm709_vm0, %v728_v54, %v729_v56  ;;  %v842_v4 = vsel %vm709_vm0, %v729_v56, 0.0  ;;  %v606_v36 = vadd.f32 %v2668_v8, %v574_v30 }
  0x40   : > { %v867_v10 = vpack.c.bf16 %v842_v4, %v842_v4 }
  0x41   : > { %v638_v43 = vmax.f32 %v606_v36, 0.0 }
  0x42   : > { %v971_v18 = vshll.u32 %v867_v10, 16  ;;  %v1135_v33 = vrot.slane %v867_v10, 1 }
  0x43   : > { %1236 = vrot.lane.b32.xlu1 %v1127_v12, %s2579_s19  ;;  %1234 = vrot.lane.b32.xlu0 %v2726_v21, %s2579_s19  ;;  %v950_v21 = vsel %vm890_vm2, %v945_v27, %v949_v28  ;;  %v843_v27 = vsel %vm709_vm0, %v732_v13, 0.0  ;;  %v573_v28 = vmul.f32 %v2396_v22, %v2656_v0  ;;  %v735_v51 = vrot.slane %v638_v43, 7 }
  0x44   : > { %v973_v25 = vrot.slane %v971_v18, 1 }
  0x45   : > { %v605_v35 = vadd.f32 %v2668_v8, %v573_v28  ;;  %v844_v63 = vsel %vm709_vm0, %v735_v51, 0.0 }
  0x47   : > { %1268 = vrot.lane.b32.xlu1 %v2773_v7, %s2576_s16  ;;  %1266 = vrot.lane.b32.xlu0 %v2702_v55, %s2576_s16  ;;  %v637_v42 = vmax.f32 %v605_v35, 0.0  ;;  %v2444_v35 = vld [vmem:[%s2651_s8 + $0x50] sm:$0xff]  }
  0x48   : > { %v2409_v43 = vunpack.c.h.bf16 %v2444_v35 }
  0x49   : > { %v734_v50 = vrot.slane %v637_v42, 7  ;;  %v2408_v42 = vunpack.c.l.bf16 %v2444_v35 }
  0x4b   : > { %1300 = vrot.lane.b32.xlu1 %v950_v21, %s2581_s30  ;;  %1298 = vrot.lane.b32.xlu0 %v938_v60, %s2581_s30  ;;  %v824_v60 = vsel %vm709_vm0, 0.0, %v728_v54  ;;  %v736_v56 = vsel %vm709_vm0, %v734_v50, %v735_v51  ;;  %v826_v57 = vsel %vm709_vm0, 0.0, %v734_v50 }
  0x4c   : > { %v2827_v3 = vpack.c.bf16 %v730_v59, %v824_v60  ;;  %v608_v59 = vadd.f32 %v2668_v8, %v576_v53  ;;  %v2877_v62 = vpack.c.bf16 %v736_v56, %v826_v57  ;;  %v580_v53 = vmul.f32 %v2409_v43, %v2656_v0 }
  0x4e   : > { %v966_v11 = vshll.u32 %v2827_v3, 16  ;;  %v964_v16 = vshrl.u32 %v2827_v3, 16  ;;  %v1134_v31 = vrot.slane %v2827_v3, 1  ;;  %v640_v2 = vmax.f32 %v608_v59, 0.0 }
  0x4f   : > { %1332 = vrot.lane.b32.xlu1 %v1130_v41, %s2578_s18  ;;  %1330 = vrot.lane.b32.xlu0 %v1127_v12, %s2578_s18  ;;  %v731_v12 = vrot.slane %v635_v5, 7  ;;  %v871_v5 = vpack.c.bf16 %v844_v63, %v844_v63  ;;  %v990_v6 = vshll.u32 %v2877_v62, 16  ;;  %v1140_v28 = vrot.slane %v2877_v62, 1 }
  0x50   : > { %v968_v17 = vrot.slane %v966_v11, 1  ;;  %v1136_v38 = vsel %vm1115_vm1, %v1134_v31, %v1135_v33  ;;  %v738_v10 = vrot.slane %v640_v2, 7  ;;  %v2443_v11 = vld [vmem:[%s2651_s8 + $0x48] sm:$0xff]  }
  0x51   : > { %v733_v19 = vsel %vm709_vm0, %v731_v12, %v732_v13  ;;  %v825_v20 = vsel %vm709_vm0, 0.0, %v731_v12  ;;  %v988_v12 = vshrl.u32 %v2877_v62, 16  ;;  %v992_v13 = vrot.slane %v990_v6, 1 }
  0x52   : > { %v969_v24 = vor.u32 %v968_v17, %v964_v16  ;;  %v2842_v26 = vpack.c.bf16 %v733_v19, %v825_v20  ;;  %v995_v14 = vshll.u32 %v871_v5, 16  ;;  %v2404_v18 = vunpack.c.l.bf16 %v2443_v11 }
  0x53   : > { %1364 = vrot.lane.b32.xlu1 %v2789_v29, %s2577_s17  ;;  %1362 = vrot.lane.b32.xlu0 %v2773_v7, %s2577_s17  ;;  %v2405_v19 = vunpack.c.h.bf16 %v2443_v11  ;;  %v993_v20 = vor.u32 %v992_v13, %v988_v12  ;;  %v1141_v31 = vrot.slane %v871_v5, 1 }
  0x54   : > { %v974_v32 = vsel %vm890_vm2, %v969_v24, %v973_v25  ;;  %v978_v34 = vshll.u32 %v2842_v26, 16  ;;  %v976_v39 = vshrl.u32 %v2842_v26, 16  ;;  %v1137_v60 = vrot.slane %v2842_v26, 1 }
  0x55   : > { %v997_v22 = vrot.slane %v995_v14, 1  ;;  %v845_v24 = vsel %vm709_vm0, %v738_v10, 0.0  ;;  %v577_v25 = vmul.f32 %v2404_v18, %v2656_v0  ;;  %v1142_v36 = vsel %vm1115_vm1, %v1140_v28, %v1141_v31 }
  0x56   : > { %v980_v40 = vrot.slane %v978_v34, 1 }
  0x57   : > { %1396 = vrot.lane.b32.xlu1 %v962_v58, %s2582_s9  ;;  %1394 = vrot.lane.b32.xlu0 %v950_v21, %s2582_s9  ;;  %v998_v30 = vsel %vm890_vm2, %v993_v20, %v997_v22 }
  0x58   : > { %v981_v46 = vor.u32 %v980_v40, %v976_v39 }
  0x5b   : > { %1206 = vrot.lane.b32.xlu1 %v950_v21, %s2580_s22  ;;  %1426 = vrot.lane.b32.xlu0 %v1130_v41, %s2583_s10  ;;  %v869_v21 = vpack.c.bf16 %v843_v27, %v843_v27  ;;  %v578_v27 = vmul.f32 %v2405_v19, %v2656_v0  ;;  %v2445_v19 = vld [vmem:[%s2651_s8 + $0x58] sm:$0xff]  }
  0x5c   : > { %v2412_v31 = vunpack.c.l.bf16 %v2445_v19 }
  0x5d   : > { %v1138_v61 = vrot.slane %v869_v21, 1  ;;  %v610_v34 = vadd.f32 %v2668_v8, %v578_v27 }
  0x5f   : > { %1208 = vrot.lane.b32.xlu1 %v962_v58, %s2580_s22  ;;  %1428 = vrot.lane.b32.xlu0 %v1133_v9, %s2583_s10  ;;  %v1139_v4 = vsel %vm1115_vm1, %v1137_v60, %v1138_v61  ;;  %v612_v61 = vadd.f32 %v2668_v8, %v580_v53 }
  0x63   : > { %1240 = vrot.lane.b32.xlu1 %v1133_v9, %s2579_s19  ;;  %1238 = vrot.lane.b32.xlu0 %v1130_v41, %s2579_s19  ;;  %v983_v41 = vshll.u32 %v869_v21, 16  ;;  %v609_v21 = vadd.f32 %v2668_v8, %v577_v25 }
  0x65   : > { %v985_v47 = vrot.slane %v983_v41, 1  ;;  %v641_v40 = vmax.f32 %v609_v21, 0.0  ;;  %v642_v41 = vmax.f32 %v610_v34, 0.0 }
  0x67   : > { %1272 = vrot.lane.b32.xlu1 %v2827_v3, %s2576_s16  ;;  %1270 = vrot.lane.b32.xlu0 %v2789_v29, %s2576_s16  ;;  %v986_v54 = vsel %vm890_vm2, %v981_v46, %v985_v47  ;;  %v740_v50 = vrot.slane %v641_v40, 7  ;;  %v741_v51 = vrot.slane %v642_v41, 7 }
  0x69   : > { %v828_v59 = vsel %vm709_vm0, 0.0, %v740_v50  ;;  %v846_v6 = vsel %vm709_vm0, %v741_v51, 0.0 }
  0x6a   : > { %v875_v12 = vpack.c.bf16 %v846_v6, %v846_v6 }
  0x6b   : > { %1304 = vrot.lane.b32.xlu1 %v974_v32, %s2581_s30  ;;  %1302 = vrot.lane.b32.xlu0 %v962_v58, %s2581_s30  ;;  %v607_v58 = vadd.f32 %v2668_v8, %v575_v52  ;;  %v579_v52 = vmul.f32 %v2408_v42, %v2656_v0 }
  0x6c   : > { %v1147_v42 = vrot.slane %v875_v12, 1 }
  0x6d   : > { %v639_v1 = vmax.f32 %v607_v58, 0.0  ;;  %v742_v58 = vsel %vm709_vm0, %v740_v50, %v741_v51  ;;  %v611_v60 = vadd.f32 %v2668_v8, %v579_v52  ;;  %v2446_v50 = vld [vmem:[%s2651_s8 + $0x60] sm:$0xff]  }
  0x6e   : > { %v2938_v2 = vpack.c.bf16 %v742_v58, %v828_v59 }
  0x6f   : > { %1336 = vrot.lane.b32.xlu1 %v1136_v38, %s2578_s18  ;;  %1334 = vrot.lane.b32.xlu0 %v1133_v9, %s2578_s18  ;;  %v737_v9 = vrot.slane %v639_v1, 7 }
  0x70   : > { %v1014_v13 = vshll.u32 %v2938_v2, 16  ;;  %v1012_v20 = vshrl.u32 %v2938_v2, 16 }
  0x71   : > { %v739_v16 = vsel %vm709_vm0, %v737_v9, %v738_v10  ;;  %v827_v17 = vsel %vm709_vm0, 0.0, %v737_v9  ;;  %v643_v9 = vmax.f32 %v611_v60, 0.0  ;;  %v644_v10 = vmax.f32 %v612_v61, 0.0 }
  0x72   : > { %v2892_v23 = vpack.c.bf16 %v739_v16, %v827_v17  ;;  %v1016_v22 = vrot.slane %v1014_v13, 1  ;;  %v2416_v60 = vunpack.c.l.bf16 %v2446_v50 }
  0x73   : > { %1368 = vrot.lane.b32.xlu1 %v2842_v26, %s2577_s17  ;;  %1366 = vrot.lane.b32.xlu0 %v2827_v3, %s2577_s17  ;;  %v743_v17 = vrot.slane %v643_v9, 7  ;;  %v744_v18 = vrot.slane %v644_v10, 7 }
  0x74   : > { %v1002_v33 = vshll.u32 %v2892_v23, 16  ;;  %v1000_v37 = vshrl.u32 %v2892_v23, 16  ;;  %v1143_v63 = vrot.slane %v2892_v23, 1 }
  0x75   : > { %v745_v28 = vsel %vm709_vm0, %v743_v17, %v744_v18 }
  0x77   : > { %1400 = vrot.lane.b32.xlu1 %v986_v54, %s2582_s9  ;;  %1398 = vrot.lane.b32.xlu0 %v974_v32, %s2582_s9 }
  0x7b   : > { %1210 = vrot.lane.b32.xlu1 %v974_v32, %s2580_s22  ;;  %1430 = vrot.lane.b32.xlu0 %v1136_v38, %s2583_s10  ;;  %v873_v32 = vpack.c.bf16 %v845_v24, %v845_v24  ;;  %v1019_v24 = vshll.u32 %v875_v12, 16 }
  0x7d   : > { %v1007_v39 = vshll.u32 %v873_v32, 16  ;;  %v1144_v1 = vrot.slane %v873_v32, 1  ;;  %v2413_v32 = vunpack.c.h.bf16 %v2445_v19  ;;  %v1021_v21 = vrot.slane %v1019_v24, 1 }
  0x7f   : > { %1212 = vrot.lane.b32.xlu1 %v986_v54, %s2580_s22  ;;  %1432 = vrot.lane.b32.xlu0 %v1139_v4, %s2583_s10  ;;  %v1009_v45 = vrot.slane %v1007_v39, 1  ;;  %v2946_v11 = vsel %vm1115_vm1, %v1143_v63, %v1144_v1  ;;  %v581_v39 = vmul.f32 %v2412_v31, %v2656_v0  ;;  %v582_v40 = vmul.f32 %v2413_v32, %v2656_v0 }
  0x81   : > { %v613_v53 = vadd.f32 %v2668_v8, %v581_v39  ;;  %v614_v58 = vadd.f32 %v2668_v8, %v582_v40 }
  0x83   : > { %1244 = vrot.lane.b32.xlu1 %v1139_v4, %s2579_s19  ;;  %1242 = vrot.lane.b32.xlu0 %v1136_v38, %s2579_s19  ;;  %v1004_v38 = vrot.slane %v1002_v33, 1  ;;  %v1017_v33 = vor.u32 %v1016_v22, %v1012_v20  ;;  %v645_v12 = vmax.f32 %v613_v53, 0.0  ;;  %v646_v13 = vmax.f32 %v614_v58, 0.0 }
  0x85   : > { %v1005_v44 = vor.u32 %v1004_v38, %v1000_v37  ;;  %v847_v38 = vsel %vm709_vm0, %v744_v18, 0.0  ;;  %v2975_v43 = vsel %vm890_vm2, %v1017_v33, %v1021_v21 }
  0x87   : > { %1276 = vrot.lane.b32.xlu1 %v2877_v62, %s2576_s16  ;;  %1274 = vrot.lane.b32.xlu0 %v2842_v26, %s2576_s16 }
  0x8b   : > { %1308 = vrot.lane.b32.xlu1 %v998_v30, %s2581_s30  ;;  %1306 = vrot.lane.b32.xlu0 %v986_v54, %s2581_s30  ;;  %v2924_v54 = vsel %vm890_vm2, %v1005_v44, %v1009_v45  ;;  %v2977_v44 = vpack.c.bf16 %v847_v38, %v847_v38 }
  0x8d   : > { %v1150_v40 = vrot.slane %v2977_v44, 1 }
  0x8f   : > { %1340 = vrot.lane.b32.xlu1 %v1142_v36, %s2578_s18  ;;  %1338 = vrot.lane.b32.xlu0 %v1139_v4, %s2578_s18 }
  0x91   : > { %v2913_v46 = vpop.permute.xlu1 %1264  ;;  %v2915_v47 = vpop.permute.xlu0 %1262 }
  0x93   : > { %1372 = vrot.lane.b32.xlu1 %v2892_v23, %s2577_s17  ;;  %1370 = vrot.lane.b32.xlu0 %v2877_v62, %s2577_s17 }
  0x95   : > { %v2926_v56 = vpop.permute.xlu1 %1360  ;;  %v2928_v57 = vpop.permute.xlu0 %1358 }
  0x97   : > { %1404 = vrot.lane.b32.xlu1 %v2924_v54, %s2582_s9  ;;  %1402 = vrot.lane.b32.xlu0 %v998_v30, %s2582_s9 }
  0x99   : > { %v2940_v4 = vpop.permute.xlu0 %1326  ;;  %v1233_v5 = vpop.permute.xlu1 %1232 }
  0x9b   : > { %1214 = vrot.lane.b32.xlu1 %v998_v30, %s2580_s22  ;;  %1434 = vrot.lane.b32.xlu0 %v1142_v36, %s2583_s10  ;;  %v829_v30 = vsel %vm709_vm0, 0.0, %v743_v17 }
  0x9c   : > { %v2962_v34 = vpack.c.bf16 %v745_v28, %v829_v30  ;;  %v746_v28 = vrot.slane %v645_v12, 7  ;;  %v747_v30 = vrot.slane %v646_v13, 7 }
  0x9d   : > { %v2949_v14 = vpop.permute.xlu1 %1328  ;;  %v1201_v16 = vpop.permute.xlu0 %1200 }
  0x9e   : > { %v1458_v41 = vsel %vm1454_vm4, %v2692_v49, %v1201_v16  ;;  %v1026_v45 = vshll.u32 %v2962_v34, 16  ;;  %v1024_v63 = vshrl.u32 %v2962_v34, 16  ;;  %v748_v21 = vsel %vm709_vm0, %v746_v28, %v747_v30 }
  0x9f   : > { %1216 = vrot.lane.b32.xlu1 %v2924_v54, %s2580_s22  ;;  %1436 = vrot.lane.b32.xlu0 %v2946_v11, %s2583_s10  ;;  %v1491_v51 = vsel %vm1487_vm5, %v1458_v41, %v1233_v5  ;;  %v1031_v5 = vshll.u32 %v2977_v44, 16  ;;  %v1149_v39 = vrot.slane %v2962_v34, 1 }
  0xa0   : > { %v1524_v61 = vsel %vm1520_vm6, %v1491_v51, %v2913_v46  ;;  %v1028_v1 = vrot.slane %v1026_v45, 1  ;;  %v583_v46 = vmul.f32 %v2416_v60, %v2656_v0 }
  0xa1   : > { %v1295_v25 = vpop.permute.xlu0 %1294  ;;  %v1231_v27 = vpop.permute.xlu1 %1230  ;;  %v1033_v22 = vrot.slane %v1031_v5, 1  ;;  %v3055_v51 = vsel %vm1115_vm1, %v1149_v39, %v1150_v40 }
  0xa2   : > { %v1029_v20 = vor.u32 %v1028_v1, %v1024_v63 }
  0xa3   : > { %1248 = vrot.lane.b32.xlu1 %v2946_v11, %s2579_s19  ;;  %1246 = vrot.lane.b32.xlu0 %v1142_v36, %s2579_s19  ;;  %v1146_v36 = vrot.slane %v2938_v2, 1 }
  0xa5   : > { %v1391_v35 = vpop.permute.xlu0 %1390  ;;  %v1297_v37 = vpop.permute.xlu1 %1296  ;;  %v2989_v59 = vsel %vm1115_vm1, %v1146_v36, %v1147_v42  ;;  %v848_v42 = vsel %vm709_vm0, %v747_v30, 0.0 }
  0xa6   : > { %v1557_v6 = vsel %vm1553_vm7, %v1524_v61, %v1297_v37  ;;  %v830_v37 = vsel %vm709_vm0, 0.0, %v746_v28  ;;  %v879_v44 = vpack.c.bf16 %v848_v42, %v848_v42  ;;  %v2447_v61 = vld [vmem:[%s2651_s8 + $0x68] sm:$0xff]  }
  0xa7   : > { %1280 = vrot.lane.b32.xlu1 %v2938_v2, %s2576_s16  ;;  %1278 = vrot.lane.b32.xlu0 %v2892_v23, %s2576_s16  ;;  %v1590_v18 = vsel %vm1586_vm8, %v1557_v6, %v2949_v14  ;;  %v2420_v13 = vunpack.c.l.bf16 %v2447_v61 }
  0xa8   : > { %v1623_v14 = vsel %vm1619_vm9, %v1590_v18, %v2926_v56  ;;  %v1043_v1 = vshll.u32 %v879_v44, 16 }
  0xa9   : > { %v1423_v49 = vpop.permute.xlu0 %1422  ;;  %v1393_v52 = vpop.permute.xlu1 %1392 }
  0xaa   : > { %v1656_v38 = vsel %vm1652_vm10, %v1623_v14, %v1393_v52 }
  0xab   : > { %1312 = vrot.lane.b32.xlu1 %v2975_v43, %s2581_s30  ;;  %1310 = vrot.lane.b32.xlu0 %v2924_v54, %s2581_s30  ;;  %v2417_v54 = vunpack.c.h.bf16 %v2446_v50 }
  0xad   : > { %v2996_v9 = vpop.permute.xlu1 %1202  ;;  %v1199_v10 = vpop.permute.xlu0 %1198  ;;  %v584_v31 = vmul.f32 %v2417_v54, %v2656_v0  ;;  %v2421_v54 = vunpack.c.h.bf16 %v2447_v61 }
  0xae   : > { %v1456_v16 = vsel %vm1454_vm4, %v2718_v15, %v1199_v10  ;;  %v1460_v30 = vsel %vm1454_vm4, %v2690_v48, %v2996_v9  ;;  %v3102_v9 = vld [vmem:[%s3563_s4] ss:$0 sm:$0xff] }
  0xaf   : > { %v1489_v17 = vsel %vm1487_vm5, %v1456_v16, %v1231_v27  ;;  %1344 = vrot.lane.b32.xlu1 %v2989_v59, %s2578_s18  ;;  %1342 = vrot.lane.b32.xlu0 %v2946_v11, %s2578_s18 }
  0xb0   : > { %v1522_v19 = vsel %vm1520_vm6, %v1489_v17, %v2915_v47  ;;  %v1045_v17 = vrot.slane %v1043_v1, 1 }
  0xb1   : > { %v1555_v15 = vsel %vm1553_vm7, %v1522_v19, %v1295_v25  ;;  %v3011_v24 = vpop.permute.xlu1 %1204  ;;  %v1425_v27 = vpop.permute.xlu0 %1424  ;;  %v3026_v25 = vsel %vm890_vm2, %v1029_v20, %v1033_v22  ;;  %v3078_v22 = vld [vmem:[%s3562_s3] ss:$0 sm:$0xff] }
  0xb2   : > { %v1588_v11 = vsel %vm1586_vm8, %v1555_v15, %v2940_v4  ;;  %v615_v4 = vadd.f32 %v2668_v8, %v583_v46  ;;  %v585_v15 = vmul.f32 %v3078_v22, %v2420_v13 }
  0xb3   : > { %1376 = vrot.lane.b32.xlu1 %v2962_v34, %s2577_s17  ;;  %1374 = vrot.lane.b32.xlu0 %v2938_v2, %s2577_s17  ;;  %v1621_v47 = vsel %vm1619_vm9, %v1588_v11, %v2928_v57  ;;  %v616_v57 = vadd.f32 %v2668_v8, %v584_v31  ;;  %v3045_v8 = vpack.c.bf16 %v748_v21, %v830_v37  ;;  %v2448_v31 = vld [vmem:[%s2651_s8 + $0x70] sm:$0xff]  }
  0xb4   : > { %v1654_v0 = vsel %vm1652_vm10, %v1621_v47, %v1391_v35  ;;  %v1689_v35 = vsel %vm1685_vm12, %v1656_v38, %v1425_v27  ;;  %v647_v45 = vmax.f32 %v615_v4, 0.0  ;;  %v586_v27 = vmul.f32 %v3078_v22, %v2421_v54 }
  0xb5   : > { %v3029_v56 = vpop.permute.xlu1 %1236  ;;  %v1235_v32 = vpop.permute.xlu0 %1234  ;;  %v1687_v33 = vsel %vm1685_vm12, %v1654_v0, %v1423_v49  ;;  %v648_v50 = vmax.f32 %v616_v57, 0.0  ;;  %v1038_v49 = vshll.u32 %v3045_v8, 16  ;;  %v1152_v28 = vrot.slane %v3045_v8, 1 }
  0xb6   : > { %2475 = vmatprep.mubr.msk.bf16.mxu0 %vm1738_vm11, %v1687_v33  ;;  %v749_v58 = vrot.slane %v647_v45, 7  ;;  %v1493_v11 = vsel %vm1487_vm5, %v1460_v30, %v1235_v32  ;;  %v617_v21 = vadd.f32 %v3102_v9, %v585_v15  ;;  %v618_v32 = vadd.f32 %v3102_v9, %v586_v27 }
  0xb7   : > { %1408 = vrot.lane.b32.xlu1 %v3026_v25, %s2582_s9  ;;  %1406 = vrot.lane.b32.xlu0 %v2975_v43, %s2582_s9  ;;  %v750_v60 = vrot.slane %v648_v50, 7  ;;  %v1040_v63 = vrot.slane %v1038_v49, 1  ;;  %v2424_v38 = vunpack.c.l.bf16 %v2448_v31 }
  0xb8   : > { %2476 = vmatmul.mubr.msk.bf16.vlgmr.msra.gmra.mrb[0].mxu0 %vm1738_vm11, %v1689_v35  ;;  %v831_v12 = vsel %vm709_vm0, 0.0, %v749_v58  ;;  %v1462_v35 = vsel %vm1454_vm4, %v2702_v55, %v3011_v24 }
  0xb9   : > { %v3047_v41 = vpop.permute.xlu1 %1268  ;;  %v1267_v36 = vpop.permute.xlu0 %1266  ;;  %v751_v10 = vsel %vm709_vm0, %v749_v58, %v750_v60  ;;  %v849_v20 = vsel %vm709_vm0, %v750_v60, 0.0  ;;  %v1495_v42 = vsel %vm1487_vm5, %v1462_v35, %v3029_v56  ;;  %v650_v58 = vmax.f32 %v618_v32, 0.0  ;;  %v2449_v35 = vld [vmem:[%s2651_s8 + $0x78] sm:$0xff]  }
  0xba   : > { %v3072_v46 = vpack.c.bf16 %v751_v10, %v831_v12  ;;  %v3095_v47 = vpack.c.bf16 %v849_v20, %v849_v20  ;;  %v1526_v4 = vsel %vm1520_vm6, %v1493_v11, %v1267_v36  ;;  %v2425_v36 = vunpack.c.h.bf16 %v2448_v31 }
  0xbb   : > { %1218 = vrot.lane.b32.xlu1 %v2975_v43, %s2580_s22  ;;  %1438 = vrot.lane.b32.xlu0 %v2989_v59, %s2583_s10  ;;  %v1036_v43 = vshrl.u32 %v3045_v8, 16  ;;  %v1528_v55 = vsel %vm1520_vm6, %v1495_v42, %v3047_v41  ;;  %v587_v41 = vmul.f32 %v3078_v22, %v2424_v38  ;;  %v753_v13 = vrot.slane %v650_v58, 7 }
  0xbc   : > { %v1050_v0 = vshll.u32 %v3072_v46, 16  ;;  %v1048_v40 = vshrl.u32 %v3072_v46, 16  ;;  %v1156_v30 = vrot.slane %v3095_v47, 1 }
  0xbd   : > { %v3058_v52 = vpop.permute.xlu1 %1300  ;;  %v1299_v53 = vpop.permute.xlu0 %1298  ;;  %v1041_v16 = vor.u32 %v1040_v63, %v1036_v43  ;;  %v588_v43 = vmul.f32 %v3078_v22, %v2425_v36  ;;  %v850_v11 = vsel %vm709_vm0, %v753_v13, 0.0 }
  0xbe   : > { %v1559_v37 = vsel %vm1553_vm7, %v1526_v4, %v1299_v53  ;;  %v1052_v50 = vrot.slane %v1050_v0, 1  ;;  %v1561_v60 = vsel %vm1553_vm7, %v1528_v55, %v3058_v52 }
  0xbf   : > { %1220 = vrot.lane.b32.xlu1 %v3026_v25, %s2580_s22  ;;  %1440 = vrot.lane.b32.xlu0 %v3055_v51, %s2583_s10  ;;  %v3093_v14 = vsel %vm890_vm2, %v1041_v16, %v1045_v17  ;;  %v620_v16 = vadd.f32 %v3102_v9, %v588_v43 }
  0xc0   : > { %v1053_v1 = vor.u32 %v1052_v50, %v1048_v40  ;;  %v2429_v50 = vunpack.c.h.bf16 %v2449_v35 }
  0xc1   : > { %v1333_v5 = vpop.permute.xlu1 %1332  ;;  %v1331_v6 = vpop.permute.xlu0 %1330 }
  0xc2   : > { %v1592_v39 = vsel %vm1586_vm8, %v1559_v37, %v1331_v6  ;;  %v1594_v61 = vsel %vm1586_vm8, %v1561_v60, %v1333_v5 }
  0xc3   : > { %1252 = vrot.lane.b32.xlu1 %v3055_v51, %s2579_s19  ;;  %1250 = vrot.lane.b32.xlu0 %v2989_v59, %s2579_s19  ;;  %v1153_v59 = vrot.slane %v879_v44, 1  ;;  %v1055_v44 = vshll.u32 %v3095_v47, 16 }
  0xc5   : > { %v1365_v18 = vpop.permute.xlu1 %1364  ;;  %v1363_v19 = vpop.permute.xlu0 %1362  ;;  %v3108_v57 = vsel %vm1115_vm1, %v1152_v28, %v1153_v59  ;;  %v1057_v52 = vrot.slane %v1055_v44, 1  ;;  %v652_v28 = vmax.f32 %v620_v16, 0.0  ;;  %v1155_v59 = vrot.slane %v3072_v46, 1 }
  0xc6   : > { %v1625_v45 = vsel %vm1619_vm9, %v1592_v39, %v1363_v19  ;;  %v1627_v63 = vsel %vm1619_vm9, %v1594_v61, %v1365_v18 }
  0xc7   : > { %1284 = vrot.lane.b32.xlu1 %v3045_v8, %s2576_s16  ;;  %1282 = vrot.lane.b32.xlu0 %v2962_v34, %s2576_s16  ;;  %v3152_v17 = vsel %vm890_vm2, %v1053_v1, %v1057_v52  ;;  %v3174_v32 = vsel %vm1115_vm1, %v1155_v59, %v1156_v30 }
  0xc9   : > { %v1397_v33 = vpop.permute.xlu1 %1396  ;;  %v1395_v48 = vpop.permute.xlu0 %1394 }
  0xca   : > { %v1658_v24 = vsel %vm1652_vm10, %v1625_v45, %v1395_v48  ;;  %v1660_v6 = vsel %vm1652_vm10, %v1627_v63, %v1397_v33  ;;  %v883_v33 = vpack.c.bf16 %v850_v11, %v850_v11  ;;  %v2428_v45 = vunpack.c.l.bf16 %v2449_v35 }
  0xcb   : > { %1316 = vrot.lane.b32.xlu1 %v3093_v14, %s2581_s30  ;;  %1314 = vrot.lane.b32.xlu0 %v3026_v25, %s2581_s30  ;;  %v649_v25 = vmax.f32 %v617_v21, 0.0  ;;  %v756_v21 = vrot.slane %v652_v28, 7 }
  0xcc   : > { %v1067_v39 = vshll.u32 %v883_v33, 16  ;;  %v589_v60 = vmul.f32 %v3078_v22, %v2428_v45  ;;  %v1159_v63 = vrot.slane %v883_v33, 1 }
  0xcd   : > { %v3126_v49 = vpop.permute.xlu1 %1206  ;;  %v1427_v53 = vpop.permute.xlu0 %1426  ;;  %v752_v12 = vrot.slane %v649_v25, 7 }
  0xce   : > { %v1691_v56 = vsel %vm1685_vm12, %v1658_v24, %v1427_v53  ;;  %v851_v53 = vsel %vm709_vm0, %v756_v21, 0.0  ;;  %v1069_v58 = vrot.slane %v1067_v39, 1  ;;  %v1464_v1 = vsel %vm1454_vm4, %v2773_v7, %v3126_v49 }
  0xcf   : > { %1348 = vrot.lane.b32.xlu1 %v3108_v57, %s2578_s18  ;;  %1346 = vrot.lane.b32.xlu0 %v3055_v51, %s2578_s18  ;;  %v619_v51 = vadd.f32 %v3102_v9, %v587_v41  ;;  %v754_v20 = vsel %vm709_vm0, %v752_v12, %v753_v13  ;;  %v832_v15 = vsel %vm709_vm0, 0.0, %v752_v12  ;;  %v3208_v52 = vpack.c.bf16 %v851_v53, %v851_v53 }
  0xd0   : > { %2479 = vmatprep.mubr.msk.bf16.mxu0 %vm1738_vm11, %v1691_v56  ;;  %v3164_v31 = vpack.c.bf16 %v754_v20, %v832_v15  ;;  %v590_v56 = vmul.f32 %v3078_v22, %v2429_v50  ;;  %v621_v13 = vadd.f32 %v3102_v9, %v589_v60 }
  0xd1   : > { %v3141_v10 = vpop.permute.xlu1 %1208  ;;  %v1429_v5 = vpop.permute.xlu0 %1428  ;;  %v651_v27 = vmax.f32 %v619_v51, 0.0  ;;  %v1079_v11 = vshll.u32 %v3208_v52, 16 }
  0xd2   : > { %v1693_v54 = vsel %vm1685_vm12, %v1660_v6, %v1429_v5  ;;  %v1062_v47 = vshll.u32 %v3164_v31, 16  ;;  %v1158_v43 = vrot.slane %v3164_v31, 1  ;;  %v1466_v28 = vsel %vm1454_vm4, %v2789_v29, %v3141_v10 }
  0xd3   : > { %1380 = vrot.lane.b32.xlu1 %v3072_v46, %s2577_s17  ;;  %1378 = vrot.lane.b32.xlu0 %v3045_v8, %s2577_s17  ;;  %v755_v48 = vrot.slane %v651_v27, 7 }
  0xd4   : > { %2480 = vmatmul.mubr.msk.bf16.gmra.mrb[4].mxu0 %vm1738_vm11, %v1693_v54  ;;  %v1064_v36 = vrot.slane %v1062_v47, 1  ;;  %v622_v54 = vadd.f32 %v3102_v9, %v590_v56  ;;  %v3220_v27 = vsel %vm1115_vm1, %v1158_v43, %v1159_v63  ;;  %v1162_v43 = vrot.slane %v3208_v52, 1 }
  0xd5   : > { %v3154_v18 = vpop.permute.xlu1 %1240  ;;  %v1239_v19 = vpop.permute.xlu0 %1238  ;;  %v757_v40 = vsel %vm709_vm0, %v755_v48, %v756_v21  ;;  %v833_v42 = vsel %vm709_vm0, 0.0, %v755_v48  ;;  %v653_v48 = vmax.f32 %v621_v13, 0.0 }
  0xd6   : > { %v3192_v24 = vpack.c.bf16 %v757_v40, %v833_v42  ;;  %v1497_v5 = vsel %vm1487_vm5, %v1464_v1, %v1239_v19  ;;  %v654_v21 = vmax.f32 %v622_v54, 0.0 }
  0xd7   : > { %1412 = vrot.lane.b32.xlu1 %v3152_v17, %s2582_s9  ;;  %1410 = vrot.lane.b32.xlu0 %v3093_v14, %s2582_s9 }
  0xd8   : > { %v1074_v6 = vshll.u32 %v3192_v24, 16  ;;  %v1072_v19 = vshrl.u32 %v3192_v24, 16  ;;  %v759_v50 = vrot.slane %v654_v21, 7 }
  0xd9   : > { %v3167_v0 = vpop.permute.xlu1 %1272  ;;  %v1271_v4 = vpop.permute.xlu0 %1270 }
  0xda   : > { %v1530_v7 = vsel %vm1520_vm6, %v1497_v5, %v1271_v4  ;;  %v1076_v30 = vrot.slane %v1074_v6, 1  ;;  %v1499_v4 = vsel %vm1487_vm5, %v1466_v28, %v3154_v18  ;;  %v852_v6 = vsel %vm709_vm0, %v759_v50, 0.0 }
  0xdb   : > { %1222 = vrot.lane.b32.xlu1 %v3093_v14, %s2580_s22  ;;  %1442 = vrot.lane.b32.xlu0 %v3108_v57, %s2583_s10  ;;  %v1060_v14 = vshrl.u32 %v3164_v31, 16  ;;  %v1532_v29 = vsel %vm1520_vm6, %v1499_v4, %v3167_v0 }
  0xdc   : > { %v1077_v40 = vor.u32 %v1076_v30, %v1072_v19 }
  0xdd   : > { %v3177_v37 = vpop.permute.xlu1 %1304  ;;  %v1303_v38 = vpop.permute.xlu0 %1302  ;;  %v1065_v25 = vor.u32 %v1064_v36, %v1060_v14  ;;  %v1081_v36 = vrot.slane %v1079_v11, 1 }
  0xde   : > { %v1563_v15 = vsel %vm1553_vm7, %v1530_v7, %v1303_v38  ;;  %v1565_v14 = vsel %vm1553_vm7, %v1532_v29, %v3177_v37  ;;  %v887_v7 = vpack.c.bf16 %v852_v6, %v852_v6 }
  0xdf   : > { %1224 = vrot.lane.b32.xlu1 %v3152_v17, %s2580_s22  ;;  %1444 = vrot.lane.b32.xlu0 %v3174_v32, %s2583_s10  ;;  %v3213_v12 = vsel %vm890_vm2, %v1065_v25, %v1069_v58 }
  0xe1   : > { %v1337_v44 = vpop.permute.xlu1 %1336  ;;  %v1335_v55 = vpop.permute.xlu0 %1334 }
  0xe2   : > { %v1596_v59 = vsel %vm1586_vm8, %v1563_v15, %v1335_v55  ;;  %v1598_v39 = vsel %vm1586_vm8, %v1565_v14, %v1337_v44 }
  0xe3   : > { %1256 = vrot.lane.b32.xlu1 %v3174_v32, %s2579_s19  ;;  %1254 = vrot.lane.b32.xlu0 %v3108_v57, %s2579_s19  ;;  %v2431_v57 = vld [vmem:[%s443_s29] sm:$0xff]  }
  0xe4   : > { %v2432_v16 = vunpack.c.l.bf16 %v2431_v57  ;;  %v2433_v20 = vunpack.c.h.bf16 %v2431_v57 }
  0xe5   : > { %v1369_v61 = vpop.permute.xlu1 %1368  ;;  %v1367_v41 = vpop.permute.xlu0 %1366 }
  0xe6   : > { %v1629_v33 = vsel %vm1619_vm9, %v1596_v59, %v1367_v41  ;;  %v656_v35 = vmul.f32 %v3078_v22, %v2433_v20  ;;  %v1631_v0 = vsel %vm1619_vm9, %v1598_v39, %v1369_v61  ;;  %v1161_v41 = vrot.slane %v3192_v24, 1 }
  0xe7   : > { %1288 = vrot.lane.b32.xlu1 %v3164_v31, %s2576_s16  ;;  %1286 = vrot.lane.b32.xlu0 %v3072_v46, %s2576_s16 }
  0xe8   : > { %v658_v55 = vadd.f32 %v3102_v9, %v656_v35  ;;  %v1163_v54 = vsel %vm1115_vm1, %v1161_v41, %v1162_v43 }
  0xe9   : > { %v1401_v49 = vpop.permute.xlu1 %1400  ;;  %v1399_v51 = vpop.permute.xlu0 %1398 }
  0xea   : > { %v1662_v10 = vsel %vm1652_vm10, %v1629_v33, %v1399_v51  ;;  %v1664_v42 = vsel %vm1652_vm10, %v1631_v0, %v1401_v49 }
  0xeb   : > { %1320 = vrot.lane.b32.xlu1 %v3213_v12, %s2581_s30  ;;  %1318 = vrot.lane.b32.xlu0 %v3152_v17, %s2581_s30  ;;  %v655_v17 = vmul.f32 %v3078_v22, %v2432_v16  ;;  %v758_v22 = vrot.slane %v653_v48, 7 }
  0xed   : > { %v3238_v47 = vpop.permute.xlu1 %1210  ;;  %v1431_v38 = vpop.permute.xlu0 %1430  ;;  %v657_v44 = vadd.f32 %v3102_v9, %v655_v17  ;;  %v760_v60 = vsel %vm709_vm0, %v758_v22, %v759_v50  ;;  %v834_v56 = vsel %vm709_vm0, 0.0, %v758_v22  ;;  %v660_v9 = vmax.f32 %v658_v55, 0.0 }
  0xee   : > { %v1695_v18 = vsel %vm1685_vm12, %v1662_v10, %v1431_v38  ;;  %v3271_v63 = vpack.c.bf16 %v760_v60, %v834_v56  ;;  %v1468_v38 = vsel %vm1454_vm4, %v2827_v3, %v3238_v47 }
  0xef   : > { %1352 = vrot.lane.b32.xlu1 %v3220_v27, %s2578_s18  ;;  %1350 = vrot.lane.b32.xlu0 %v3174_v32, %s2578_s18  ;;  %v1082_v32 = vsel %vm890_vm2, %v1077_v40, %v1081_v36  ;;  %v659_v61 = vmax.f32 %v657_v44, 0.0  ;;  %v672_v13 = vmul.f32 0.0, %v660_v9 }
  0xf0   : > { %2483 = vmatprep.mubr.msk.bf16.mxu0 %vm1738_vm11, %v1695_v18  ;;  %v1167_v49 = vshll.u32 %v3271_v63, 16  ;;  %v1165_v15 = vshrl.u32 %v3271_v63, 16  ;;  %v1178_v17 = vrot.slane %v3271_v63, 1 }
  0xf1   : > { %v3253_v37 = vpop.permute.xlu1 %1212  ;;  %v1433_v45 = vpop.permute.xlu0 %1432  ;;  %v671_v5 = vmul.f32 0.0, %v659_v61  ;;  %v762_v20 = vrot.slane %v672_v13, 7 }
  0xf2   : > { %v1697_v53 = vsel %vm1685_vm12, %v1664_v42, %v1433_v45  ;;  %v1169_v19 = vrot.slane %v1167_v49, 1  ;;  %v1470_v47 = vsel %vm1454_vm4, %v2842_v26, %v3253_v37 }
  0xf3   : > { %1384 = vrot.lane.b32.xlu1 %v3192_v24, %s2577_s17  ;;  %1382 = vrot.lane.b32.xlu0 %v3164_v31, %s2577_s17  ;;  %v761_v16 = vrot.slane %v671_v5, 7  ;;  %v853_v10 = vsel %vm709_vm0, %v762_v20, 0.0 }
  0xf4   : > { %2484 = vmatmul.mubr.msk.bf16.gmra.mrb[8].mxu0 %vm1738_vm11, %v1697_v53  ;;  %v1170_v4 = vor.u32 %v1169_v19, %v1165_v15  ;;  %v889_v18 = vpack.c.bf16 %v853_v10, %v853_v10 }
  0xf5   : > { %v1245_v25 = vpop.permute.xlu1 %1244  ;;  %v1243_v58 = vpop.permute.xlu0 %1242  ;;  %v763_v30 = vsel %vm709_vm0, %v761_v16, %v762_v20  ;;  %v835_v11 = vsel %vm709_vm0, 0.0, %v761_v16 }
  0xf6   : > { %v888_v48 = vpack.c.bf16 %v763_v30, %v835_v11  ;;  %v1501_v35 = vsel %vm1487_vm5, %v1468_v38, %v1243_v58  ;;  %v1503_v50 = vsel %vm1487_vm5, %v1470_v47, %v1245_v25  ;;  %v1189_v53 = vshll.u32 %v889_v18, 16 }
  0xf7   : > { %1416 = vrot.lane.b32.xlu1 %v1082_v32, %s2582_s9  ;;  %1414 = vrot.lane.b32.xlu0 %v3213_v12, %s2582_s9 }
  0xf8   : > { %v1184_v39 = vshll.u32 %v888_v48, 16  ;;  %v1182_v45 = vshrl.u32 %v888_v48, 16  ;;  %v1191_v41 = vrot.slane %v1189_v53, 1  ;;  %v1195_v13 = vrot.slane %v888_v48, 1 }
  0xf9   : > { %v1277_v57 = vpop.permute.xlu1 %1276  ;;  %v1275_v1 = vpop.permute.xlu0 %1274 }
  0xfa   : > { %v1534_v0 = vsel %vm1520_vm6, %v1501_v35, %v1275_v1  ;;  %v1186_v55 = vrot.slane %v1184_v39, 1  ;;  %v1536_v58 = vsel %vm1520_vm6, %v1503_v50, %v1277_v57 }
  0xfb   : > { %1226 = vrot.lane.b32.xlu1 %v3213_v12, %s2580_s22  ;;  %1446 = vrot.lane.b32.xlu0 %v3220_v27, %s2583_s10  ;;  %v1172_v12 = vshll.u32 %v887_v7, 16 }
  0xfc   : > { %v1187_v9 = vor.u32 %v1186_v55, %v1182_v45 }
  0xfd   : > { %v1309_v52 = vpop.permute.xlu1 %1308  ;;  %v1307_v51 = vpop.permute.xlu0 %1306  ;;  %v1174_v33 = vrot.slane %v1172_v12, 1 }
  0xfe   : > { %v1567_v3 = vsel %vm1553_vm7, %v1534_v0, %v1307_v51  ;;  %v1569_v56 = vsel %vm1553_vm7, %v1536_v58, %v1309_v52  ;;  %v1192_v5 = vsel %vm890_vm2, %v1187_v9, %v1191_v41 }
  0xff   : > { %1228 = vrot.lane.b32.xlu1 %v1082_v32, %s2580_s22  ;;  %1448 = vrot.lane.b32.xlu0 %v1163_v54, %s2583_s10  ;;  %v1175_v14 = vsel %vm890_vm2, %v1170_v4, %v1174_v33 }
 0x101   : > { %v1341_v28 = vpop.permute.xlu1 %1340  ;;  %v1339_v59 = vpop.permute.xlu0 %1338 }
 0x102   : > { %v1600_v22 = vsel %vm1586_vm8, %v1567_v3, %v1339_v59 }
 0x103   : > { %1260 = vrot.lane.b32.xlu1 %v1163_v54, %s2579_s19  ;;  %1258 = vrot.lane.b32.xlu0 %v3220_v27, %s2579_s19  ;;  %v1179_v27 = vrot.slane %v887_v7, 1  ;;  %s2333_s19 = sshll.u32 %s3572_s24, 1 }
 0x105   : > { %v1373_v21 = vpop.permute.xlu1 %1372  ;;  %v1371_v29 = vpop.permute.xlu0 %1370  ;;  %v1180_v42 = vsel %vm1115_vm1, %v1178_v17, %v1179_v27 }
 0x106   : > { %v1633_v44 = vsel %vm1619_vm9, %v1600_v22, %v1371_v29 }
 0x107   : > { %1292 = vrot.lane.b32.xlu1 %v3271_v63, %s2576_s16  ;;  %1290 = vrot.lane.b32.xlu0 %v3192_v24, %s2576_s16 }
 0x109   : > { %v1405_v40 = vpop.permute.xlu1 %1404  ;;  %v1403_v36 = vpop.permute.xlu0 %1402 }
 0x10a   : > { %v1666_v60 = vsel %vm1652_vm10, %v1633_v44, %v1403_v36 }
 0x10b   : > { %1324 = vrot.lane.b32.xlu1 %v1175_v14, %s2581_s30  ;;  %1322 = vrot.lane.b32.xlu0 %v1082_v32, %s2581_s30  ;;  %v1602_v32 = vsel %vm1586_vm8, %v1569_v56, %v1341_v28 }
 0x10c   : > { %v1635_v25 = vsel %vm1619_vm9, %v1602_v32, %v1373_v21 }
 0x10d   : > { %v1215_v26 = vpop.permute.xlu1 %1214  ;;  %v1435_v37 = vpop.permute.xlu0 %1434  ;;  %v1668_v43 = vsel %vm1652_vm10, %v1635_v25, %v1405_v40 }
 0x10e   : > { %v1699_v61 = vsel %vm1685_vm12, %v1666_v60, %v1435_v37  ;;  %v1472_v59 = vsel %vm1454_vm4, %v2877_v62, %v1215_v26 }
 0x10f   : > { %1356 = vrot.lane.b32.xlu1 %v1180_v42, %s2578_s18  ;;  %1354 = vrot.lane.b32.xlu0 %v1163_v54, %s2578_s18  ;;  %v1196_v54 = vrot.slane %v889_v18, 1  ;;  %s3400_s18 = scalar_lea.vmem %s3565_s6, %s2361_s28 }
 0x110   : > { %2487 = vmatprep.mubr.msk.bf16.mxu0 %vm1738_vm11, %v1699_v61 }
 0x111   : > { %v1217_v57 = vpop.permute.xlu1 %1216  ;;  %v1437_v1 = vpop.permute.xlu0 %1436  ;;  %v1197_v52 = vsel %vm1115_vm1, %v1195_v13, %v1196_v54 }
 0x112   : > { %v1701_v6 = vsel %vm1685_vm12, %v1668_v43, %v1437_v1  ;;  %v1474_v21 = vsel %vm1454_vm4, %v2892_v23, %v1217_v57 }
 0x113   : > { %1388 = vrot.lane.b32.xlu1 %v888_v48, %s2577_s17  ;;  %1386 = vrot.lane.b32.xlu0 %v3271_v63, %s2577_s17 }
 0x114   : > { %2488 = vmatmul.mubr.msk.bf16.gmra.mrb[12].mxu0 %vm1738_vm11, %v1701_v6 }
 0x115   : > { %v1249_v7 = vpop.permute.xlu1 %1248  ;;  %v1247_v49 = vpop.permute.xlu0 %1246 }
 0x116   : > { %v1505_v30 = vsel %vm1487_vm5, %v1472_v59, %v1247_v49  ;;  %v1507_v10 = vsel %vm1487_vm5, %v1474_v21, %v1249_v7 }
 0x117   : > { %1420 = vrot.lane.b32.xlu1 %v1192_v5, %s2582_s9  ;;  %1418 = vrot.lane.b32.xlu0 %v1175_v14, %s2582_s9  ;;  %s465_s9 = scalar_lea.vmem %s3566_s7, %s2333_s19 }
 0x119   : > { %v1281_v51 = vpop.permute.xlu1 %1280  ;;  %v1279_v16 = vpop.permute.xlu0 %1278 }
 0x11a   : > { %v1538_v11 = vsel %vm1520_vm6, %v1505_v30, %v1279_v16  ;;  %v1540_v17 = vsel %vm1520_vm6, %v1507_v10, %v1281_v51 }
 0x11b   : > { %1452 = vrot.lane.b32.xlu1 %v1197_v52, %s2583_s10  ;;  %1450 = vrot.lane.b32.xlu0 %v1180_v42, %s2583_s10 }
 0x11d   : > { %v1313_v63 = vpop.permute.xlu1 %1312  ;;  %v1311_v20 = vpop.permute.xlu0 %1310 }
 0x11e   : > { %v1571_v48 = vsel %vm1553_vm7, %v1538_v11, %v1311_v20  ;;  %v1573_v14 = vsel %vm1553_vm7, %v1540_v17, %v1313_v63 }
 0x121   : > { %v1345_v15 = vpop.permute.xlu1 %1344  ;;  %v1343_v19 = vpop.permute.xlu0 %1342 }
 0x122   : > { %v1604_v29 = vsel %vm1586_vm8, %v1571_v48, %v1343_v19  ;;  %v1606_v39 = vsel %vm1586_vm8, %v1573_v14, %v1345_v15 }
 0x125   : > { %v1377_v12 = vpop.permute.xlu1 %1376  ;;  %v1375_v28 = vpop.permute.xlu0 %1374 }
 0x126   : > { %v1637_v38 = vsel %vm1619_vm9, %v1604_v29, %v1375_v28  ;;  %v1639_v23 = vsel %vm1619_vm9, %v1606_v39, %v1377_v12 }
 0x129   : > { %v1409_v4 = vpop.permute.xlu1 %1408  ;;  %v1407_v33 = vpop.permute.xlu0 %1406 }
 0x12a   : > { %v1670_v62 = vsel %vm1652_vm10, %v1637_v38, %v1407_v33  ;;  %v1672_v0 = vsel %vm1652_vm10, %v1639_v23, %v1409_v4 }
 0x12d   : > { %v1219_v27 = vpop.permute.xlu1 %1218  ;;  %v1439_v35 = vpop.permute.xlu0 %1438 }
 0x12e   : > { %v1703_v18 = vsel %vm1685_vm12, %v1670_v62, %v1439_v35  ;;  %v1476_v26 = vsel %vm1454_vm4, %v2938_v2, %v1219_v27 }
 0x12f   : > { %2491 = vmatprep.mubr.msk.bf16.mxu1 %vm1738_vm11, %v1703_v18 }
 0x131   : > { %v1221_v40 = vpop.permute.xlu1 %1220  ;;  %v1441_v36 = vpop.permute.xlu0 %1440 }
 0x132   : > { %v1705_v3 = vsel %vm1685_vm12, %v1672_v0, %v1441_v36  ;;  %v1478_v9 = vsel %vm1454_vm4, %v2962_v34, %v1221_v40 }
 0x133   : > { %2492 = vmatmul.mubr.msk.bf16.vlgmr.msra.gmra.mrb[0].mxu1 %vm1738_vm11, %v1705_v3 }
 0x135   : > { %v1253_v47 = vpop.permute.xlu1 %1252  ;;  %v1251_v22 = vpop.permute.xlu0 %1250 }
 0x136   : > { %v1509_v37 = vsel %vm1487_vm5, %v1476_v26, %v1251_v22  ;;  %v1511_v43 = vsel %vm1487_vm5, %v1478_v9, %v1253_v47 }
 0x139   : > { %v1285_v42 = vpop.permute.xlu1 %1284  ;;  %v1283_v45 = vpop.permute.xlu0 %1282 }
 0x13a   : > { %v1542_v56 = vsel %vm1520_vm6, %v1509_v37, %v1283_v45  ;;  %v1544_v1 = vsel %vm1520_vm6, %v1511_v43, %v1285_v42 }
 0x13d   : > { %v1317_v50 = vpop.permute.xlu1 %1316  ;;  %v1315_v44 = vpop.permute.xlu0 %1314 }
 0x13e   : > { %v1575_v25 = vsel %vm1553_vm7, %v1542_v56, %v1315_v44  ;;  %v1577_v13 = vsel %vm1553_vm7, %v1544_v1, %v1317_v50 }
 0x141   : > { %v1349_v55 = vpop.permute.xlu1 %1348  ;;  %v1347_v53 = vpop.permute.xlu0 %1346 }
 0x142   : > { %v1608_v41 = vsel %vm1586_vm8, %v1575_v25, %v1347_v53  ;;  %v1610_v7 = vsel %vm1586_vm8, %v1577_v13, %v1349_v55 }
 0x145   : > { %v1381_v58 = vpop.permute.xlu1 %1380  ;;  %v1379_v60 = vpop.permute.xlu0 %1378 }
 0x146   : > { %v1641_v57 = vsel %vm1619_vm9, %v1608_v41, %v1379_v60  ;;  %v1643_v34 = vsel %vm1619_vm9, %v1610_v7, %v1381_v58 }
 0x149   : > { %v1413_v61 = vpop.permute.xlu1 %1412  ;;  %v1411_v32 = vpop.permute.xlu0 %1410 }
 0x14a   : > { %v1674_v2 = vsel %vm1652_vm10, %v1641_v57, %v1411_v32  ;;  %v1676_v49 = vsel %vm1652_vm10, %v1643_v34, %v1413_v61 }
 0x14d   : > { %v1223_v6 = vpop.permute.xlu1 %1222  ;;  %v1443_v5 = vpop.permute.xlu0 %1442 }
 0x14e   : > { %v1707_v54 = vsel %vm1685_vm12, %v1674_v2, %v1443_v5  ;;  %v1480_v33 = vsel %vm1454_vm4, %v3045_v8, %v1223_v6 }
 0x14f   : > { %2495 = vmatprep.mubr.msk.bf16.mxu1 %vm1738_vm11, %v1707_v54 }
 0x151   : > { %v1225_v52 = vpop.permute.xlu1 %1224  ;;  %v1445_v51 = vpop.permute.xlu0 %1444 }
 0x152   : > { %v1709_v16 = vsel %vm1685_vm12, %v1676_v49, %v1445_v51  ;;  %v1482_v17 = vsel %vm1454_vm4, %v3072_v46, %v1225_v52 }
 0x153   : > { %2496 = vmatmul.mubr.msk.bf16.gmra.mrb[4].mxu1 %vm1738_vm11, %v1709_v16 }
 0x155   : > { %v1257_v63 = vpop.permute.xlu1 %1256  ;;  %v1255_v20 = vpop.permute.xlu0 %1254 }
 0x156   : > { %v1513_v48 = vsel %vm1487_vm5, %v1480_v33, %v1255_v20  ;;  %v1515_v27 = vsel %vm1487_vm5, %v1482_v17, %v1257_v63 }
 0x159   : > { %v1289_v15 = vpop.permute.xlu1 %1288  ;;  %v1287_v19 = vpop.permute.xlu0 %1286 }
 0x15a   : > { %v1546_v21 = vsel %vm1520_vm6, %v1513_v48, %v1287_v19  ;;  %v1548_v14 = vsel %vm1520_vm6, %v1515_v27, %v1289_v15 }
 0x15d   : > { %v1321_v12 = vpop.permute.xlu1 %1320  ;;  %v1319_v28 = vpop.permute.xlu0 %1318 }
 0x15e   : > { %v1579_v38 = vsel %vm1553_vm7, %v1546_v21, %v1319_v28  ;;  %v1581_v23 = vsel %vm1553_vm7, %v1548_v14, %v1321_v12 }
 0x161   : > { %v1353_v59 = vpop.permute.xlu1 %1352  ;;  %v1351_v30 = vpop.permute.xlu0 %1350 }
 0x162   : > { %v1612_v62 = vsel %vm1586_vm8, %v1579_v38, %v1351_v30  ;;  %v1614_v40 = vsel %vm1586_vm8, %v1581_v23, %v1353_v59 }
 0x165   : > { %v1385_v11 = vpop.permute.xlu1 %1384  ;;  %v1383_v4 = vpop.permute.xlu0 %1382 }
 0x166   : > { %v1645_v35 = vsel %vm1619_vm9, %v1612_v62, %v1383_v4  ;;  %v1647_v46 = vsel %vm1619_vm9, %v1614_v40, %v1385_v11 }
 0x169   : > { %v1417_v29 = vpop.permute.xlu1 %1416  ;;  %v1415_v10 = vpop.permute.xlu0 %1414 }
 0x16a   : > { %v1678_v8 = vsel %vm1652_vm10, %v1645_v35, %v1415_v10  ;;  %v1680_v36 = vsel %vm1652_vm10, %v1647_v46, %v1417_v29 }
 0x16d   : > { %v1227_v18 = vpop.permute.xlu1 %1226  ;;  %v1447_v39 = vpop.permute.xlu0 %1446 }
 0x16e   : > { %v1711_v0 = vsel %vm1685_vm12, %v1678_v8, %v1447_v39  ;;  %v1484_v61 = vsel %vm1454_vm4, %v3164_v31, %v1227_v18 }
 0x16f   : > { %2499 = vmatprep.mubr.msk.bf16.mxu1 %vm1738_vm11, %v1711_v0 }
 0x171   : > { %v1229_v3 = vpop.permute.xlu1 %1228  ;;  %v1449_v47 = vpop.permute.xlu0 %1448 }
 0x172   : > { %v1713_v22 = vsel %vm1685_vm12, %v1680_v36, %v1449_v47  ;;  %v1486_v56 = vsel %vm1454_vm4, %v3192_v24, %v1229_v3 }
 0x173   : > { %2500 = vmatmul.mubr.msk.bf16.gmra.mrb[8].mxu1 %vm1738_vm11, %v1713_v22 }
 0x175   : > { %v1261_v42 = vpop.permute.xlu1 %1260  ;;  %v1259_v45 = vpop.permute.xlu0 %1258 }
 0x176   : > { %v1519_v32 = vsel %vm1487_vm5, %v1486_v56, %v1261_v42  ;;  %v1517_v25 = vsel %vm1487_vm5, %v1484_v61, %v1259_v45 }
 0x179   : > { %v1293_v50 = vpop.permute.xlu1 %1292  ;;  %v1291_v44 = vpop.permute.xlu0 %1290 }
 0x17a   : > { %v1552_v9 = vsel %vm1520_vm6, %v1519_v32, %v1293_v50  ;;  %v1550_v24 = vsel %vm1520_vm6, %v1517_v25, %v1291_v44 }
 0x17d   : > { %v1325_v55 = vpop.permute.xlu1 %1324  ;;  %v1323_v53 = vpop.permute.xlu0 %1322 }
 0x17e   : > { %v1585_v57 = vsel %vm1553_vm7, %v1552_v9, %v1325_v55  ;;  %v1583_v31 = vsel %vm1553_vm7, %v1550_v24, %v1323_v53 }
 0x181   : > { %v1357_v58 = vpop.permute.xlu1 %1356  ;;  %v1355_v60 = vpop.permute.xlu0 %1354 }
 0x182   : > { %v1618_v1 = vsel %vm1586_vm8, %v1585_v57, %v1357_v58  ;;  %v1616_v6 = vsel %vm1586_vm8, %v1583_v31, %v1355_v60 }
 0x185   : > { %v1389_v26 = vpop.permute.xlu1 %1388  ;;  %v1387_v37 = vpop.permute.xlu0 %1386 }
 0x186   : > { %v1651_v5 = vsel %vm1619_vm9, %v1618_v1, %v1389_v26  ;;  %v1649_v54 = vsel %vm1619_vm9, %v1616_v6, %v1387_v37 }
 0x189   : > { %v1421_v41 = vpop.permute.xlu1 %1420  ;;  %v1419_v43 = vpop.permute.xlu0 %1418 }
 0x18a   : > { %v1684_v7 = vsel %vm1652_vm10, %v1651_v5, %v1421_v41  ;;  %v1682_v51 = vsel %vm1652_vm10, %v1649_v54, %v1419_v43 }
 0x18b   : > { %v2477_v2 = vpop.f32.mrb[0].mxu0 }
 0x18c   : > { %1938 = vst.msk [vmem:[%s3400_s18 + $0x10] sm:$0xff] %vm1454_vm4, %v2477_v2  ;;  %v1809_v13 = vpop.f32.mrb[1].mxu0  ;;  %v2039_v16 = vmul.f32 %v2477_v2, %v2477_v2  ;;  %v1971_v11 = vsel %vm1454_vm4, %v2477_v2, 0.0 }
 0x18d   : > { %1936 = vst.msk [vmem:[%s3400_s18] sm:$0xff] %vm1454_vm4, %v1809_v13  ;;  %v2037_v34 = vmul.f32 %v1809_v13, %v1809_v13  ;;  %v2478_v49 = vpop.f32.mrb[2].mxu0  ;;  %v1453_v52 = vpop.permute.xlu1 %1452  ;;  %v1968_v19 = vsel %vm1454_vm4, %v1809_v13, 0.0 }
 0x18e   : > { %1939 = vst.msk [vmem:[%s3400_s18 + $0x18] sm:$0xff] %vm1454_vm4, %v2478_v49  ;;  %v1717_v63 = vsel %vm1685_vm12, %v1684_v7, %v1453_v52  ;;  %v1812_v20 = vpop.f32.mrb[3].mxu0  ;;  %v1451_v15 = vpop.permute.xlu0 %1450  ;;  %v2040_v33 = vmul.f32 %v2478_v49, %v2478_v49  ;;  %v2072_v10 = vsel %vm1454_vm4, %v2039_v16, 0.0  ;;  %v1973_v38 = vsel %vm1454_vm4, %v2478_v49, 0.0 }
 0x18f   : > { %1937 = vst.msk [vmem:[%s3400_s18 + $0x8] sm:$0xff] %vm1454_vm4, %v1812_v20  ;;  %v1969_v12 = vsel %vm1454_vm4, %v1812_v20, 0.0  ;;  %v2038_v28 = vmul.f32 %v1812_v20, %v1812_v20  ;;  %v1715_v59 = vsel %vm1685_vm12, %v1682_v51, %v1451_v15  ;;  %v2069_v4 = vsel %vm1454_vm4, %v2037_v34, 0.0 }
 0x190   : > { %v1970_v30 = vadd.f32 %v1969_v12, %v1968_v19  ;;  %2503 = vmatprep.mubr.msk.bf16.mxu1 %vm1738_vm11, %v1715_v59  ;;  %v2074_v27 = vsel %vm1454_vm4, %v2040_v33, 0.0 }
 0x191   : > { %v2070_v48 = vsel %vm1454_vm4, %v2038_v28, 0.0  ;;  %2504 = vmatmul.mubr.msk.bf16.gmra.mrb[12].mxu1 %vm1738_vm11, %v1717_v63 }
 0x192   : > { %v1972_v21 = vadd.f32 %v1971_v11, %v1970_v30  ;;  %v2071_v29 = vadd.f32 %v2070_v48, %v2069_v4 }
 0x194   : > { %v2073_v17 = vadd.f32 %v2072_v10, %v2071_v29  ;;  %v1974_v62 = vadd.f32 %v1973_v38, %v1972_v21 }
 0x196   : > { %v2075_v35 = vadd.f32 %v2074_v27, %v2073_v17 }
 0x1a7   : > { %v2481_v14 = vpop.f32.mrb[4].mxu0 }
 0x1a8   : > { %1942 = vst.msk [vmem:[%s3400_s18 + $0x30] sm:$0xff] %vm1454_vm4, %v2481_v14  ;;  %v1825_v8 = vpop.f32.mrb[5].mxu0  ;;  %v2043_v46 = vmul.f32 %v2481_v14, %v2481_v14  ;;  %v1979_v45 = vsel %vm1454_vm4, %v2481_v14, 0.0 }
 0x1a9   : > { %1940 = vst.msk [vmem:[%s3400_s18 + $0x20] sm:$0xff] %vm1454_vm4, %v1825_v8  ;;  %v1975_v18 = vsel %vm1454_vm4, %v1825_v8, 0.0  ;;  %v2041_v39 = vmul.f32 %v1825_v8, %v1825_v8  ;;  %v2482_v23 = vpop.f32.mrb[6].mxu0 }
 0x1aa   : > { %v1976_v0 = vadd.f32 %v1975_v18, %v1974_v62  ;;  %1943 = vst.msk [vmem:[%s3400_s18 + $0x38] sm:$0xff] %vm1454_vm4, %v2482_v23  ;;  %v1828_v40 = vpop.f32.mrb[7].mxu0  ;;  %v2044_v50 = vmul.f32 %v2482_v23, %v2482_v23  ;;  %v2080_v58 = vsel %vm1454_vm4, %v2043_v46, 0.0  ;;  %v1981_v60 = vsel %vm1454_vm4, %v2482_v23, 0.0 }
 0x1ab   : > { %v2076_v36 = vsel %vm1454_vm4, %v2041_v39, 0.0  ;;  %1941 = vst.msk [vmem:[%s3400_s18 + $0x28] sm:$0xff] %vm1454_vm4, %v1828_v40  ;;  %v1977_v3 = vsel %vm1454_vm4, %v1828_v40, 0.0  ;;  %v2042_v47 = vmul.f32 %v1828_v40, %v1828_v40 }
 0x1ac   : > { %v2077_v22 = vadd.f32 %v2076_v36, %v2075_v35  ;;  %v1978_v42 = vadd.f32 %v1977_v3, %v1976_v0  ;;  %v2082_v56 = vsel %vm1454_vm4, %v2044_v50, 0.0 }
 0x1ad   : > { %v2078_v44 = vsel %vm1454_vm4, %v2042_v47, 0.0 }
 0x1ae   : > { %v1980_v55 = vadd.f32 %v1979_v45, %v1978_v42  ;;  %v2079_v53 = vadd.f32 %v2078_v44, %v2077_v22 }
 0x1b0   : > { %v2081_v26 = vadd.f32 %v2080_v58, %v2079_v53  ;;  %v1982_v37 = vadd.f32 %v1981_v60, %v1980_v55 }
 0x1b2   : > { %v2083_v61 = vadd.f32 %v2082_v56, %v2081_v26 }
 0x1c7   : > { %v2485_v32 = vpop.f32.mrb[8].mxu0 }
 0x1c8   : > { %1946 = vst.msk [vmem:[%s3400_s18 + $0x50] sm:$0xff] %vm1454_vm4, %v2485_v32  ;;  %v1841_v25 = vpop.f32.mrb[9].mxu0  ;;  %v2047_v31 = vmul.f32 %v2485_v32, %v2485_v32  ;;  %v1987_v54 = vsel %vm1454_vm4, %v2485_v32, 0.0 }
 0x1c9   : > { %1944 = vst.msk [vmem:[%s3400_s18 + $0x40] sm:$0xff] %vm1454_vm4, %v1841_v25  ;;  %v1983_v9 = vsel %vm1454_vm4, %v1841_v25, 0.0  ;;  %v2045_v41 = vmul.f32 %v1841_v25, %v1841_v25  ;;  %v2486_v43 = vpop.f32.mrb[10].mxu0 }
 0x1ca   : > { %v1984_v24 = vadd.f32 %v1983_v9, %v1982_v37  ;;  %1947 = vst.msk [vmem:[%s3400_s18 + $0x58] sm:$0xff] %vm1454_vm4, %v2486_v43  ;;  %v1844_v57 = vpop.f32.mrb[11].mxu0  ;;  %v2048_v7 = vmul.f32 %v2486_v43, %v2486_v43  ;;  %v2088_v51 = vsel %vm1454_vm4, %v2047_v31, 0.0  ;;  %v1989_v16 = vsel %vm1454_vm4, %v2486_v43, 0.0 }
 0x1cb   : > { %v2084_v1 = vsel %vm1454_vm4, %v2045_v41, 0.0  ;;  %1945 = vst.msk [vmem:[%s3400_s18 + $0x48] sm:$0xff] %vm1454_vm4, %v1844_v57  ;;  %v1985_v2 = vsel %vm1454_vm4, %v1844_v57, 0.0  ;;  %v2046_v6 = vmul.f32 %v1844_v57, %v1844_v57 }
 0x1cc   : > { %v2085_v5 = vadd.f32 %v2084_v1, %v2083_v61  ;;  %v1986_v13 = vadd.f32 %v1985_v2, %v1984_v24  ;;  %v2090_v15 = vsel %vm1454_vm4, %v2048_v7, 0.0 }
 0x1cd   : > { %v2086_v34 = vsel %vm1454_vm4, %v2046_v6, 0.0 }
 0x1ce   : > { %v1988_v49 = vadd.f32 %v1987_v54, %v1986_v13  ;;  %v2087_v52 = vadd.f32 %v2086_v34, %v2085_v5 }
 0x1d0   : > { %v2089_v63 = vadd.f32 %v2088_v51, %v2087_v52  ;;  %v1990_v20 = vadd.f32 %v1989_v16, %v1988_v49 }
 0x1d2   : > { %v2091_v19 = vadd.f32 %v2090_v15, %v2089_v63 }
 0x1e7   : > { %v2489_v12 = vpop.f32.mrb[12].mxu0 }
 0x1e8   : > { %1950 = vst.msk [vmem:[%s3400_s18 + $0x70] sm:$0xff] %vm1454_vm4, %v2489_v12  ;;  %v1857_v28 = vpop.f32.mrb[13].mxu0  ;;  %v2051_v48 = vmul.f32 %v2489_v12, %v2489_v12  ;;  %v1995_v62 = vsel %vm1454_vm4, %v2489_v12, 0.0 }
 0x1e9   : > { %1948 = vst.msk [vmem:[%s3400_s18 + $0x60] sm:$0xff] %vm1454_vm4, %v1857_v28  ;;  %v1991_v59 = vsel %vm1454_vm4, %v1857_v28, 0.0  ;;  %v2049_v30 = vmul.f32 %v1857_v28, %v1857_v28  ;;  %v2490_v11 = vpop.f32.mrb[14].mxu0 }
 0x1ea   : > { %v1992_v4 = vadd.f32 %v1991_v59, %v1990_v20  ;;  %1951 = vst.msk [vmem:[%s3400_s18 + $0x78] sm:$0xff] %vm1454_vm4, %v2490_v11  ;;  %v1860_v33 = vpop.f32.mrb[15].mxu0  ;;  %v2052_v27 = vmul.f32 %v2490_v11, %v2490_v11  ;;  %v2096_v18 = vsel %vm1454_vm4, %v2051_v48, 0.0  ;;  %v1997_v39 = vsel %vm1454_vm4, %v2490_v11, 0.0 }
 0x1eb   : > { %v2092_v21 = vsel %vm1454_vm4, %v2049_v30, 0.0  ;;  %1949 = vst.msk [vmem:[%s3400_s18 + $0x68] sm:$0xff] %vm1454_vm4, %v1860_v33  ;;  %v1993_v29 = vsel %vm1454_vm4, %v1860_v33, 0.0  ;;  %v2050_v10 = vmul.f32 %v1860_v33, %v1860_v33 }
 0x1ec   : > { %v2093_v38 = vadd.f32 %v2092_v21, %v2091_v19  ;;  %v1994_v17 = vadd.f32 %v1993_v29, %v1992_v4  ;;  %v2098_v40 = vsel %vm1454_vm4, %v2052_v27, 0.0 }
 0x1ed   : > { %v2094_v35 = vsel %vm1454_vm4, %v2050_v10, 0.0 }
 0x1ee   : > { %v1996_v14 = vadd.f32 %v1995_v62, %v1994_v17  ;;  %v2095_v8 = vadd.f32 %v2094_v35, %v2093_v38 }
 0x1f0   : > { %v2097_v23 = vadd.f32 %v2096_v18, %v2095_v8  ;;  %v1998_v0 = vadd.f32 %v1997_v39, %v1996_v14 }
 0x1f2   : > { %v2099_v46 = vadd.f32 %v2098_v40, %v2097_v23 }
 0x206   : > { %v2493_v36 = vpop.f32.mrb[0].mxu1 }
 0x207   : > { %1954 = vst.msk [vmem:[%s3400_s18 + $0x90] sm:$0xff] %vm1454_vm4, %v2493_v36  ;;  %v1873_v3 = vpop.f32.mrb[1].mxu1  ;;  %v2055_v44 = vmul.f32 %v2493_v36, %v2493_v36  ;;  %v2003_v37 = vsel %vm1454_vm4, %v2493_v36, 0.0 }
 0x208   : > { %1952 = vst.msk [vmem:[%s3400_s18 + $0x80] sm:$0xff] %vm1454_vm4, %v1873_v3  ;;  %v1999_v47 = vsel %vm1454_vm4, %v1873_v3, 0.0  ;;  %v2053_v22 = vmul.f32 %v1873_v3, %v1873_v3  ;;  %v2494_v42 = vpop.f32.mrb[2].mxu1 }
 0x209   : > { %v2000_v45 = vadd.f32 %v1999_v47, %v1998_v0  ;;  %1955 = vst.msk [vmem:[%s3400_s18 + $0x98] sm:$0xff] %vm1454_vm4, %v2494_v42  ;;  %v1876_v50 = vpop.f32.mrb[3].mxu1  ;;  %v2056_v56 = vmul.f32 %v2494_v42, %v2494_v42  ;;  %v2104_v9 = vsel %vm1454_vm4, %v2055_v44, 0.0  ;;  %v2005_v41 = vsel %vm1454_vm4, %v2494_v42, 0.0 }
 0x20a   : > { %v2100_v55 = vsel %vm1454_vm4, %v2053_v22, 0.0  ;;  %1953 = vst.msk [vmem:[%s3400_s18 + $0x88] sm:$0xff] %vm1454_vm4, %v1876_v50  ;;  %v2001_v53 = vsel %vm1454_vm4, %v1876_v50, 0.0  ;;  %v2054_v58 = vmul.f32 %v1876_v50, %v1876_v50 }
 0x20b   : > { %v2101_v60 = vadd.f32 %v2100_v55, %v2099_v46  ;;  %v2002_v26 = vadd.f32 %v2001_v53, %v2000_v45  ;;  %v2106_v57 = vsel %vm1454_vm4, %v2056_v56, 0.0 }
 0x20c   : > { %v2102_v61 = vsel %vm1454_vm4, %v2054_v58, 0.0 }
 0x20d   : > { %v2004_v32 = vadd.f32 %v2003_v37, %v2002_v26  ;;  %v2103_v25 = vadd.f32 %v2102_v61, %v2101_v60 }
 0x20f   : > { %v2105_v43 = vadd.f32 %v2104_v9, %v2103_v25  ;;  %v2006_v24 = vadd.f32 %v2005_v41, %v2004_v32 }
 0x211   : > { %v2107_v31 = vadd.f32 %v2106_v57, %v2105_v43 }
 0x226   : > { %v2497_v1 = vpop.f32.mrb[4].mxu1 }
 0x227   : > { %1958 = vst.msk [vmem:[%s3400_s18 + $0xb0] sm:$0xff] %vm1454_vm4, %v2497_v1  ;;  %v1889_v2 = vpop.f32.mrb[5].mxu1  ;;  %v2059_v34 = vmul.f32 %v2497_v1, %v2497_v1  ;;  %v2011_v20 = vsel %vm1454_vm4, %v2497_v1, 0.0 }
 0x228   : > { %1956 = vst.msk [vmem:[%s3400_s18 + $0xa0] sm:$0xff] %vm1454_vm4, %v1889_v2  ;;  %v2007_v6 = vsel %vm1454_vm4, %v1889_v2, 0.0  ;;  %v2057_v5 = vmul.f32 %v1889_v2, %v1889_v2  ;;  %v2498_v13 = vpop.f32.mrb[6].mxu1 }
 0x229   : > { %v2008_v54 = vadd.f32 %v2007_v6, %v2006_v24  ;;  %1959 = vst.msk [vmem:[%s3400_s18 + $0xb8] sm:$0xff] %vm1454_vm4, %v2498_v13  ;;  %v1892_v7 = vpop.f32.mrb[7].mxu1  ;;  %v2060_v15 = vmul.f32 %v2498_v13, %v2498_v13  ;;  %v2112_v59 = vsel %vm1454_vm4, %v2059_v34, 0.0  ;;  %v2013_v30 = vsel %vm1454_vm4, %v2498_v13, 0.0 }
 0x22a   : > { %v2108_v49 = vsel %vm1454_vm4, %v2057_v5, 0.0  ;;  %1957 = vst.msk [vmem:[%s3400_s18 + $0xa8] sm:$0xff] %vm1454_vm4, %v1892_v7  ;;  %v2009_v52 = vsel %vm1454_vm4, %v1892_v7, 0.0  ;;  %v2058_v51 = vmul.f32 %v1892_v7, %v1892_v7 }
 0x22b   : > { %v2109_v16 = vadd.f32 %v2108_v49, %v2107_v31  ;;  %v2010_v63 = vadd.f32 %v2009_v52, %v2008_v54  ;;  %v2114_v33 = vsel %vm1454_vm4, %v2060_v15, 0.0 }
 0x22c   : > { %v2110_v19 = vsel %vm1454_vm4, %v2058_v51, 0.0 }
 0x22d   : > { %v2012_v12 = vadd.f32 %v2011_v20, %v2010_v63  ;;  %v2111_v28 = vadd.f32 %v2110_v19, %v2109_v16 }
 0x22f   : > { %v2113_v11 = vadd.f32 %v2112_v59, %v2111_v28  ;;  %v2014_v4 = vadd.f32 %v2013_v30, %v2012_v12 }
 0x231   : > { %v2115_v48 = vadd.f32 %v2114_v33, %v2113_v11 }
 0x246   : > { %v2501_v21 = vpop.f32.mrb[8].mxu1 }
 0x247   : > { %1962 = vst.msk [vmem:[%s3400_s18 + $0xd0] sm:$0xff] %vm1454_vm4, %v2501_v21  ;;  %v1905_v29 = vpop.f32.mrb[9].mxu1  ;;  %v2063_v35 = vmul.f32 %v2501_v21, %v2501_v21  ;;  %v2019_v0 = vsel %vm1454_vm4, %v2501_v21, 0.0 }
 0x248   : > { %1960 = vst.msk [vmem:[%s3400_s18 + $0xc0] sm:$0xff] %vm1454_vm4, %v1905_v29  ;;  %v2015_v10 = vsel %vm1454_vm4, %v1905_v29, 0.0  ;;  %v2061_v38 = vmul.f32 %v1905_v29, %v1905_v29  ;;  %v2502_v17 = vpop.f32.mrb[10].mxu1 }
 0x249   : > { %v2016_v62 = vadd.f32 %v2015_v10, %v2014_v4  ;;  %1963 = vst.msk [vmem:[%s3400_s18 + $0xd8] sm:$0xff] %vm1454_vm4, %v2502_v17  ;;  %v1908_v27 = vpop.f32.mrb[11].mxu1  ;;  %v2064_v40 = vmul.f32 %v2502_v17, %v2502_v17  ;;  %v2120_v47 = vsel %vm1454_vm4, %v2063_v35, 0.0  ;;  %v2021_v22 = vsel %vm1454_vm4, %v2502_v17, 0.0 }
 0x24a   : > { %v2116_v14 = vsel %vm1454_vm4, %v2061_v38, 0.0  ;;  %1961 = vst.msk [vmem:[%s3400_s18 + $0xc8] sm:$0xff] %vm1454_vm4, %v1908_v27  ;;  %v2017_v8 = vsel %vm1454_vm4, %v1908_v27, 0.0  ;;  %v2062_v18 = vmul.f32 %v1908_v27, %v1908_v27 }
 0x24b   : > { %v2117_v39 = vadd.f32 %v2116_v14, %v2115_v48  ;;  %v2018_v23 = vadd.f32 %v2017_v8, %v2016_v62  ;;  %v2122_v50 = vsel %vm1454_vm4, %v2064_v40, 0.0 }
 0x24c   : > { %v2118_v46 = vsel %vm1454_vm4, %v2062_v18, 0.0 }
 0x24d   : > { %v2020_v36 = vadd.f32 %v2019_v0, %v2018_v23  ;;  %v2119_v3 = vadd.f32 %v2118_v46, %v2117_v39 }
 0x24f   : > { %v2121_v42 = vadd.f32 %v2120_v47, %v2119_v3  ;;  %v2022_v45 = vadd.f32 %v2021_v22, %v2020_v36 }
 0x251   : > { %v2123_v44 = vadd.f32 %v2122_v50, %v2121_v42 }
 0x264   : > { %v2505_v55 = vpop.f32.mrb[12].mxu1 }
 0x265   : > { %1966 = vst.msk [vmem:[%s3400_s18 + $0xf0] sm:$0xff] %vm1454_vm4, %v2505_v55  ;;  %v1921_v53 = vpop.f32.mrb[13].mxu1  ;;  %v2067_v61 = vmul.f32 %v2505_v55, %v2505_v55  ;;  %v2027_v24 = vsel %vm1454_vm4, %v2505_v55, 0.0 }
 0x266   : > { %1964 = vst.msk [vmem:[%s3400_s18 + $0xe0] sm:$0xff] %vm1454_vm4, %v1921_v53  ;;  %v2023_v58 = vsel %vm1454_vm4, %v1921_v53, 0.0  ;;  %v2065_v60 = vmul.f32 %v1921_v53, %v1921_v53  ;;  %v2506_v26 = vpop.f32.mrb[14].mxu1 }
 0x267   : > { %v2024_v37 = vadd.f32 %v2023_v58, %v2022_v45  ;;  %1967 = vst.msk [vmem:[%s3400_s18 + $0xf8] sm:$0xff] %vm1454_vm4, %v2506_v26  ;;  %v1924_v56 = vpop.f32.mrb[15].mxu1  ;;  %v2068_v57 = vmul.f32 %v2506_v26, %v2506_v26  ;;  %v2128_v6 = vsel %vm1454_vm4, %v2067_v61, 0.0  ;;  %v2029_v5 = vsel %vm1454_vm4, %v2506_v26, 0.0 }
 0x268   : > { %v2124_v32 = vsel %vm1454_vm4, %v2065_v60, 0.0  ;;  %1965 = vst.msk [vmem:[%s3400_s18 + $0xe8] sm:$0xff] %vm1454_vm4, %v1924_v56  ;;  %v2025_v25 = vsel %vm1454_vm4, %v1924_v56, 0.0  ;;  %v2066_v9 = vmul.f32 %v1924_v56, %v1924_v56 }
 0x269   : > { %v2125_v41 = vadd.f32 %v2124_v32, %v2123_v44  ;;  %v2026_v43 = vadd.f32 %v2025_v25, %v2024_v37  ;;  %v2130_v7 = vsel %vm1454_vm4, %v2068_v57, 0.0 }
 0x26a   : > { %v2126_v31 = vsel %vm1454_vm4, %v2066_v9, 0.0 }
 0x26b   : > { %v2028_v1 = vadd.f32 %v2027_v24, %v2026_v43  ;;  %v2127_v2 = vadd.f32 %v2126_v31, %v2125_v41 }
 0x26d   : > { %v2030_v13 = vadd.f32 %v2029_v5, %v2028_v1  ;;  %v2129_v54 = vadd.f32 %v2128_v6, %v2127_v2 }
 0x26f   : > { %v2031_v34 = vrot.slane %v2030_v13, 4  ;;  %v2131_v49 = vadd.f32 %v2130_v7, %v2129_v54 }
 0x271   : > { %v2032_v52 = vadd.f32 %v2031_v34, %v2030_v13  ;;  %v2132_v51 = vrot.slane %v2131_v49, 4 }
 0x273   : > { %v2033_v16 = vrot.slane %v2032_v52, 2  ;;  %v2133_v63 = vadd.f32 %v2132_v51, %v2131_v49 }
 0x275   : > { %v2034_v20 = vadd.f32 %v2033_v16, %v2032_v52  ;;  %v2134_v15 = vrot.slane %v2133_v63, 2 }
 0x277   : > { %v2035_v19 = vrot.slane %v2034_v20, 1  ;;  %v2135_v12 = vadd.f32 %v2134_v15, %v2133_v63 }
 0x279   : > { %v2136_v28 = vrot.slane %v2135_v12, 1  ;;  %v2036_v59 = vadd.f32 %v2035_v19, %v2034_v20 }
 0x27b   : > { %v2137_v30 = vadd.f32 %v2136_v28, %v2135_v12 }
 0x27d   : > { %v2138_v11 = vsel %vm709_vm0, %v2036_v59, %v2137_v30 }
 0x27e   : > { %2140 = vst.msk [vmem:[%s465_s9] sm:$0x3] %vm2139_vm13, %v2138_v11 }
 0x27f PF: > { %s18_s26 = sadd.s32 1, %s2574_s26   ;;  %s3567_s24 = smov %s2570_s25 }
 0x280   : > { %p15_p5 = scmp.ge.s32.totalorder %s18_s26, 4   ;;  %s3568_s25 = smov %s3570_s27 }
 0x282   :  { %17 = sbr.rel (!%p15_p5) target bundleno = 2 (0x2), region = 92 }

// kernel: up_forward.3
= control target key start
LH: loop header
LB: loop body
LE: loop exit
PB: predicated region body
PF: predicated region fallthrough
CT: control target
= control target key end

     0   :  { %s4949_s27 = smov 0   ;;  %s4951_s28 = smov 0   ;;  %s6315_s0 = inlined_call_operand.vmem [shape: f32[2,16,16,4], index: 0, kind: input, shape index: {}, may-alias: {0,1,2}]   ;;  %s6316_s1 = inlined_call_operand.vmem [shape: f32[2,16,16,4], index: 1, kind: input, shape index: {}, may-alias: {0,1,2}]   ;;  %s6317_s2 = inlined_call_operand.vmem [shape: f32[2,16,16,4], index: 2, kind: input, shape index: {}, may-alias: {0,1,2}]   ;;  %s6318_s3 = inlined_call_operand.vmem [shape: f32[2,8,32], index: 3, kind: input, shape index: {}]   ;;  %s6319_s4 = inlined_call_operand.vmem [shape: f32[18,8], index: 4, kind: input, shape index: {}]   ;;  %s6320_s5 = inlined_call_operand.vmem [shape: f32[8,16], index: 5, kind: input, shape index: {}]   ;;  %s6321_s6 = inlined_call_operand.vmem [shape: bf16[72,4], index: 6, kind: input, shape index: {}]   ;;  %s6322_s7 = inlined_call_operand.vmem [shape: bf16[2,16,16,4], index: 7, kind: output, shape index: {0}]   ;;  %s6323_s8 = inlined_call_operand.vmem [shape: f32[2,1,2,4], index: 8, kind: output, shape index: {1}]  }
   0x1   :  { %s4953_s29 = smov 0  }
   0x2 LB: > { %s31_s30 = sadd.s32 1, %s4878_s28  ;;  %p4368_p0 = scmp.ge.s32.totalorder %s4882_s29, 1  ;;  %s4882_s29 = sphi %s4953_s29, %s19_s29   ;;  %s4878_s28 = sphi %s4951_s28, %s6325_s28   ;;  %s4874_s27 = sphi %s4949_s27, %s6324_s27  }
   0x3   : > { %p33_p1 = scmp.ge.s32.totalorder %s31_s30, 2  ;;  %p362_p2 = scmp.lt.s32.totalorder %s4882_s29, 3 }
   0x5   : > { %s6327_s30 = smov (%p33_p1, %s31_s30), 0  ;;  %p363_p3 = pnand %p4368_p0, %p362_p2 }
   0x6   : > { %p447_p4 = scmp.lt.s32.totalorder (!%p363_p3), %s4874_s27, 1  ;;  %v4884_v0 = vmov (!%p363_p3), 0.0   ;;  %vm4885_vm0 = vmmov (!%p363_p3), 0   ;;  %v561_v1 = vld [vmem:[%s6319_s4] sm:$0xff] (!%p363_p3)  ;;  %vm565_vm1 = vcmask (!%p363_p3), 64512   ;;  %v562_v3 = vld [vmem:[%s6319_s4 + $0x8] sm:$0xff] (!%p363_p3)  ;;  %v726_v15 = vlaneseq (!%p363_p3) }
   0x7   : > { %366 = sbr.rel (%p363_p3) target bundleno = 1591 (0x637), region = 48  ;;  %4519 = vmatprep.subr.mxu0 (!%p363_p3), %v4884_v0  ;;  %4521 = vmatprep.mubr.msk.f32.mxu0 (!%p363_p3), %vm4885_vm0, %v4884_v0  ;;  %v563_v4 = vld [vmem:[%s6319_s4 + $0x10] sm:$0x3] (!%p363_p3)  ;;  %s4886_s19 = smov (!%p363_p3), 116   ;;  %v4893_v13 = vmov (!%p363_p3), 1983009808  }
   0x8   : > { %4530 = vmatprep.subr.mxu1 (!%p363_p3), %v4884_v0  ;;  %4532 = vmatprep.mubr.msk.f32.mxu1 (!%p363_p3), %vm4885_vm0, %v4884_v0  ;;  %s4887_s20 = smov (!%p363_p3), 124   ;;  %s4888_s21 = smov (!%p363_p3), 112   ;;  %v724_v14 = vunpack.c.l.s4 (!%p363_p3), %v4893_v13  ;;  %v727_v19 = vshrl.u32 (!%p363_p3), %v726_v15, 7  ;;  %v4894_v20 = vmov (!%p363_p3), 1934713408   ;;  %v1619_v13 = vld [vmem:[%s6320_s5] sm:$0xff] (!%p363_p3) }
   0x9   : > { %s4889_s22 = smov (!%p363_p3), 120   ;;  %s4890_s23 = smov (!%p363_p3), 104   ;;  %v788_v21 = vunpack.c.l.s4 (!%p363_p3), %v4894_v20  ;;  %4531 = vmatpush3.msra.mxu1 (!%p363_p3), %v1619_v13  ;;  %vm2522_vm2 = vcmask (!%p363_p3), 31744   ;;  %vm2595_vm3 = vcmask (!%p363_p3), 1040384   ;;  %vm3001_vm4 = vcmask (!%p363_p3), 1046528  }
   0xa   : > { %s4891_s24 = smov (!%p363_p3), 108   ;;  %s4892_s25 = smov (!%p363_p3), 100   ;;  %v725_v18 = vunpack.c.0.s8 (!%p363_p3), %v724_v14  ;;  %vm2776_vm5 = vsmask.f32 (!%p363_p3), 7424  ;;  %vm3672_vm6 = vcmask (!%p363_p3), 1043456   ;;  %vm3372_vm7 = vcmask (!%p363_p3), 130048  }
   0xb   : > { %v789_v27 = vunpack.c.0.s8 (!%p363_p3), %v788_v21  ;;  %s4895_s10 = smov (!%p363_p3), 4   ;;  %s4896_s18 = smov (!%p363_p3), 24   ;;  %vm3405_vm8 = vcmask (!%p363_p3), 195584   ;;  %vm3438_vm9 = vcmask (!%p363_p3), 261120   ;;  %vm3471_vm10 = vcmask (!%p363_p3), 326656  }
   0xc   : > { %v5023_v25 = vsub.s32 (!%p363_p3), %v725_v18, %v727_v19  ;;  %s4902_s26 = smov (!%p363_p3), 32   ;;  %s4903_s16 = smov (!%p363_p3), 56   ;;  %vm3504_vm11 = vcmask (!%p363_p3), 392192   ;;  %vm3537_vm12 = vcmask (!%p363_p3), 457728   ;;  %vm3570_vm13 = vcmask (!%p363_p3), 523264  }
   0xd   : > { %v5032_v40 = vsub.s32 (!%p363_p3), %v789_v27, %v727_v19  ;;  %vm3639_vm14 = vcmask (!%p363_p3), 588800   ;;  %vm3965_vm15 = vcmask (!%p363_p3), 27648  }
   0xe   : > { %s6329_s27 = smov (!%p447_p4, %s4874_s27), 1 }
   0xf   : > { %s4375_s9 = sshll.u32 %s6329_s27, 3  ;;  %s5120_s11 = sshll.u32 %s6329_s27, 8 }
  0x10   : > { %s491_s12 = scalar_lea.vmem %s6318_s3, %s4375_s9  ;;  %s455_s14 = scalar_lea.vmem %s6315_s0, %s5120_s11 }
  0x11   : > { %v564_v2 = vld [vmem:[%s491_s12] sm:$0xff]  ;;  %s5130_s17 = scalar_lea.vmem %s6316_s1, %s5120_s11 }
  0x12   : > { %4520 = vmatpush3.msra.mxu0 %v564_v2 }
  0x13   : > { %4522 = vmatmul.mubr.msk.f32.vlgmr.msra.gmra.mrb[0].mxu0 %vm565_vm1, %v561_v1 }
  0x14   : > { %4524 = vmatprep.mubr.msk.f32.mxu0 %vm4885_vm0, %v4884_v0 }
  0x17   : > { %4525 = vmatmul.mubr.msk.f32.gmra.mrb[2].mxu0 %vm565_vm1, %v562_v3 }
  0x18   : > { %4527 = vmatprep.mubr.msk.f32.mxu0 %vm4885_vm0, %v4884_v0 }
  0x1b   : > { %4528 = vmatmul.mubr.msk.f32.gmra.mrb[4].mxu0 %vm565_vm1, %v563_v4 }
  0xe6   : > { %v4995_v5 = vpop.f32.mrb[0].mxu0 }
  0xe7   : > { %676 = vrot.lane.b32.xlu1 %v4995_v5, %s4886_s19  ;;  %658 = vrot.lane.b32.xlu0 %v4995_v5, %s4887_s20  ;;  %v4523_v6 = vpop.f32.mrb[1].mxu0 }
  0xea   : > { %v4999_v7 = vpop.f32.mrb[2].mxu0 }
  0xeb   : > { %685 = vrot.lane.b32.xlu1 %v4995_v5, %s4888_s21  ;;  %667 = vrot.lane.b32.xlu0 %v4995_v5, %s4889_s22  ;;  %v4526_v8 = vpop.f32.mrb[3].mxu0 }
  0xee   : > { %v5003_v9 = vpop.f32.mrb[4].mxu0 }
  0xef   : > { %703 = vrot.lane.b32.xlu1 %v4995_v5, %s4890_s23  ;;  %694 = vrot.lane.b32.xlu0 %v4995_v5, %s4891_s24  ;;  %v4529_v10 = vpop.f32.mrb[5].mxu0 }
  0xf3   : > { %712 = vrot.lane.b32.xlu0 %v4995_v5, %s4892_s25  ;;  %660 = vrot.lane.b32.xlu1 %v4999_v7, %s4887_s20 }
  0xf7   : > { %669 = vrot.lane.b32.xlu0 %v4999_v7, %s4889_s22  ;;  %678 = vrot.lane.b32.xlu1 %v4999_v7, %s4886_s19 }
  0xfb   : > { %687 = vrot.lane.b32.xlu0 %v4999_v7, %s4888_s21  ;;  %696 = vrot.lane.b32.xlu1 %v4999_v7, %s4891_s24 }
  0xff   : > { %705 = vrot.lane.b32.xlu0 %v4999_v7, %s4890_s23  ;;  %714 = vrot.lane.b32.xlu1 %v4999_v7, %s4892_s25 }
 0x103   : > { %671 = vrot.lane.b32.xlu1 %v5003_v9, %s4889_s22  ;;  %662 = vrot.lane.b32.xlu0 %v5003_v9, %s4887_s20  ;;  %s4898_s20 = smov 48   ;;  %s4900_s22 = smov 8  }
 0x107   : > { %680 = vrot.lane.b32.xlu0 %v5003_v9, %s4886_s19  ;;  %689 = vrot.lane.b32.xlu1 %v5003_v9, %s4888_s21  ;;  %s4897_s19 = smov 16   ;;  %s4899_s21 = smov 40  }
 0x10b   : > { %698 = vrot.lane.b32.xlu0 %v5003_v9, %s4891_s24  ;;  %707 = vrot.lane.b32.xlu1 %v5003_v9, %s4890_s23  ;;  %s4901_s23 = smov 64  }
 0x10f   : > { %716 = vrot.lane.b32.xlu0 %v5003_v9, %s4892_s25 }
 0x159   : > { %v677_v11 = vpop.permute.xlu1 %676  ;;  %v659_v12 = vpop.permute.xlu0 %658 }
 0x15a   : > { %v737_v26 = vcombine.low %v659_v12, %v677_v11  ;;  %v738_v36 = vcombine.high %v659_v12, %v677_v11 }
 0x15c   : > { %v745_v37 = vrot.slane %v737_v26, %v5023_v25  ;;  %v752_v47 = vrot.slane %v738_v36, %v5023_v25 }
 0x15d   : > { %v686_v16 = vpop.permute.xlu1 %685  ;;  %v668_v17 = vpop.permute.xlu0 %667 }
 0x15e   : > { %v721_v22 = vcombine.low %v4995_v5, %v668_v17  ;;  %v722_v28 = vcombine.high %v4995_v5, %v668_v17 }
 0x160   : > { %v729_v29 = vrot.slane %v721_v22, %v5023_v25  ;;  %v736_v41 = vrot.slane %v722_v28, %v5023_v25 }
 0x161   : > { %v704_v23 = vpop.permute.xlu1 %703  ;;  %v695_v24 = vpop.permute.xlu0 %694 }
 0x162   : > { %v753_v30 = vcombine.low %v686_v16, %v704_v23  ;;  %v754_v31 = vcombine.high %v686_v16, %v704_v23  ;;  %v785_v46 = vcombine.low %v729_v29, %v745_v37  ;;  %v801_v57 = vcombine.low %v736_v41, %v752_v47 }
 0x163   : > { %v786_v58 = vcombine.high %v729_v29, %v745_v37  ;;  %v802_v3 = vcombine.high %v736_v41, %v752_v47 }
 0x164   : > { %v761_v42 = vrot.slane %v753_v30, %v5023_v25  ;;  %v768_v43 = vrot.slane %v754_v31, %v5023_v25  ;;  %v793_v55 = vrot.slane %v785_v46, %v5032_v40  ;;  %v809_v6 = vrot.slane %v801_v57, %v5032_v40 }
 0x165   : > { %v713_v32 = vpop.permute.xlu0 %712  ;;  %v5027_v33 = vpop.permute.xlu1 %660  ;;  %v800_v8 = vrot.slane %v786_v58, %v5032_v40  ;;  %v816_v20 = vrot.slane %v802_v3, %v5032_v40 }
 0x166   : > { %v769_v34 = vcombine.low %v695_v24, %v713_v32  ;;  %v770_v35 = vcombine.high %v695_v24, %v713_v32 }
 0x168   : > { %v777_v38 = vrot.slane %v769_v34, %v5023_v25  ;;  %v784_v39 = vrot.slane %v770_v35, %v5023_v25 }
 0x169   : > { %v670_v44 = vpop.permute.xlu0 %669  ;;  %v679_v45 = vpop.permute.xlu1 %678 }
 0x16a   : > { %v817_v48 = vcombine.low %v761_v42, %v777_v38  ;;  %v833_v49 = vcombine.low %v768_v43, %v784_v39  ;;  %v818_v50 = vcombine.high %v761_v42, %v777_v38  ;;  %v857_v51 = vcombine.low %v4999_v7, %v670_v44 }
 0x16b   : > { %v873_v52 = vcombine.low %v5027_v33, %v679_v45  ;;  %v834_v59 = vcombine.high %v768_v43, %v784_v39  ;;  %v858_v22 = vcombine.high %v4999_v7, %v670_v44  ;;  %v874_v23 = vcombine.high %v5027_v33, %v679_v45 }
 0x16c   : > { %v825_v56 = vrot.slane %v817_v48, %v5032_v40  ;;  %v841_v62 = vrot.slane %v833_v49, %v5032_v40  ;;  %v832_v63 = vrot.slane %v818_v50, %v5032_v40  ;;  %v865_v1 = vrot.slane %v857_v51, %v5023_v25 }
 0x16d   : > { %v688_v53 = vpop.permute.xlu0 %687  ;;  %v697_v54 = vpop.permute.xlu1 %696  ;;  %v881_v2 = vrot.slane %v873_v52, %v5023_v25  ;;  %v848_v12 = vrot.slane %v834_v59, %v5032_v40  ;;  %v872_v7 = vrot.slane %v858_v22, %v5023_v25  ;;  %v888_v33 = vrot.slane %v874_v23, %v5023_v25 }
 0x16e   : > { %v849_v60 = vcombine.low %v793_v55, %v825_v56  ;;  %v850_v61 = vcombine.high %v793_v55, %v825_v56  ;;  %v853_v16 = vcombine.low %v809_v6, %v841_v62  ;;  %v851_v17 = vcombine.low %v800_v8, %v832_v63 }
 0x16f   : > { %v921_v21 = vcombine.low %v865_v1, %v881_v2  ;;  %v855_v27 = vcombine.low %v816_v20, %v848_v12  ;;  %v852_v31 = vcombine.high %v800_v8, %v832_v63  ;;  %v922_v38 = vcombine.high %v865_v1, %v881_v2 }
 0x170   : > { %1043 = vxpose.xlu1.b32.start.end [1/1] (short) (narrow) %v849_v60, 8  ;;  %1075 = vxpose.xlu0.b32.start.end [1/1] (short) (narrow) %v850_v61, 8  ;;  %v854_v41 = vcombine.high %v809_v6, %v841_v62  ;;  %v937_v48 = vcombine.low %v872_v7, %v888_v33  ;;  %v856_v52 = vcombine.high %v816_v20, %v848_v12 }
 0x171   : > { %v706_v4 = vpop.permute.xlu0 %705  ;;  %v715_v5 = vpop.permute.xlu1 %714  ;;  %v929_v34 = vrot.slane %v921_v21, %v5032_v40  ;;  %v936_v46 = vrot.slane %v922_v38, %v5032_v40  ;;  %v938_v58 = vcombine.high %v872_v7, %v888_v33 }
 0x172   : > { %v889_v10 = vcombine.low %v688_v53, %v706_v4  ;;  %v905_v11 = vcombine.low %v697_v54, %v715_v5  ;;  %v890_v14 = vcombine.high %v688_v53, %v706_v4  ;;  %v906_v15 = vcombine.high %v697_v54, %v715_v5 }
 0x173   : > { %v945_v57 = vrot.slane %v937_v48, %v5032_v40  ;;  %v952_v3 = vrot.slane %v938_v58, %v5032_v40 }
 0x174   : > { %v897_v18 = vrot.slane %v889_v10, %v5023_v25  ;;  %v913_v19 = vrot.slane %v905_v11, %v5023_v25  ;;  %1171 = vxpose.xlu1.b32.start.end [1/1] (short) (narrow) %v853_v16, 8  ;;  %1107 = vxpose.xlu0.b32.start.end [1/1] (short) (narrow) %v851_v17, 8  ;;  %v904_v29 = vrot.slane %v890_v14, %v5023_v25 }
 0x175   : > { %v672_v24 = vpop.permute.xlu1 %671  ;;  %v663_v26 = vpop.permute.xlu0 %662  ;;  %v920_v30 = vrot.slane %v906_v15, %v5023_v25 }
 0x176   : > { %v953_v28 = vcombine.low %v897_v18, %v913_v19  ;;  %v954_v32 = vcombine.high %v897_v18, %v913_v19  ;;  %v993_v49 = vcombine.low %v5003_v9, %v672_v24 }
 0x177   : > { %v969_v43 = vcombine.low %v904_v29, %v920_v30  ;;  %v970_v54 = vcombine.high %v904_v29, %v920_v30 }
 0x178   : > { %v961_v35 = vrot.slane %v953_v28, %v5032_v40  ;;  %1235 = vxpose.xlu1.b32.start.end [1/1] (short) (narrow) %v855_v27, 8  ;;  %1139 = vxpose.xlu0.b32.start.end [1/1] (short) (narrow) %v852_v31, 8  ;;  %v968_v42 = vrot.slane %v954_v32, %v5032_v40  ;;  %v1000_v59 = vrot.slane %v993_v49, %v5023_v25 }
 0x179   : > { %v681_v36 = vpop.permute.xlu0 %680  ;;  %v690_v37 = vpop.permute.xlu1 %689  ;;  %v977_v53 = vrot.slane %v969_v43, %v5032_v40  ;;  %v984_v63 = vrot.slane %v970_v54, %v5032_v40 }
 0x17a   : > { %v985_v39 = vcombine.low %v929_v34, %v961_v35  ;;  %v1001_v44 = vcombine.low %v663_v26, %v681_v36  ;;  %v987_v51 = vcombine.low %v936_v46, %v968_v42  ;;  %v986_v62 = vcombine.high %v929_v34, %v961_v35 }
 0x17b   : > { %v989_v9 = vcombine.low %v945_v57, %v977_v53  ;;  %v991_v5 = vcombine.low %v952_v3, %v984_v63  ;;  %v988_v6 = vcombine.high %v936_v46, %v968_v42  ;;  %v990_v12 = vcombine.high %v945_v57, %v977_v53 }
 0x17c   : > { %1299 = vxpose.xlu1.b32.start.end [1/1] (short) (narrow) %v985_v39, 8  ;;  %1203 = vxpose.xlu0.b32.start.end [1/1] (short) (narrow) %v854_v41, 8  ;;  %v1008_v55 = vrot.slane %v1001_v44, %v5023_v25  ;;  %v992_v13 = vcombine.high %v952_v3, %v984_v63 }
 0x17d   : > { %v699_v45 = vpop.permute.xlu0 %698  ;;  %v708_v47 = vpop.permute.xlu1 %707 }
 0x17e   : > { %v1009_v50 = vcombine.low %v690_v37, %v708_v47  ;;  %v1025_v2 = vcombine.low %v1000_v59, %v1008_v55 }
 0x180   : > { %1363 = vxpose.xlu1.b32.start.end [1/1] (short) (narrow) %v987_v51, 8  ;;  %1267 = vxpose.xlu0.b32.start.end [1/1] (short) (narrow) %v856_v52, 8  ;;  %v1016_v60 = vrot.slane %v1009_v50, %v5023_v25  ;;  %v1032_v8 = vrot.slane %v1025_v2, %v5032_v40 }
 0x181   : > { %v717_v56 = vpop.permute.xlu0 %716 }
 0x182   : > { %v1017_v61 = vcombine.low %v699_v45, %v717_v56 }
 0x184   : > { %v1024_v1 = vrot.slane %v1017_v61, %v5023_v25  ;;  %1427 = vxpose.xlu1.b32.start.end [1/1] (short) (narrow) %v989_v9, 8  ;;  %1331 = vxpose.xlu0.b32.start.end [1/1] (short) (narrow) %v986_v62, 8 }
 0x186   : > { %v1033_v4 = vcombine.low %v1016_v60, %v1024_v1 }
 0x188   : > { %v1040_v10 = vrot.slane %v1033_v4, %v5032_v40  ;;  %1491 = vxpose.xlu1.b32.start.end [1/1] (short) (narrow) %v991_v5, 8  ;;  %1395 = vxpose.xlu0.b32.start.end [1/1] (short) (narrow) %v988_v6, 8 }
 0x18a   : > { %v1041_v11 = vcombine.low %v1032_v8, %v1040_v10  ;;  %v1042_v25 = vcombine.high %v1032_v8, %v1040_v10 }
 0x18c   : > { %1459 = vxpose.xlu0.b32.start.end [1/1] (short) (narrow) %v990_v12, 8  ;;  %1555 = vxpose.xlu1.b32.start.end [1/1] (short) (narrow) %v1041_v11, 8 }
 0x190   : > { %1523 = vxpose.xlu0.b32.start.end [1/1] (short) (narrow) %v992_v13, 8 }
 0x194   : > { %1587 = vxpose.xlu0.b32.start.end [1/1] (short) (narrow) %v1042_v25, 8 }
 0x1f0   : > { %v1059_v14 = vpop.trf.xlu1  ;;  %v1091_v15 = vpop.trf.xlu0 }
 0x1f1   : > { %v1638_v16 = vcombine.low %v1059_v14, %v1091_v15 }
 0x1f3   : > { %4533 = vmatmul.mubr.msk.f32.vlgmr.msra.gmra.mrb[0].mxu1 %vm565_vm1, %v1638_v16 }
 0x1f4   : > { %v1123_v17 = vpop.trf.xlu0  ;;  %4535 = vmatprep.mubr.msk.f32.mxu1 %vm4885_vm0, %v4884_v0  ;;  %v1187_v40 = vpop.trf.xlu1 }
 0x1f8   : > { %v1155_v18 = vpop.trf.xlu0  ;;  %v1251_v20 = vpop.trf.xlu1 }
 0x1f9   : > { %v1639_v19 = vcombine.low %v1123_v17, %v1155_v18 }
 0x1fb   : > { %4536 = vmatmul.mubr.msk.f32.gmra.mrb[2].mxu1 %vm565_vm1, %v1639_v19 }
 0x1fc   : > { %v1219_v21 = vpop.trf.xlu0  ;;  %4538 = vmatprep.mubr.msk.f32.mxu1 %vm4885_vm0, %v4884_v0  ;;  %v1315_v23 = vpop.trf.xlu1 }
 0x1fd   : > { %v1640_v22 = vcombine.low %v1187_v40, %v1219_v21 }
 0x1ff   : > { %4539 = vmatmul.mubr.msk.f32.gmra.mrb[4].mxu1 %vm565_vm1, %v1640_v22 }
 0x200   : > { %v1283_v24 = vpop.trf.xlu0  ;;  %4541 = vmatprep.mubr.msk.f32.mxu1 %vm4885_vm0, %v4884_v0  ;;  %v1379_v27 = vpop.trf.xlu1 }
 0x201   : > { %v1641_v26 = vcombine.low %v1251_v20, %v1283_v24 }
 0x203   : > { %4542 = vmatmul.mubr.msk.f32.gmra.mrb[6].mxu1 %vm565_vm1, %v1641_v26 }
 0x204   : > { %v1347_v28 = vpop.trf.xlu0  ;;  %4544 = vmatprep.mubr.msk.f32.mxu1 %vm4885_vm0, %v4884_v0  ;;  %v1443_v31 = vpop.trf.xlu1 }
 0x205   : > { %v1642_v29 = vcombine.low %v1315_v23, %v1347_v28 }
 0x207   : > { %4545 = vmatmul.mubr.msk.f32.gmra.mrb[8].mxu1 %vm565_vm1, %v1642_v29 }
 0x208   : > { %v1411_v30 = vpop.trf.xlu0  ;;  %4547 = vmatprep.mubr.msk.f32.mxu1 %vm4885_vm0, %v4884_v0  ;;  %v1507_v7 = vpop.trf.xlu1 }
 0x209   : > { %v1643_v32 = vcombine.low %v1379_v27, %v1411_v30 }
 0x20b   : > { %4548 = vmatmul.mubr.msk.f32.gmra.mrb[10].mxu1 %vm565_vm1, %v1643_v32 }
 0x20c   : > { %v1475_v34 = vpop.trf.xlu0  ;;  %4550 = vmatprep.mubr.msk.f32.mxu1 %vm4885_vm0, %v4884_v0  ;;  %v1571_v37 = vpop.trf.xlu1 }
 0x20d   : > { %v1644_v35 = vcombine.low %v1443_v31, %v1475_v34 }
 0x20f   : > { %4551 = vmatmul.mubr.msk.f32.gmra.mrb[12].mxu1 %vm565_vm1, %v1644_v35 }
 0x210   : > { %v1539_v33 = vpop.trf.xlu0  ;;  %4553 = vmatprep.mubr.msk.f32.mxu1 %vm4885_vm0, %v4884_v0 }
 0x211   : > { %v1645_v36 = vcombine.low %v1507_v7, %v1539_v33 }
 0x213   : > { %4554 = vmatmul.mubr.msk.f32.gmra.mrb[14].mxu1 %vm565_vm1, %v1645_v36 }
 0x214   : > { %v1603_v38 = vpop.trf.xlu0  ;;  %4556 = vmatprep.mubr.msk.f32.mxu1 %vm4885_vm0, %v4884_v0  ;;  %vm4169_vm0 = vcmask 25600  }
 0x215   : > { %v1646_v39 = vcombine.low %v1571_v37, %v1603_v38 }
 0x217   : > { %4557 = vmatmul.mubr.msk.f32.gmra.mrb[16].mxu1 %vm565_vm1, %v1646_v39 }
 0x2c6   : > { %v1731_v41 = vpop.f32.mrb[0].mxu1 }
 0x2c7   : > { %v1784_v42 = vcombine.high %v1731_v41, %v1731_v41  ;;  %v4534_v43 = vpop.f32.mrb[1].mxu1 }
 0x2c9   : > { %v4657_v44 = vpack.i.bf16 %v1784_v42, %v1731_v41 }
 0x2cb   : > { %4658 = vxpose.xlu1.b32.start.end [1/1] (short) (narrow) %v4657_v44, 16 }
 0x2ce   : > { %v1736_v45 = vpop.f32.mrb[2].mxu1 }
 0x2cf   : > { %v1785_v46 = vcombine.high %v1736_v45, %v1736_v45  ;;  %v4537_v47 = vpop.f32.mrb[3].mxu1 }
 0x2d1   : > { %v4669_v48 = vpack.i.bf16 %v1785_v46, %v1736_v45 }
 0x2d2   : > { %v1741_v49 = vpop.f32.mrb[4].mxu1 }
 0x2d3   : > { %4670 = vxpose.xlu0.b32.start.end [1/1] (short) (narrow) %v4669_v48, 16  ;;  %v1786_v50 = vcombine.high %v1741_v49, %v1741_v49  ;;  %v4540_v51 = vpop.f32.mrb[5].mxu1 }
 0x2d5   : > { %v4681_v52 = vpack.i.bf16 %v1786_v50, %v1741_v49 }
 0x2d6   : > { %v1746_v53 = vpop.f32.mrb[6].mxu1 }
 0x2d7   : > { %4682 = vxpose.xlu1.b32.start.end [1/1] (short) (narrow) %v4681_v52, 16  ;;  %v1787_v0 = vcombine.high %v1746_v53, %v1746_v53  ;;  %v4543_v54 = vpop.f32.mrb[7].mxu1 }
 0x2d9   : > { %v4693_v55 = vpack.i.bf16 %v1787_v0, %v1746_v53 }
 0x2da   : > { %v1751_v56 = vpop.f32.mrb[8].mxu1 }
 0x2db   : > { %4694 = vxpose.xlu0.b32.start.end [1/1] (short) (narrow) %v4693_v55, 16  ;;  %v1788_v57 = vcombine.high %v1751_v56, %v1751_v56  ;;  %v4546_v58 = vpop.f32.mrb[9].mxu1 }
 0x2dd   : > { %v4705_v59 = vpack.i.bf16 %v1788_v57, %v1751_v56 }
 0x2de   : > { %v1756_v60 = vpop.f32.mrb[10].mxu1 }
 0x2df   : > { %4706 = vxpose.xlu1.b32.start.end [1/1] (short) (narrow) %v4705_v59, 16  ;;  %v1789_v61 = vcombine.high %v1756_v60, %v1756_v60  ;;  %v4549_v9 = vpop.f32.mrb[11].mxu1 }
 0x2e1   : > { %v4717_v62 = vpack.i.bf16 %v1789_v61, %v1756_v60 }
 0x2e2   : > { %v1761_v63 = vpop.f32.mrb[12].mxu1 }
 0x2e3   : > { %v1790_v1 = vcombine.high %v1761_v63, %v1761_v63  ;;  %4718 = vxpose.xlu0.b32.start.end [1/1] (short) (narrow) %v4717_v62, 16  ;;  %v4552_v2 = vpop.f32.mrb[13].mxu1 }
 0x2e5   : > { %v4729_v3 = vpack.i.bf16 %v1790_v1, %v1761_v63 }
 0x2e6   : > { %v1766_v4 = vpop.f32.mrb[14].mxu1 }
 0x2e7   : > { %v1791_v5 = vcombine.high %v1766_v4, %v1766_v4  ;;  %4730 = vxpose.xlu1.b32.start.end [1/1] (short) (narrow) %v4729_v3, 16  ;;  %v4555_v6 = vpop.f32.mrb[15].mxu1 }
 0x2e9   : > { %v4741_v8 = vpack.i.bf16 %v1791_v5, %v1766_v4 }
 0x2ea   : > { %v1771_v10 = vpop.f32.mrb[16].mxu1 }
 0x2eb   : > { %4742 = vxpose.xlu0.b32.start.end [1/1] (short) (narrow) %v4741_v8, 16  ;;  %v1792_v11 = vcombine.high %v1771_v10, %v1771_v10  ;;  %v4558_v12 = vpop.f32.mrb[17].mxu1 }
 0x2ed   : > { %v4753_v13 = vpack.i.bf16 %v1792_v11, %v1771_v10 }
 0x2ef   : > { %4754 = vxpose.xlu1.b32.start.end [1/1] (short) (narrow) %v4753_v13, 16 }
 0x34b   : > { %v4659_v25 = vpop.trf.xlu1 }
 0x34c   : > { %v4663_v15 = vunpack.i.h.bf16 %v4659_v25  ;;  %v4660_v16 = vunpack.i.l.bf16 %v4659_v25 }
 0x34f   : > { %v4664_v14 = vpop.trf.xlu1 }
 0x350   : > { %v4668_v17 = vunpack.i.h.bf16 %v4664_v14  ;;  %v4665_v40 = vunpack.i.l.bf16 %v4664_v14 }
 0x352   : > { %v4770_v18 = vpack.i.bf16 %v4668_v17, %v4663_v15  ;;  %v4765_v19 = vpack.i.bf16 %v4665_v40, %v4660_v16 }
 0x353   : > { %v4671_v20 = vpop.trf.xlu0 }
 0x354   : > { %4771 = vrot.lane.b32.xlu0 %v4770_v18, %s4895_s10  ;;  %4766 = vrot.lane.b32.xlu1 %v4765_v19, %s4895_s10  ;;  %v4675_v22 = vunpack.i.h.bf16 %v4671_v20  ;;  %v4672_v23 = vunpack.i.l.bf16 %v4671_v20  ;;  %v511_v20 = vld [vmem:[%s455_s14] sm:$0xff] }
 0x357   : > { %v4676_v21 = vpop.trf.xlu0  ;;  %v4683_v24 = vpop.trf.xlu1 }
 0x358   : > { %v4680_v26 = vunpack.i.h.bf16 %v4676_v21  ;;  %v4677_v27 = vunpack.i.l.bf16 %v4676_v21  ;;  %v4684_v30 = vunpack.i.l.bf16 %v4683_v24  ;;  %v4687_v31 = vunpack.i.h.bf16 %v4683_v24  ;;  %v512_v21 = vld [vmem:[%s455_s14 + $0x8] sm:$0xff] }
 0x35a   : > { %v4780_v28 = vpack.i.bf16 %v4680_v26, %v4675_v22  ;;  %v4775_v29 = vpack.i.bf16 %v4677_v27, %v4672_v23  ;;  %v554_v22 = vmul.f32 0.0, %v511_v20  ;;  %v555_v23 = vmul.f32 0.0, %v512_v21  ;;  %v513_v27 = vld [vmem:[%s5130_s17] sm:$0xff] }
 0x35b   : > { %v4688_v32 = vpop.trf.xlu1  ;;  %v4695_v34 = vpop.trf.xlu0 }
 0x35c   : > { %4781 = vrot.lane.b32.xlu0 %v4780_v28, %s4895_s10  ;;  %4776 = vrot.lane.b32.xlu1 %v4775_v29, %s4895_s10  ;;  %v4689_v35 = vunpack.i.l.bf16 %v4688_v32  ;;  %v4692_v7 = vunpack.i.h.bf16 %v4688_v32  ;;  %v4696_v37 = vunpack.i.l.bf16 %v4695_v34  ;;  %v4699_v39 = vunpack.i.h.bf16 %v4695_v34  ;;  %v514_v28 = vld [vmem:[%s5130_s17 + $0x8] sm:$0xff] }
 0x35e   : > { %v4785_v33 = vpack.i.bf16 %v4689_v35, %v4684_v30  ;;  %v4790_v36 = vpack.i.bf16 %v4692_v7, %v4687_v31 }
 0x35f   : > { %v4700_v38 = vpop.trf.xlu0  ;;  %v4707_v41 = vpop.trf.xlu1 }
 0x360   : > { %4786 = vrot.lane.b32.xlu0 %v4785_v33, %s4895_s10  ;;  %4791 = vrot.lane.b32.xlu1 %v4790_v36, %s4895_s10  ;;  %v4701_v42 = vunpack.i.l.bf16 %v4700_v38  ;;  %v4704_v43 = vunpack.i.h.bf16 %v4700_v38  ;;  %v4708_v47 = vunpack.i.l.bf16 %v4707_v41  ;;  %v4711_v52 = vunpack.i.h.bf16 %v4707_v41 }
 0x362   : > { %v4795_v44 = vpack.i.bf16 %v4701_v42, %v4696_v37  ;;  %v4800_v45 = vpack.i.bf16 %v4704_v43, %v4699_v39 }
 0x363   : > { %v4712_v46 = vpop.trf.xlu1  ;;  %v4719_v48 = vpop.trf.xlu0 }
 0x364   : > { %4796 = vrot.lane.b32.xlu0 %v4795_v44, %s4895_s10  ;;  %v4713_v49 = vunpack.i.l.bf16 %v4712_v46  ;;  %v4716_v51 = vunpack.i.h.bf16 %v4712_v46  ;;  %v4720_v56 = vunpack.i.l.bf16 %v4719_v48  ;;  %v4723_v61 = vunpack.i.h.bf16 %v4719_v48 }
 0x366   : > { %v4805_v50 = vpack.i.bf16 %v4713_v49, %v4708_v47  ;;  %v4810_v54 = vpack.i.bf16 %v4716_v51, %v4711_v52  ;;  %v517_v47 = vld [vmem:[%s5130_s17 + $0x20] sm:$0xff]  ;;  %v518_v51 = vld [vmem:[%s5130_s17 + $0x28] sm:$0xff] }
 0x367   : > { %v4724_v53 = vpop.trf.xlu0  ;;  %v4731_v0 = vpop.trf.xlu1 }
 0x368   : > { %4801 = vrot.lane.b32.xlu0 %v4800_v45, %s4895_s10  ;;  %v4725_v55 = vunpack.i.l.bf16 %v4724_v53  ;;  %v4728_v60 = vunpack.i.h.bf16 %v4724_v53  ;;  %v4732_v2 = vunpack.i.l.bf16 %v4731_v0  ;;  %v4735_v11 = vunpack.i.h.bf16 %v4731_v0  ;;  %v515_v53 = vld [vmem:[%s5130_s17 + $0x10] sm:$0xff]  ;;  %v516_v0 = vld [vmem:[%s5130_s17 + $0x18] sm:$0xff] }
 0x36a   : > { %v4815_v59 = vpack.i.bf16 %v4725_v55, %v4720_v56  ;;  %v4820_v5 = vpack.i.bf16 %v4728_v60, %v4723_v61 }
 0x36b   : > { %v4736_v57 = vpop.trf.xlu1  ;;  %v4743_v58 = vpop.trf.xlu0 }
 0x36c   : > { %4806 = vrot.lane.b32.xlu0 %v4805_v50, %s4895_s10  ;;  %v4744_v63 = vunpack.i.l.bf16 %v4743_v58  ;;  %v4737_v6 = vunpack.i.l.bf16 %v4736_v57  ;;  %v4740_v10 = vunpack.i.h.bf16 %v4736_v57  ;;  %v4747_v25 = vunpack.i.h.bf16 %v4743_v58 }
 0x36e   : > { %v4825_v8 = vpack.i.bf16 %v4737_v6, %v4732_v2  ;;  %v4830_v12 = vpack.i.bf16 %v4740_v10, %v4735_v11  ;;  %v520_v10 = vld [vmem:[%s5130_s17 + $0x38] sm:$0xff] }
 0x36f   : > { %v4755_v9 = vpop.trf.xlu1  ;;  %v4748_v62 = vpop.trf.xlu0 }
 0x370   : > { %4811 = vrot.lane.b32.xlu0 %v4810_v54, %s4895_s10  ;;  %v4749_v1 = vunpack.i.l.bf16 %v4748_v62  ;;  %v4752_v13 = vunpack.i.h.bf16 %v4748_v62  ;;  %v4756_v16 = vunpack.i.l.bf16 %v4755_v9  ;;  %v4759_v18 = vunpack.i.h.bf16 %v4755_v9 }
 0x372   : > { %v4835_v4 = vpack.i.bf16 %v4749_v1, %v4744_v63  ;;  %v4840_v14 = vpack.i.bf16 %v4752_v13, %v4747_v25 }
 0x373   : > { %v4760_v3 = vpop.trf.xlu1 }
 0x374   : > { %4816 = vrot.lane.b32.xlu0 %v4815_v59, %s4895_s10  ;;  %4836 = vrot.lane.b32.xlu1 %v4835_v4, %s4895_s10  ;;  %v4761_v15 = vunpack.i.l.bf16 %v4760_v3  ;;  %v4764_v40 = vunpack.i.h.bf16 %v4760_v3 }
 0x376   : > { %v4845_v17 = vpack.i.bf16 %v4761_v15, %v4756_v16  ;;  %v4850_v19 = vpack.i.bf16 %v4764_v40, %v4759_v18 }
 0x378   : > { %4821 = vrot.lane.b32.xlu0 %v4820_v5, %s4895_s10 }
 0x37c   : > { %4826 = vrot.lane.b32.xlu0 %v4825_v8, %s4895_s10  ;;  %v519_v8 = vld [vmem:[%s5130_s17 + $0x30] sm:$0xff] }
 0x380   : > { %4831 = vrot.lane.b32.xlu0 %v4830_v12, %s4895_s10 }
 0x384   : > { %4841 = vrot.lane.b32.xlu0 %v4840_v14, %s4895_s10 }
 0x388   : > { %4846 = vrot.lane.b32.xlu0 %v4845_v17, %s4895_s10 }
 0x38c   : > { %4851 = vrot.lane.b32.xlu0 %v4850_v19, %s4895_s10 }
 0x3c6   : > { %v4767_v24 = vpop.permute.xlu1 %4766  ;;  %v4772_v26 = vpop.permute.xlu0 %4771 }
 0x3c7   : > { %v4769_v29 = vunpack.i.h.bf16 %v4767_v24  ;;  %v4768_v30 = vunpack.i.l.bf16 %v4767_v24  ;;  %v4774_v31 = vunpack.i.h.bf16 %v4772_v26  ;;  %v4773_v32 = vunpack.i.l.bf16 %v4772_v26 }
 0x3c9   : > { %v2523_v34 = vsel %vm2522_vm2, %v554_v22, %v4768_v30  ;;  %v2524_v35 = vsel %vm2522_vm2, %v555_v23, %v4769_v29  ;;  %v2525_v7 = vsel %vm2522_vm2, %v513_v27, %v4773_v32  ;;  %v2526_v33 = vsel %vm2522_vm2, %v514_v28, %v4774_v31 }
 0x3ca   : > { %v2596_v36 = vrot.slane %v2523_v34, 7  ;;  %v2597_v37 = vrot.slane %v2524_v35, 7  ;;  %v2599_v38 = vrot.slane %v2525_v7, 7  ;;  %v2600_v39 = vrot.slane %v2526_v33, 7 }
 0x3cc   : > { %v2598_v41 = vsel %vm2595_vm3, %v2596_v36, %v2597_v37  ;;  %v2704_v42 = vsel %vm2595_vm3, 0.0, %v2596_v36  ;;  %v2601_v43 = vsel %vm2595_vm3, %v2599_v38, %v2600_v39  ;;  %v2705_v44 = vsel %vm2595_vm3, 0.0, %v2599_v38  ;;  %v521_v36 = vld [vmem:[%s5130_s17 + $0x40] sm:$0xff] }
 0x3cd   : > { %v5142_v45 = vpack.c.bf16 %v2598_v41, %v2704_v42  ;;  %v5144_v46 = vpack.c.bf16 %v2601_v43, %v2705_v44  ;;  %v2722_v48 = vsel %vm2595_vm3, %v2597_v37, 0.0  ;;  %v2723_v49 = vsel %vm2595_vm3, %v2600_v39, 0.0  ;;  %v522_v37 = vld [vmem:[%s5130_s17 + $0x48] sm:$0xff] }
 0x3ce   : > { %v4782_v50 = vpop.permute.xlu0 %4781  ;;  %v4777_v52 = vpop.permute.xlu1 %4776  ;;  %v5152_v54 = vpack.c.bf16 %v2722_v48, %v2722_v48  ;;  %v5158_v61 = vpack.c.bf16 %v2723_v49, %v2723_v49 }
 0x3cf   : > { %v4784_v55 = vunpack.i.h.bf16 %v4782_v50  ;;  %v4783_v56 = vunpack.i.l.bf16 %v4782_v50  ;;  %v4779_v57 = vunpack.i.h.bf16 %v4777_v52  ;;  %v4778_v58 = vunpack.i.l.bf16 %v4777_v52  ;;  %3148 = vrot.lane.b32.xlu0 %v5144_v46, %s4896_s18 }
 0x3d0   : > { %v3002_v59 = vrot.slane %v5142_v45, 1  ;;  %v3003_v60 = vrot.slane %v5152_v54, 1  ;;  %v3005_v19 = vrot.slane %v5144_v46, 1  ;;  %v3006_v20 = vrot.slane %v5158_v61, 1 }
 0x3d1   : > { %v2529_v9 = vsel %vm2522_vm2, %v517_v47, %v4783_v56  ;;  %v2530_v62 = vsel %vm2522_vm2, %v518_v51, %v4784_v55  ;;  %v2527_v63 = vsel %vm2522_vm2, %v515_v53, %v4778_v58  ;;  %v2528_v1 = vsel %vm2522_vm2, %v516_v0, %v4779_v57 }
 0x3d2   : > { %v2605_v2 = vrot.slane %v2529_v9, 7  ;;  %v2606_v3 = vrot.slane %v2530_v62, 7  ;;  %v2602_v4 = vrot.slane %v2527_v63, 7  ;;  %v2603_v5 = vrot.slane %v2528_v1, 7  ;;  %v4787_v6 = vpop.permute.xlu0 %4786  ;;  %v4792_v21 = vpop.permute.xlu1 %4791 }
 0x3d3   : > { %v3004_v11 = vsel %vm3001_vm4, %v3002_v59, %v3003_v60  ;;  %v4789_v12 = vunpack.i.h.bf16 %v4787_v6  ;;  %v4788_v13 = vunpack.i.l.bf16 %v4787_v6  ;;  %v3007_v28 = vsel %vm3001_vm4, %v3005_v19, %v3006_v20 }
 0x3d4   : > { %v2604_v25 = vsel %vm2595_vm3, %v2602_v4, %v2603_v5  ;;  %v2706_v14 = vsel %vm2595_vm3, 0.0, %v2602_v4  ;;  %3116 = vrot.lane.b32.xlu0 %v3004_v11, %s4897_s19  ;;  %v2607_v40 = vsel %vm2595_vm3, %v2605_v2, %v2606_v3  ;;  %v2707_v18 = vsel %vm2595_vm3, 0.0, %v2605_v2  ;;  %v523_v4 = vld [vmem:[%s5130_s17 + $0x50] sm:$0xff] }
 0x3d5   : > { %v5170_v15 = vpack.c.bf16 %v2604_v25, %v2706_v14  ;;  %v2531_v16 = vsel %vm2522_vm2, %v519_v8, %v4788_v13  ;;  %v5174_v17 = vsel %vm2522_vm2, %v520_v10, %v4789_v12  ;;  %v2724_v22 = vsel %vm2595_vm3, %v2603_v5, 0.0  ;;  %v524_v5 = vld [vmem:[%s5130_s17 + $0x58] sm:$0xff]  ;;  %v4855_v13 = vld [vmem:[%s6321_s6] sm:$0xff]  }
 0x3d6   : > { %v2608_v23 = vrot.slane %v2531_v16, 7  ;;  %v2609_v24 = vrot.slane %v5174_v17, 7  ;;  %v5186_v26 = vpack.c.bf16 %v2607_v40, %v2707_v18  ;;  %v2745_v27 = vpack.c.bf16 %v2724_v22, %v2724_v22  ;;  %v4797_v59 = vpop.permute.xlu0 %4796  ;;  %4559 = vmatprep.subr.bf16.mxu0 %v4855_v13  ;;  %v4856_v18 = vld [vmem:[%s6321_s6 + $0x8] sm:$0xff]   ;;  %4601 = vmatprep.subr.bf16.mxu1 %v4855_v13 }
 0x3d7   : > { %3150 = vrot.lane.b32.xlu1 %v5170_v15, %s4896_s18  ;;  %v4794_v29 = vunpack.i.h.bf16 %v4792_v21  ;;  %v3008_v30 = vrot.slane %v5170_v15, 1  ;;  %v4793_v31 = vunpack.i.l.bf16 %v4792_v21  ;;  %v2725_v34 = vsel %vm2595_vm3, %v2606_v3, 0.0  ;;  %4560 = vmatpush3.bf16.msra.mxu0 %v4855_v13 }
 0x3d8   : > { %3244 = vrot.lane.b32.xlu0 %v5170_v15, %s4898_s20  ;;  %v3009_v32 = vrot.slane %v2745_v27, 1  ;;  %v2780_v35 = vshll.u32 %v5142_v45, 16  ;;  %v2610_v7 = vsel %vm2595_vm3, %v2608_v23, %v2609_v24  ;;  %v2708_v33 = vsel %vm2595_vm3, 0.0, %v2608_v23  ;;  %4561 = vmatprep.subr.bf16.mxu0 %v4856_v18 }
 0x3d9   : > { %v5200_v39 = vpack.c.bf16 %v2725_v34, %v2725_v34  ;;  %v5202_v41 = vpack.c.bf16 %v2610_v7, %v2708_v33  ;;  %v2533_v42 = vsel %vm2522_vm2, %v521_v36, %v4793_v31  ;;  %v5206_v43 = vsel %vm2522_vm2, %v522_v37, %v4794_v29  ;;  %4606 = vmatpush3.bf16.msra.mxu1 %v4855_v13  ;;  %v4858_v36 = vld [vmem:[%s6321_s6 + $0x18] sm:$0xff]  }
 0x3da   : > { %v3010_v38 = vsel %vm3001_vm4, %v3008_v30, %v3009_v32  ;;  %v2782_v44 = vrot.slane %v2780_v35, 1  ;;  %v3011_v47 = vrot.slane %v5186_v26, 1  ;;  %v2778_v48 = vshrl.u32 %v5142_v45, 16  ;;  %4602 = vmatprep.subr.bf16.mxu1 %v4856_v18  ;;  %v4802_v34 = vpop.permute.xlu0 %4801 }
 0x3db   : > { %3246 = vrot.lane.b32.xlu1 %v5186_v26, %s4898_s20  ;;  %v2785_v49 = vshll.u32 %v5152_v54, 16  ;;  %v2611_v50 = vrot.slane %v2533_v42, 7  ;;  %v2612_v51 = vrot.slane %v5206_v43, 7  ;;  %v3012_v52 = vrot.slane %v5200_v39, 1  ;;  %4562 = vmatpush3.bf16.msra.mxu0 %v4856_v18 }
 0x3dc   : > { %3118 = vrot.lane.b32.xlu0 %v3007_v28, %s4897_s19  ;;  %v2804_v53 = vshll.u32 %v5170_v15, 16  ;;  %v2783_v0 = vor.u32 %v2782_v44, %v2778_v48  ;;  %v2802_v9 = vshrl.u32 %v5170_v15, 16  ;;  %v2809_v62 = vshll.u32 %v2745_v27, 16  ;;  %v525_v44 = vld [vmem:[%s5130_s17 + $0x60] sm:$0xff] }
 0x3dd   : > { %v2787_v55 = vrot.slane %v2785_v49, 1  ;;  %v2613_v54 = vsel %vm2595_vm3, %v2611_v50, %v2612_v51  ;;  %v2709_v56 = vsel %vm2595_vm3, 0.0, %v2611_v50  ;;  %v5225_v57 = vsel %vm3001_vm4, %v3011_v47, %v3012_v52  ;;  %4607 = vmatpush3.bf16.msra.mxu1 %v4856_v18  ;;  %v526_v47 = vld [vmem:[%s5130_s17 + $0x68] sm:$0xff] }
 0x3de   : > { %v2806_v58 = vrot.slane %v2804_v53, 1  ;;  %v5232_v63 = vpack.c.bf16 %v2613_v54, %v2709_v56  ;;  %v4799_v1 = vunpack.i.h.bf16 %v4797_v59  ;;  %v4798_v2 = vunpack.i.l.bf16 %v4797_v59 }
 0x3df   : > { %3214 = vrot.lane.b32.xlu1 %v3010_v38, %s4899_s21  ;;  %v2788_v60 = vsel %vm2776_vm5, %v2783_v0, %v2787_v55  ;;  %v2726_v6 = vsel %vm2595_vm3, %v2609_v24, 0.0  ;;  %v2792_v8 = vshll.u32 %v5144_v46, 16  ;;  %v2811_v10 = vrot.slane %v2809_v62, 1 }
 0x3e0   : > { %3212 = vrot.lane.b32.xlu0 %v3007_v28, %s4899_s21  ;;  %v2807_v3 = vor.u32 %v2806_v58, %v2802_v9  ;;  %v2535_v11 = vsel %vm2522_vm2, %v523_v4, %v4798_v2  ;;  %v5243_v12 = vsel %vm2522_vm2, %v524_v5, %v4799_v1  ;;  %v5251_v14 = vpack.c.bf16 %v2726_v6, %v2726_v6  ;;  %v4807_v1 = vpop.permute.xlu0 %4806  ;;  %v527_v6 = vld [vmem:[%s5130_s17 + $0x70] sm:$0xff] }
 0x3e1   : > { %v2794_v16 = vrot.slane %v2792_v8, 1  ;;  %v2614_v17 = vrot.slane %v2535_v11, 7  ;;  %v2615_v40 = vrot.slane %v5243_v12, 7  ;;  %v2790_v19 = vshrl.u32 %v5144_v46, 16  ;;  %v528_v8 = vld [vmem:[%s5130_s17 + $0x78] sm:$0xff] }
 0x3e2   : > { %v5249_v25 = vsel %vm2776_vm5, %v2807_v3, %v2811_v10  ;;  %v2797_v20 = vshll.u32 %v5158_v61, 16  ;;  %v3014_v21 = vrot.slane %v5202_v41, 1  ;;  %v3015_v22 = vrot.slane %v5251_v14, 1  ;;  %v4857_v61 = vld [vmem:[%s6321_s6 + $0x10] sm:$0xff]  }
 0x3e3   : > { %3154 = vrot.lane.b32.xlu1 %v5202_v41, %s4896_s18  ;;  %v2816_v23 = vshll.u32 %v5186_v26, 16  ;;  %v2795_v24 = vor.u32 %v2794_v16, %v2790_v19  ;;  %v2616_v27 = vsel %vm2595_vm3, %v2614_v17, %v2615_v40  ;;  %v2710_v28 = vsel %vm2595_vm3, 0.0, %v2614_v17  ;;  %4563 = vmatprep.subr.bf16.mxu0 %v4857_v61  ;;  %v4859_v19 = vld [vmem:[%s6321_s6 + $0x20] ss:$0 sps:$4 sm:$0xff]  }
 0x3e4   : > { %3152 = vrot.lane.b32.xlu0 %v5186_v26, %s4896_s18  ;;  %v2799_v29 = vrot.slane %v2797_v20, 1  ;;  %v5277_v30 = vsel %vm3001_vm4, %v3014_v21, %v3015_v22  ;;  %v5279_v32 = vpack.c.bf16 %v2616_v27, %v2710_v28  ;;  %v2814_v7 = vshrl.u32 %v5186_v26, 16  ;;  %4564 = vmatpush3.bf16.msra.mxu0 %v4857_v61  ;;  %v4812_v22 = vpop.permute.xlu0 %4811 }
 0x3e5   : > { %v2818_v31 = vrot.slane %v2816_v23, 1  ;;  %v2821_v33 = vshll.u32 %v5200_v39, 16  ;;  %4603 = vmatprep.subr.bf16.mxu1 %v4857_v61  ;;  %v4804_v37 = vunpack.i.h.bf16 %v4802_v34  ;;  %4565 = vmatprep.subr.bf16.mxu0 %v4858_v36  ;;  %v2727_v48 = vsel %vm2595_vm3, %v2612_v51, 0.0 }
 0x3e6   : > { %v2800_v35 = vsel %vm2776_vm5, %v2795_v24, %v2799_v29  ;;  %4608 = vmatpush3.bf16.msra.mxu1 %v4857_v61  ;;  %v5305_v53 = vpack.c.bf16 %v2727_v48, %v2727_v48  ;;  %v3017_v0 = vrot.slane %v5232_v63, 1  ;;  %v2828_v54 = vshll.u32 %v5202_v41, 16 }
 0x3e7   : > { %3122 = vrot.lane.b32.xlu1 %v5225_v57, %s4897_s19  ;;  %v2819_v42 = vor.u32 %v2818_v31, %v2814_v7  ;;  %v2823_v39 = vrot.slane %v2821_v33, 1  ;;  %4604 = vmatprep.subr.bf16.mxu1 %v4858_v36  ;;  %v5300_v50 = vsel %vm2522_vm2, %v526_v47, %v4804_v37  ;;  %v2833_v62 = vshll.u32 %v5251_v14, 16  ;;  %v529_v33 = vld [vmem:[%s5130_s17 + $0x80] sm:$0xff] }
 0x3e8   : > { %3084 = vrot.lane.b32.xlu0 %v2788_v60, %s4900_s22  ;;  %4566 = vmatpush3.bf16.msra.mxu0 %v4858_v36  ;;  %v2618_v51 = vrot.slane %v5300_v50, 7  ;;  %v3018_v55 = vrot.slane %v5305_v53, 1  ;;  %v2826_v60 = vshrl.u32 %v5202_v41, 16  ;;  %v2830_v9 = vrot.slane %v2828_v54, 1 }
 0x3e9   : > { %v5303_v52 = vsel %vm2776_vm5, %v2819_v42, %v2823_v39  ;;  %v4809_v2 = vunpack.i.h.bf16 %v4807_v1  ;;  %v4808_v3 = vunpack.i.l.bf16 %v4807_v1  ;;  %v2835_v5 = vrot.slane %v2833_v62, 1  ;;  %4611 = vmatprep.subr.msk.bf16.mxu0 %vm3672_vm6, %v4859_v19 }
 0x3ea   : > { %4609 = vmatpush3.bf16.msra.mxu1 %v4858_v36  ;;  %v5324_v59 = vsel %vm3001_vm4, %v3017_v0, %v3018_v55  ;;  %v2831_v4 = vor.u32 %v2830_v9, %v2826_v60  ;;  %v2728_v10 = vsel %vm2595_vm3, %v2615_v40, 0.0  ;;  %v2840_v18 = vshll.u32 %v5232_v63, 16  ;;  %v530_v36 = vld [vmem:[%s5130_s17 + $0x88] sm:$0xff] }
 0x3eb   : > { %3250 = vrot.lane.b32.xlu1 %v5232_v63, %s4898_s20  ;;  %v2539_v11 = vsel %vm2522_vm2, %v527_v6, %v4808_v3  ;;  %v5345_v13 = vsel %vm2522_vm2, %v528_v8, %v4809_v2  ;;  %v5347_v14 = vpack.c.bf16 %v2728_v10, %v2728_v10  ;;  %v2838_v24 = vshrl.u32 %v5232_v63, 16  ;;  %4612 = vmatprep.subr.msk.bf16.mxu1 %vm3672_vm6, %v4859_v19  ;;  %v531_v2 = vld [vmem:[%s5130_s17 + $0x90] sm:$0xff]  ;;  %v532_v3 = vld [vmem:[%s5130_s17 + $0x98] sm:$0xff] }
 0x3ec   : > { %3308 = vrot.lane.b32.xlu0 %v3010_v38, %s4901_s23  ;;  %v5350_v16 = vsel %vm2776_vm5, %v2831_v4, %v2835_v5  ;;  %v2620_v12 = vrot.slane %v2539_v11, 7  ;;  %v2621_v17 = vrot.slane %v5345_v13, 7  ;;  %v2842_v27 = vrot.slane %v2840_v18, 1 }
 0x3ed   : > { %v3021_v40 = vrot.slane %v5347_v14, 1  ;;  %v2845_v28 = vshll.u32 %v5305_v53, 16  ;;  %v3674_v61 = vsel %vm3672_vm6, %v4859_v19, 0  ;;  %v4814_v31 = vunpack.i.h.bf16 %v4812_v22 }
 0x3ee   : > { %v2622_v20 = vsel %vm2595_vm3, %v2620_v12, %v2621_v17  ;;  %v2712_v21 = vsel %vm2595_vm3, 0.0, %v2620_v12  ;;  %4568 = vmatpush3.bf16.msra.mxu0 %v3674_v61  ;;  %4610 = vmatpush3.bf16.msra.mxu1 %v3674_v61  ;;  %v2729_v37 = vsel %vm2595_vm3, %v2618_v51, 0.0  ;;  %v2852_v53 = vshll.u32 %v5279_v32, 16 }
 0x3ef   : > { %3182 = vrot.lane.b32.xlu1 %v5249_v25, %s4902_s26  ;;  %v5376_v29 = vpack.c.bf16 %v2622_v20, %v2712_v21  ;;  %v2847_v7 = vrot.slane %v2845_v28, 1  ;;  %v5393_v42 = vsel %vm2522_vm2, %v530_v36, %v4814_v31  ;;  %v2755_v47 = vpack.c.bf16 %v2729_v37, %v2729_v37  ;;  %v533_v31 = vld [vmem:[%s5130_s17 + $0xa0] sm:$0xff] }
 0x3f0   : > { %3120 = vrot.lane.b32.xlu0 %v3010_v38, %s4897_s19  ;;  %v4803_v38 = vunpack.i.l.bf16 %v4802_v34  ;;  %v4813_v34 = vunpack.i.l.bf16 %v4812_v22  ;;  %v2850_v54 = vshrl.u32 %v5279_v32, 16  ;;  %v2730_v5 = vsel %vm2595_vm3, %v2621_v17, 0.0 }
 0x3f1   : > { %v2757_v11 = vpack.c.bf16 %v2730_v5, %v2730_v5  ;;  %v2869_v22 = vshll.u32 %v2755_v47, 16  ;;  %v535_v5 = vld [vmem:[%s5130_s17 + $0xb0] sm:$0xff] }
 0x3f2   : > { %v2537_v49 = vsel %vm2522_vm2, %v525_v44, %v4803_v38  ;;  %v2541_v38 = vsel %vm2522_vm2, %v529_v33, %v4813_v34  ;;  %v534_v34 = vld [vmem:[%s5130_s17 + $0xa8] sm:$0xff] }
 0x3f3   : > { %3088 = vrot.lane.b32.xlu1 %v5249_v25, %s4900_s22  ;;  %v2617_v43 = vrot.slane %v2537_v49, 7  ;;  %v2623_v39 = vrot.slane %v2541_v38, 7  ;;  %v2624_v49 = vrot.slane %v5393_v42, 7  ;;  %v3027_v17 = vrot.slane %v2757_v11, 1 }
 0x3f4   : > { %3248 = vrot.lane.b32.xlu0 %v5202_v41, %s4898_s20 }
 0x3f5   : > { %v2619_v56 = vsel %vm2595_vm3, %v2617_v43, %v2618_v51  ;;  %v2711_v58 = vsel %vm2595_vm3, 0.0, %v2617_v43  ;;  %v2625_v43 = vsel %vm2595_vm3, %v2623_v39, %v2624_v49  ;;  %v2713_v51 = vsel %vm2595_vm3, 0.0, %v2623_v39 }
 0x3f7   : > { %3218 = vrot.lane.b32.xlu1 %v5277_v30, %s4899_s21 }
 0x3f8   : > { %3086 = vrot.lane.b32.xlu0 %v2800_v35, %s4900_s22 }
 0x3fb   : > { %3158 = vrot.lane.b32.xlu1 %v5279_v32, %s4896_s18 }
 0x3fc   : > { %3180 = vrot.lane.b32.xlu0 %v2800_v35, %s4902_s26  ;;  %v2843_v35 = vor.u32 %v2842_v27, %v2838_v24 }
 0x3fe   : > { %v5396_v44 = vsel %vm2776_vm5, %v2843_v35, %v2847_v7  ;;  %v2731_v35 = vsel %vm2595_vm3, %v2624_v49, 0.0  ;;  %v2876_v49 = vshll.u32 %v5376_v29, 16 }
 0x3ff   : > { %3278 = vrot.lane.b32.xlu1 %v5303_v52, %s4903_s16  ;;  %v5489_v38 = vpack.c.bf16 %v2731_v35, %v2731_v35 }
 0x400   : > { %3310 = vrot.lane.b32.xlu0 %v5225_v57, %s4901_s23 }
 0x401   : > { %v3030_v39 = vrot.slane %v5489_v38, 1 }
 0x403   : > { %3090 = vrot.lane.b32.xlu1 %v5303_v52, %s4900_s22 }
 0x404   : > { %3216 = vrot.lane.b32.xlu0 %v5225_v57, %s4899_s21  ;;  %v5332_v57 = vpack.c.bf16 %v2619_v56, %v2711_v58  ;;  %v2854_v56 = vrot.slane %v2852_v53, 1  ;;  %v2857_v58 = vshll.u32 %v5347_v14, 16  ;;  %v5509_v53 = vpop.permute.xlu1 %4836 }
 0x406   : > { %v3023_v50 = vrot.slane %v5332_v57, 1  ;;  %v2855_v62 = vor.u32 %v2854_v56, %v2850_v54  ;;  %v2859_v1 = vrot.slane %v2857_v58, 1  ;;  %v2862_v20 = vshrl.u32 %v5332_v57, 16 }
 0x407   : > { %3126 = vrot.lane.b32.xlu1 %v5324_v59, %s4897_s19  ;;  %v2874_v54 = vshrl.u32 %v5376_v29, 16  ;;  %v2878_v56 = vrot.slane %v2876_v49, 1  ;;  %v2881_v58 = vshll.u32 %v2757_v11, 16 }
 0x408   : > { %3156 = vrot.lane.b32.xlu0 %v5232_v63, %s4896_s18  ;;  %v5442_v10 = vsel %vm2776_vm5, %v2855_v62, %v2859_v1 }
 0x40b   : > { %3254 = vrot.lane.b32.xlu1 %v5332_v57, %s4898_s20 }
 0x40c   : > { %3276 = vrot.lane.b32.xlu0 %v5249_v25, %s4903_s16  ;;  %v3020_v25 = vrot.slane %v5279_v32, 1 }
 0x40e   : > { %v5372_v23 = vsel %vm3001_vm4, %v3020_v25, %v3021_v40  ;;  %v2864_v25 = vshll.u32 %v5332_v57, 16 }
 0x40f   : > { %3186 = vrot.lane.b32.xlu1 %v5350_v16, %s4902_s26 }
 0x410   : > { %3312 = vrot.lane.b32.xlu0 %v5277_v30, %s4901_s23  ;;  %v2866_v21 = vrot.slane %v2864_v25, 1 }
 0x412   : > { %v2867_v61 = vor.u32 %v2866_v21, %v2862_v20 }
 0x413   : > { %3092 = vrot.lane.b32.xlu1 %v5350_v16, %s4900_s22 }
 0x414   : > { %3124 = vrot.lane.b32.xlu0 %v5277_v30, %s4897_s19  ;;  %v4817_v30 = vpop.permute.xlu0 %4816 }
 0x415   : > { %v4819_v60 = vunpack.i.h.bf16 %v4817_v30  ;;  %v4818_v9 = vunpack.i.l.bf16 %v4817_v30  ;;  %v2871_v30 = vrot.slane %v2869_v22, 1 }
 0x417   : > { %3222 = vrot.lane.b32.xlu1 %v5372_v23, %s4899_s21  ;;  %v2543_v6 = vsel %vm2522_vm2, %v531_v2, %v4818_v9  ;;  %v5439_v8 = vsel %vm2522_vm2, %v532_v3, %v4819_v60  ;;  %v5487_v37 = vsel %vm2776_vm5, %v2867_v61, %v2871_v30  ;;  %v2879_v2 = vor.u32 %v2878_v56, %v2874_v54  ;;  %v537_v54 = vld [vmem:[%s5130_s17 + $0xc0] sm:$0xff]  ;;  %v538_v56 = vld [vmem:[%s5130_s17 + $0xc8] sm:$0xff] }
 0x418   : > { %3252 = vrot.lane.b32.xlu0 %v5279_v32, %s4898_s20  ;;  %v5398_v48 = vpop.permute.xlu0 %4821  ;;  %v2626_v13 = vrot.slane %v2543_v6, 7  ;;  %v2627_v14 = vrot.slane %v5439_v8, 7  ;;  %v2883_v3 = vrot.slane %v2881_v58, 1  ;;  %v536_v6 = vld [vmem:[%s5130_s17 + $0xb8] sm:$0xff] }
 0x419   : > { %v4824_v27 = vunpack.i.h.bf16 %v5398_v48  ;;  %v4823_v28 = vunpack.i.l.bf16 %v5398_v48 }
 0x41a   : > { %v2628_v40 = vsel %vm2595_vm3, %v2626_v13, %v2627_v14  ;;  %v2714_v18 = vsel %vm2595_vm3, 0.0, %v2626_v13  ;;  %v2732_v8 = vsel %vm2595_vm3, %v2627_v14, 0.0 }
 0x41b   : > { %3162 = vrot.lane.b32.xlu1 %v5376_v29, %s4896_s18  ;;  %v2545_v33 = vsel %vm2522_vm2, %v533_v31, %v4823_v28  ;;  %v5484_v36 = vsel %vm2522_vm2, %v534_v34, %v4824_v27  ;;  %v5547_v25 = vpack.c.bf16 %v2732_v8, %v2732_v8 }
 0x41c   : > { %3184 = vrot.lane.b32.xlu0 %v5303_v52, %s4902_s26  ;;  %v3024_v52 = vrot.slane %v2755_v47, 1  ;;  %v5413_v0 = vpop.permute.xlu0 %4826  ;;  %v2629_v42 = vrot.slane %v2545_v33, 7 }
 0x41d   : > { %v4829_v9 = vunpack.i.h.bf16 %v5413_v0  ;;  %v4828_v62 = vunpack.i.l.bf16 %v5413_v0  ;;  %v3033_v21 = vrot.slane %v5547_v25, 1 }
 0x41e   : > { %v5416_v55 = vsel %vm3001_vm4, %v3023_v50, %v3024_v52  ;;  %v2715_v52 = vsel %vm2595_vm3, 0.0, %v2629_v42 }
 0x41f   : > { %3282 = vrot.lane.b32.xlu1 %v5396_v44, %s4903_s16  ;;  %v2547_v13 = vsel %vm2522_vm2, %v535_v5, %v4828_v62  ;;  %v5540_v0 = vsel %vm2522_vm2, %v536_v6, %v4829_v9 }
 0x420   : > { %3314 = vrot.lane.b32.xlu0 %v5324_v59, %s4901_s23  ;;  %v5428_v4 = vpop.permute.xlu0 %4831  ;;  %v2633_v14 = vrot.slane %v5540_v0, 7 }
 0x423   : > { %3094 = vrot.lane.b32.xlu1 %v5396_v44, %s4900_s22 }
 0x424   : > { %3220 = vrot.lane.b32.xlu0 %v5324_v59, %s4899_s21  ;;  %v5424_v59 = vpack.c.bf16 %v2625_v43, %v2713_v51  ;;  %v5449_v12 = vpop.permute.xlu0 %4841 }
 0x426   : > { %v3029_v48 = vrot.slane %v5424_v59, 1  ;;  %v2888_v22 = vshll.u32 %v5424_v59, 16  ;;  %v2886_v34 = vshrl.u32 %v5424_v59, 16 }
 0x427   : > { %3130 = vrot.lane.b32.xlu1 %v5416_v55, %s4897_s19 }
 0x428   : > { %3160 = vrot.lane.b32.xlu0 %v5332_v57, %s4896_s18  ;;  %v5463_v24 = vpop.permute.xlu0 %4846  ;;  %v5514_v51 = vsel %vm3001_vm4, %v3029_v48, %v3030_v39  ;;  %v2890_v35 = vrot.slane %v2888_v22, 1  ;;  %v4834_v48 = vunpack.i.h.bf16 %v5428_v4  ;;  %v4833_v39 = vunpack.i.l.bf16 %v5428_v4 }
 0x42a   : > { %v2549_v9 = vsel %vm2522_vm2, %v537_v54, %v4833_v39  ;;  %v5601_v4 = vsel %vm2522_vm2, %v538_v56, %v4834_v48  ;;  %v4838_v39 = vunpack.i.l.bf16 %v5509_v53 }
 0x42b   : > { %3258 = vrot.lane.b32.xlu1 %v5424_v59, %s4898_s20 }
 0x42c   : > { %3280 = vrot.lane.b32.xlu0 %v5350_v16, %s4903_s16  ;;  %v3026_v16 = vrot.slane %v5376_v29, 1  ;;  %v5480_v7 = vpop.permute.xlu0 %4851 }
 0x42e   : > { %v5460_v19 = vsel %vm3001_vm4, %v3026_v16, %v3027_v17  ;;  %v5545_v17 = vsel %vm2776_vm5, %v2879_v2, %v2883_v3 }
 0x42f   : > { %3190 = vrot.lane.b32.xlu1 %v5442_v10, %s4902_s26 }
 0x430   : > { %3316 = vrot.lane.b32.xlu0 %v5372_v23, %s4901_s23 }
 0x433   : > { %3096 = vrot.lane.b32.xlu1 %v5442_v10, %s4900_s22 }
 0x434   : > { %3128 = vrot.lane.b32.xlu0 %v5372_v23, %s4897_s19  ;;  %v5469_v23 = vpack.c.bf16 %v2628_v40, %v2714_v18 }
 0x436   : > { %v3032_v20 = vrot.slane %v5469_v23, 1 }
 0x437   : > { %3226 = vrot.lane.b32.xlu1 %v5460_v19, %s4899_s21 }
 0x438   : > { %3256 = vrot.lane.b32.xlu0 %v5376_v29, %s4898_s20  ;;  %v5574_v31 = vsel %vm3001_vm4, %v3032_v20, %v3033_v21 }
 0x43b   : > { %3166 = vrot.lane.b32.xlu1 %v5469_v23, %s4896_s18 }
 0x43c   : > { %3188 = vrot.lane.b32.xlu0 %v5396_v44, %s4902_s26  ;;  %v2630_v44 = vrot.slane %v5484_v36, 7  ;;  %v2635_v36 = vrot.slane %v2549_v9, 7 }
 0x43e   : > { %v2631_v50 = vsel %vm2595_vm3, %v2629_v42, %v2630_v44  ;;  %v2717_v20 = vsel %vm2595_vm3, 0.0, %v2635_v36 }
 0x43f   : > { %3286 = vrot.lane.b32.xlu1 %v5487_v37, %s4903_s16 }
 0x440   : > { %3318 = vrot.lane.b32.xlu0 %v5416_v55, %s4901_s23 }
 0x441   : > { %v5496_v47 = vpop.permute.xlu0 %3148 }
 0x443   : > { %3098 = vrot.lane.b32.xlu1 %v5487_v37, %s4900_s22 }
 0x444   : > { %3224 = vrot.lane.b32.xlu0 %v5416_v55, %s4899_s21  ;;  %v5521_v55 = vpack.c.bf16 %v2631_v50, %v2715_v52  ;;  %v2891_v50 = vor.u32 %v2890_v35, %v2886_v34  ;;  %v2905_v35 = vshll.u32 %v5547_v25, 16  ;;  %v2734_v25 = vsel %vm2595_vm3, %v2633_v14, 0.0 }
 0x445   : > { %v5669_v0 = vpack.c.bf16 %v2734_v25, %v2734_v25  ;;  %v4844_v25 = vunpack.i.h.bf16 %v5449_v12 }
 0x446   : > { %v5511_v43 = vpop.permute.xlu0 %3116  ;;  %v3035_v6 = vrot.slane %v5521_v55, 1  ;;  %v2907_v56 = vrot.slane %v2905_v35, 1 }
 0x447   : > { %3134 = vrot.lane.b32.xlu1 %v5514_v51, %s4897_s19  ;;  %v3039_v35 = vrot.slane %v5669_v0, 1 }
 0x448   : > { %3164 = vrot.lane.b32.xlu0 %v5424_v59, %s4896_s18 }
 0x449   : > { %v5523_v60 = vpop.permute.xlu1 %3150 }
 0x44a   : > { %v5527_v1 = vpop.permute.xlu0 %3244 }
 0x44b   : > { %3262 = vrot.lane.b32.xlu1 %v5521_v55, %s4898_s20 }
 0x44c   : > { %3284 = vrot.lane.b32.xlu0 %v5442_v10, %s4903_s16  ;;  %v2632_v10 = vrot.slane %v2547_v13, 7  ;;  %v2900_v13 = vshll.u32 %v5469_v23, 16 }
 0x44d   : > { %v5536_v11 = vpop.permute.xlu1 %3246 }
 0x44e   : > { %v5542_v16 = vpop.permute.xlu0 %3118  ;;  %v2634_v27 = vsel %vm2595_vm3, %v2632_v10, %v2633_v14  ;;  %v2716_v28 = vsel %vm2595_vm3, 0.0, %v2632_v10  ;;  %v2902_v34 = vrot.slane %v2900_v13, 1 }
 0x44f   : > { %3194 = vrot.lane.b32.xlu1 %v5545_v17, %s4902_s26  ;;  %v5582_v33 = vpack.c.bf16 %v2634_v27, %v2716_v28  ;;  %v2898_v28 = vshrl.u32 %v5469_v23, 16 }
 0x450   : > { %3320 = vrot.lane.b32.xlu0 %v5460_v19, %s4901_s23 }
 0x451   : > { %v5554_v40 = vpop.permute.xlu1 %3214  ;;  %v2903_v54 = vor.u32 %v2902_v34, %v2898_v28  ;;  %v3038_v34 = vrot.slane %v5582_v33, 1 }
 0x452   : > { %v5556_v18 = vpop.permute.xlu0 %3212 }
 0x453   : > { %3100 = vrot.lane.b32.xlu1 %v5545_v17, %s4900_s22  ;;  %v5667_v13 = vsel %vm2776_vm5, %v2903_v54, %v2907_v56 }
 0x454   : > { %3132 = vrot.lane.b32.xlu0 %v5460_v19, %s4897_s19  ;;  %v2893_v19 = vshll.u32 %v5489_v38, 16  ;;  %v2733_v38 = vsel %vm2595_vm3, %v2630_v44, 0.0 }
 0x455   : > { %v5569_v61 = vpop.permute.xlu1 %3154  ;;  %v5608_v3 = vpack.c.bf16 %v2733_v38, %v2733_v38  ;;  %v539_v38 = vld [vmem:[%s5130_s17 + $0xd0] sm:$0xff] }
 0x456   : > { %v5571_v30 = vpop.permute.xlu0 %3152  ;;  %v2895_v52 = vrot.slane %v2893_v19, 1  ;;  %v4839_v19 = vunpack.i.h.bf16 %v5509_v53  ;;  %v2551_v53 = vsel %vm2522_vm2, %v539_v38, %v4838_v39 }
 0x457   : > { %3230 = vrot.lane.b32.xlu1 %v5574_v31, %s4899_s21  ;;  %v3036_v8 = vrot.slane %v5608_v3, 1 }
 0x458   : > { %3260 = vrot.lane.b32.xlu0 %v5469_v23, %s4898_s20  ;;  %v5606_v2 = vsel %vm2776_vm5, %v2891_v50, %v2895_v52  ;;  %v540_v50 = vld [vmem:[%s5130_s17 + $0xd8] sm:$0xff] }
 0x459   : > { %v5584_v42 = vpop.permute.xlu1 %3122  ;;  %v5635_v27 = vsel %vm3001_vm4, %v3035_v6, %v3036_v8  ;;  %v5659_v9 = vsel %vm2522_vm2, %v540_v50, %v4839_v19  ;;  %v2912_v19 = vshll.u32 %v5521_v55, 16 }
 0x45a   : > { %v3085_v49 = vpop.permute.xlu0 %3084  ;;  %v2639_v14 = vrot.slane %v5659_v9, 7 }
 0x45b   : > { %3170 = vrot.lane.b32.xlu1 %v5582_v33, %s4896_s18  ;;  %v2914_v54 = vrot.slane %v2912_v19, 1 }
 0x45c   : > { %3192 = vrot.lane.b32.xlu0 %v5487_v37, %s4902_s26  ;;  %v2636_v37 = vrot.slane %v5601_v4, 7 }
 0x45d   : > { %v5597_v58 = vpop.permute.xlu1 %3250 }
 0x45e   : > { %v5603_v62 = vpop.permute.xlu0 %3308  ;;  %v2637_v10 = vsel %vm2595_vm3, %v2635_v36, %v2636_v37 }
 0x45f   : > { %3290 = vrot.lane.b32.xlu1 %v5606_v2, %s4903_s16 }
 0x460   : > { %3322 = vrot.lane.b32.xlu0 %v5514_v51, %s4901_s23 }
 0x461   : > { %v5615_v44 = vpop.permute.xlu1 %3182 }
 0x462   : > { %v5617_v5 = vpop.permute.xlu0 %3120 }
 0x463   : > { %3102 = vrot.lane.b32.xlu1 %v5606_v2, %s4900_s22 }
 0x464   : > { %3228 = vrot.lane.b32.xlu0 %v5514_v51, %s4899_s21  ;;  %v5643_v51 = vpack.c.bf16 %v2637_v10, %v2717_v20  ;;  %v3341_v10 = vsel %vm565_vm1, %v5142_v45, %v3085_v49 }
 0x465   : > { %v5630_v21 = vpop.permute.xlu1 %3088  ;;  %v3374_v39 = vsel %vm3372_vm7, %v3341_v10, %v5511_v43  ;;  %v5700_v43 = vsel %vm3001_vm4, %v3038_v34, %v3039_v35  ;;  %v541_v10 = vld [vmem:[%s5130_s17 + $0xe0] sm:$0xff] }
 0x466   : > { %v5632_v22 = vpop.permute.xlu0 %3248  ;;  %v3407_v56 = vsel %vm3405_vm8, %v3374_v39, %v5496_v47 }
 0x467   : > { %3138 = vrot.lane.b32.xlu1 %v5635_v27, %s4897_s19 }
 0x468   : > { %3168 = vrot.lane.b32.xlu0 %v5521_v55, %s4896_s18 }
 0x469   : > { %v5646_v48 = vpop.permute.xlu1 %3218 }
 0x46a   : > { %v3087_v52 = vpop.permute.xlu0 %3086 }
 0x46b   : > { %3266 = vrot.lane.b32.xlu1 %v5643_v51, %s4898_s20  ;;  %v3343_v6 = vsel %vm565_vm1, %v5144_v46, %v3087_v52 }
 0x46c   : > { %3288 = vrot.lane.b32.xlu0 %v5545_v17, %s4903_s16  ;;  %v2638_v17 = vrot.slane %v2551_v53, 7  ;;  %v3376_v46 = vsel %vm3372_vm7, %v3343_v6, %v5542_v16  ;;  %v4843_v6 = vunpack.i.l.bf16 %v5449_v12  ;;  %v2735_v12 = vsel %vm2595_vm3, %v2636_v37, 0.0 }
 0x46d   : > { %v5661_v36 = vpop.permute.xlu1 %3158  ;;  %v3409_v45 = vsel %vm3405_vm8, %v3376_v46, %v5523_v60  ;;  %v2910_v60 = vshrl.u32 %v5521_v55, 16 }
 0x46e   : > { %v3181_v8 = vpop.permute.xlu0 %3180  ;;  %v2640_v16 = vsel %vm2595_vm3, %v2638_v17, %v2639_v14  ;;  %v2718_v49 = vsel %vm2595_vm3, 0.0, %v2638_v17  ;;  %v3442_v38 = vsel %vm3438_vm9, %v3409_v45, %v5615_v44 }
 0x46f   : > { %3198 = vrot.lane.b32.xlu1 %v5667_v13, %s4902_s26  ;;  %v3440_v53 = vsel %vm3438_vm9, %v3407_v56, %v3181_v8  ;;  %v5716_v17 = vpack.c.bf16 %v2640_v16, %v2718_v49  ;;  %v3475_v44 = vsel %vm3471_vm10, %v3442_v38, %v5554_v40  ;;  %v2915_v34 = vor.u32 %v2914_v54, %v2910_v60 }
 0x470   : > { %3324 = vrot.lane.b32.xlu0 %v5574_v31, %s4901_s23  ;;  %v3473_v8 = vsel %vm3471_vm10, %v3440_v53, %v5556_v18  ;;  %v2553_v40 = vsel %vm2522_vm2, %v541_v10, %v4843_v6  ;;  %v3508_v39 = vsel %vm3504_vm11, %v3475_v44, %v5536_v11  ;;  %v5748_v49 = vpack.c.bf16 %v2735_v12, %v2735_v12 }
 0x471   : > { %v3279_v20 = vpop.permute.xlu1 %3278  ;;  %v3506_v4 = vsel %vm3504_vm11, %v3473_v8, %v5527_v1  ;;  %v3041_v56 = vrot.slane %v5643_v51, 1  ;;  %v2922_v10 = vshrl.u32 %v5582_v33, 16  ;;  %v4849_v8 = vunpack.i.h.bf16 %v5463_v24 }
 0x472   : > { %v3311_v28 = vpop.permute.xlu0 %3310  ;;  %v3541_v45 = vsel %vm3537_vm12, %v3508_v39, %v3279_v20  ;;  %v2641_v20 = vrot.slane %v2553_v40, 7  ;;  %v3042_v38 = vrot.slane %v5748_v49, 1  ;;  %v4848_v12 = vunpack.i.l.bf16 %v5463_v24 }
 0x473   : > { %3104 = vrot.lane.b32.xlu1 %v5667_v13, %s4900_s22  ;;  %v3574_v60 = vsel %vm3570_vm13, %v3541_v45, %v3311_v28 }
 0x474   : > { %3136 = vrot.lane.b32.xlu0 %v5574_v31, %s4897_s19  ;;  %v2917_v31 = vshll.u32 %v5608_v3, 16  ;;  %v542_v3 = vld [vmem:[%s5130_s17 + $0xe8] sm:$0xff]  ;;  %v2719_v28 = vsel %vm2595_vm3, 0.0, %v2641_v20 }
 0x475   : > { %v5695_v50 = vpop.permute.xlu1 %3090  ;;  %v5733_v19 = vsel %vm2522_vm2, %v542_v3, %v4844_v25  ;;  %v2924_v25 = vshll.u32 %v5582_v33, 16  ;;  %v5781_v3 = vsel %vm3001_vm4, %v3041_v56, %v3042_v38  ;;  %v3345_v38 = vsel %vm565_vm1, %v5170_v15, %v5630_v21 }
 0x476   : > { %v5697_v52 = vpop.permute.xlu0 %3216  ;;  %v2919_v35 = vrot.slane %v2917_v31, 1  ;;  %v2642_v1 = vrot.slane %v5733_v19, 7  ;;  %v3347_v9 = vsel %vm565_vm1, %v5186_v26, %v5695_v50  ;;  %v2936_v50 = vshll.u32 %v5643_v51, 16 }
 0x477   : > { %3234 = vrot.lane.b32.xlu1 %v5700_v43, %s4899_s21  ;;  %v2926_v44 = vrot.slane %v2924_v25, 1  ;;  %v3378_v15 = vsel %vm3372_vm7, %v3345_v38, %v5617_v5 }
 0x478   : > { %3264 = vrot.lane.b32.xlu0 %v5582_v33, %s4898_s20  ;;  %v5746_v16 = vsel %vm2776_vm5, %v2915_v34, %v2919_v35 }
 0x479   : > { %v5718_v47 = vpop.permute.xlu1 %3126  ;;  %v2927_v39 = vor.u32 %v2926_v44, %v2922_v10  ;;  %v3380_v10 = vsel %vm3372_vm7, %v3347_v9, %v5584_v42  ;;  %v2934_v42 = vshrl.u32 %v5643_v51, 16 }
 0x47a   : > { %v5723_v46 = vpop.permute.xlu0 %3156 }
 0x47b   : > { %3174 = vrot.lane.b32.xlu1 %v5716_v17, %s4896_s18 }
 0x47c   : > { %3196 = vrot.lane.b32.xlu0 %v5606_v2, %s4902_s26 }
 0x47d   : > { %v5740_v18 = vpop.permute.xlu1 %3254 }
 0x47e   : > { %v3277_v37 = vpop.permute.xlu0 %3276 }
 0x47f   : > { %v3539_v2 = vsel %vm3537_vm12, %v3506_v4, %v3277_v37  ;;  %3294 = vrot.lane.b32.xlu1 %v5746_v16, %s4903_s16  ;;  %v544_v4 = vld [vmem:[%s5130_s17 + $0xf8] sm:$0xff]  ;;  %v2736_v37 = vsel %vm2595_vm3, %v2639_v14, 0.0 }
 0x480   : > { %3326 = vrot.lane.b32.xlu0 %v5635_v27, %s4901_s23  ;;  %v3572_v11 = vsel %vm3570_vm13, %v3539_v2, %v5603_v62  ;;  %v2643_v62 = vsel %vm2595_vm3, %v2641_v20, %v2642_v1  ;;  %v5815_v56 = vpack.c.bf16 %v2736_v37, %v2736_v37  ;;  %v3411_v37 = vsel %vm3405_vm8, %v3378_v15, %v5571_v30 }
 0x481   : > { %4569 = vmatprep.mubr.msk.bf16.mxu0 %vm3639_vm14, %v3572_v11  ;;  %v5760_v54 = vpop.permute.xlu1 %3186  ;;  %v5789_v34 = vpack.c.bf16 %v2643_v62, %v2719_v28  ;;  %v5810_v11 = vsel %vm2522_vm2, %v544_v4, %v4849_v8  ;;  %v3044_v28 = vrot.slane %v5716_v17, 1 }
 0x482   : > { %4570 = vmatmul.mubr.msk.bf16.vlgmr.msra.gmra.mrb[8].mxu0 %vm3639_vm14, %v3574_v60  ;;  %v5763_v31 = vpop.permute.xlu0 %3312  ;;  %v2645_v14 = vrot.slane %v5810_v11, 7  ;;  %v3045_v26 = vrot.slane %v5815_v56, 1 }
 0x483   : > { %3106 = vrot.lane.b32.xlu1 %v5746_v16, %s4900_s22 }
 0x484   : > { %3232 = vrot.lane.b32.xlu0 %v5635_v27, %s4899_s21  ;;  %v2929_v27 = vshll.u32 %v5669_v0, 16  ;;  %v543_v0 = vld [vmem:[%s5130_s17 + $0xf0] sm:$0xff]  ;;  %s4449_s17 = sadd.s32 240, %s5120_s11  ;;  %v5855_v5 = vsel %vm3001_vm4, %v3044_v28, %v3045_v26 }
 0x485   : > { %v5776_v53 = vpop.permute.xlu1 %3092  ;;  %v2555_v24 = vsel %vm2522_vm2, %v543_v0, %v4848_v12  ;;  %s483_s10 = scalar_lea.vmem %s6317_s2, %s4449_s17  ;;  %v2941_v0 = vshll.u32 %v5748_v49, 16  ;;  %v4853_v49 = vunpack.i.l.bf16 %v5480_v7 }
 0x486   : > { %v5778_v6 = vpop.permute.xlu0 %3124  ;;  %v2931_v45 = vrot.slane %v2929_v27, 1  ;;  %v545_v27 = vld [vmem:[%s483_s10] sm:$0xff]  ;;  %v546_v12 = vld [vmem:[%s483_s10 + $0x8] sm:$0xff] }
 0x487   : > { %3142 = vrot.lane.b32.xlu1 %v5781_v3, %s4897_s19  ;;  %v558_v38 = vmul.f32 0.0, %v546_v12 }
 0x488   : > { %3172 = vrot.lane.b32.xlu0 %v5643_v51, %s4896_s18  ;;  %v5813_v60 = vsel %vm2776_vm5, %v2927_v39, %v2931_v45  ;;  %v3413_v39 = vsel %vm3405_vm8, %v3380_v10, %v5569_v61 }
 0x489   : > { %v5791_v35 = vpop.permute.xlu1 %3222  ;;  %v3446_v4 = vsel %vm3438_vm9, %v3413_v39, %v5760_v54 }
 0x48a   : > { %v5795_v40 = vpop.permute.xlu0 %3252  ;;  %v3479_v30 = vsel %vm3471_vm10, %v3446_v4, %v5646_v48  ;;  %v2948_v4 = vshll.u32 %v5716_v17, 16 }
 0x48b   : > { %3270 = vrot.lane.b32.xlu1 %v5789_v34, %s4898_s20  ;;  %v3512_v15 = vsel %vm3504_vm11, %v3479_v30, %v5597_v58 }
 0x48c   : > { %3292 = vrot.lane.b32.xlu0 %v5667_v13, %s4903_s16  ;;  %v2644_v13 = vrot.slane %v2555_v24, 7  ;;  %v557_v24 = vmul.f32 0.0, %v545_v27 }
 0x48d   : > { %v5806_v2 = vpop.permute.xlu1 %3162 }
 0x48e   : > { %v3185_v20 = vpop.permute.xlu0 %3184  ;;  %v2646_v21 = vsel %vm2595_vm3, %v2644_v13, %v2645_v14  ;;  %v2720_v44 = vsel %vm2595_vm3, 0.0, %v2644_v13  ;;  %v4854_v13 = vunpack.i.h.bf16 %v5480_v7  ;;  %v2737_v7 = vsel %vm2595_vm3, %v2642_v1, 0.0 }
 0x48f   : > { %3202 = vrot.lane.b32.xlu1 %v5813_v60, %s4902_s26  ;;  %v3444_v61 = vsel %vm3438_vm9, %v3411_v37, %v3185_v20  ;;  %v5867_v9 = vpack.c.bf16 %v2646_v21, %v2720_v44  ;;  %v2557_v10 = vsel %vm2522_vm2, %v557_v24, %v4853_v49  ;;  %v2950_v49 = vrot.slane %v2948_v4, 1 }
 0x490   : > { %3328 = vrot.lane.b32.xlu0 %v5700_v43, %s4901_s23  ;;  %v3477_v20 = vsel %vm3471_vm10, %v3444_v61, %v5697_v52  ;;  %v5888_v48 = vsel %vm2522_vm2, %v558_v38, %v4854_v13  ;;  %v2946_v13 = vshrl.u32 %v5716_v17, 16  ;;  %v2953_v38 = vshll.u32 %v5815_v56, 16 }
 0x491   : > { %v3283_v25 = vpop.permute.xlu1 %3282  ;;  %v3510_v19 = vsel %vm3504_vm11, %v3477_v20, %v5632_v22  ;;  %v2738_v56 = vsel %vm2595_vm3, %v2645_v14, 0.0 }
 0x492   : > { %v3315_v62 = vpop.permute.xlu0 %3314  ;;  %v3545_v52 = vsel %vm3537_vm12, %v3512_v15, %v3283_v25  ;;  %v2647_v25 = vrot.slane %v2557_v10, 7  ;;  %v2955_v20 = vrot.slane %v2953_v38, 1  ;;  %v2773_v15 = vpack.c.bf16 %v2738_v56, %v2738_v56 }
 0x493   : > { %3108 = vrot.lane.b32.xlu1 %v5813_v60, %s4900_s22  ;;  %v3578_v22 = vsel %vm3570_vm13, %v3545_v52, %v3315_v62  ;;  %v2960_v52 = vshll.u32 %v5789_v34, 16 }
 0x494   : > { %3140 = vrot.lane.b32.xlu0 %v5700_v43, %s4897_s19  ;;  %v2938_v43 = vrot.slane %v2936_v50, 1  ;;  %v2943_v50 = vrot.slane %v2941_v0, 1  ;;  %v2721_v37 = vsel %vm2595_vm3, 0.0, %v2647_v25 }
 0x495   : > { %v5847_v8 = vpop.permute.xlu1 %3094 }
 0x496   : > { %v5852_v45 = vpop.permute.xlu0 %3220  ;;  %v2939_v26 = vor.u32 %v2938_v43, %v2934_v42  ;;  %v2648_v42 = vrot.slane %v5888_v48, 7  ;;  %v3047_v43 = vrot.slane %v5789_v34, 1  ;;  %v3351_v11 = vsel %vm565_vm1, %v5232_v63, %v5847_v8 }
 0x497   : > { %3238 = vrot.lane.b32.xlu1 %v5855_v5, %s4899_s21  ;;  %v3053_v8 = vshll.u32 %v5867_v9, 16 }
 0x498   : > { %3268 = vrot.lane.b32.xlu0 %v5716_v17, %s4898_s20  ;;  %v5898_v1 = vsel %vm2776_vm5, %v2939_v26, %v2943_v50  ;;  %v2649_v62 = vsel %vm2595_vm3, %v2647_v25, %v2648_v42  ;;  %v2951_v50 = vor.u32 %v2950_v49, %v2946_v13  ;;  %v2962_v25 = vrot.slane %v2960_v52, 1 }
 0x499   : > { %v5871_v54 = vpop.permute.xlu1 %3130  ;;  %v5936_v30 = vpack.c.bf16 %v2649_v62, %v2721_v37  ;;  %v3051_v37 = vshrl.u32 %v5867_v9, 16  ;;  %v3058_v13 = vshll.u32 %v2773_v15, 16 }
 0x49a   : > { %v5875_v28 = vpop.permute.xlu0 %3160  ;;  %v5950_v48 = vsel %vm2776_vm5, %v2951_v50, %v2955_v20  ;;  %v3055_v50 = vrot.slane %v3053_v8, 1 }
 0x49b   : > { %3178 = vrot.lane.b32.xlu1 %v5867_v9, %s4896_s18  ;;  %v3070_v20 = vshll.u32 %v5936_v30, 16 }
 0x49c   : > { %3200 = vrot.lane.b32.xlu0 %v5746_v16, %s4902_s26  ;;  %v2771_v16 = vpack.c.bf16 %v2737_v7, %v2737_v7 }
 0x49d   : > { %v5892_v21 = vpop.permute.xlu1 %3258 }
 0x49e   : > { %v3281_v44 = vpop.permute.xlu0 %3280  ;;  %v3048_v0 = vrot.slane %v2771_v16, 1 }
 0x49f   : > { %v3543_v27 = vsel %vm3537_vm12, %v3510_v19, %v3281_v44  ;;  %3298 = vrot.lane.b32.xlu1 %v5898_v1, %s4903_s16  ;;  %v3064_v19 = vrot.slane %v5867_v9, 1 }
 0x4a0   : > { %3330 = vrot.lane.b32.xlu0 %v5781_v3, %s4901_s23  ;;  %v3576_v58 = vsel %vm3570_vm13, %v3543_v27, %v5763_v31  ;;  %v5926_v61 = vsel %vm3001_vm4, %v3047_v43, %v3048_v0  ;;  %v3065_v27 = vrot.slane %v2773_v15, 1  ;;  %v3384_v43 = vsel %vm3372_vm7, %v3351_v11, %v5718_v47 }
 0x4a1   : > { %4573 = vmatprep.mubr.msk.bf16.mxu0 %vm3639_vm14, %v3576_v58  ;;  %v3191_v12 = vpop.permute.xlu1 %3190  ;;  %v2958_v58 = vshrl.u32 %v5789_v34, 16  ;;  %v3068_v15 = vshrl.u32 %v5936_v30, 16 }
 0x4a2   : > { %4574 = vmatmul.mubr.msk.bf16.gmra.mrb[12].mxu0 %vm3639_vm14, %v3578_v22  ;;  %v5911_v39 = vpop.permute.xlu0 %3316  ;;  %v2965_v22 = vshll.u32 %v2771_v16, 16  ;;  %v3417_v16 = vsel %vm3405_vm8, %v3384_v43, %v5661_v36  ;;  %v5982_v47 = vsel %vm3001_vm4, %v3064_v19, %v3065_v27  ;;  %v3056_v19 = vor.u32 %v3055_v50, %v3051_v37 }
 0x4a3   : > { %3110 = vrot.lane.b32.xlu1 %v5898_v1, %s4900_s22  ;;  %v2963_v4 = vor.u32 %v2962_v25, %v2958_v58  ;;  %v3072_v27 = vrot.slane %v3070_v20, 1 }
 0x4a4   : > { %3236 = vrot.lane.b32.xlu0 %v5781_v3, %s4899_s21  ;;  %v2967_v62 = vrot.slane %v2965_v22, 1 }
 0x4a5   : > { %v5919_v31 = vpop.permute.xlu1 %3096  ;;  %v3073_v22 = vor.u32 %v3072_v27, %v3068_v15 }
 0x4a6   : > { %v5923_v24 = vpop.permute.xlu0 %3128 }
 0x4a7   : > { %3146 = vrot.lane.b32.xlu1 %v5926_v61, %s4897_s19 }
 0x4a8   : > { %3176 = vrot.lane.b32.xlu0 %v5789_v34, %s4896_s18  ;;  %s4450_s18 = sshll.u32 %s6329_s27, 7 }
 0x4a9   : > { %v5934_v3 = vpop.permute.xlu1 %3226 }
 0x4aa   : > { %v5938_v26 = vpop.permute.xlu0 %3256 }
 0x4ab   : > { %3274 = vrot.lane.b32.xlu1 %v5936_v30, %s4898_s20 }
 0x4ac   : > { %3296 = vrot.lane.b32.xlu0 %v5813_v60, %s4903_s16  ;;  %v3349_v60 = vsel %vm565_vm1, %v5202_v41, %v5776_v53  ;;  %v2739_v41 = vsel %vm2595_vm3, %v2648_v42, 0.0 }
 0x4ad   : > { %v5947_v7 = vpop.permute.xlu1 %3166  ;;  %v3382_v63 = vsel %vm3372_vm7, %v3349_v60, %v5778_v6  ;;  %v3450_v6 = vsel %vm3438_vm9, %v3417_v16, %v3191_v12  ;;  %v2775_v49 = vpack.c.bf16 %v2739_v41, %v2739_v41 }
 0x4ae   : > { %v3189_v10 = vpop.permute.xlu0 %3188  ;;  %v3483_v12 = vsel %vm3471_vm10, %v3450_v6, %v5791_v35  ;;  %v3060_v35 = vrot.slane %v3058_v13, 1 }
 0x4af   : > { %3206 = vrot.lane.b32.xlu1 %v5950_v48, %s4902_s26  ;;  %v3075_v52 = vshll.u32 %v2775_v49, 16  ;;  %v3082_v8 = vrot.slane %v2775_v49, 1 }
 0x4b0   : > { %3332 = vrot.lane.b32.xlu0 %v5855_v5, %s4901_s23  ;;  %v3061_v25 = vsel %vm2776_vm5, %v3056_v19, %v3060_v35 }
 0x4b1   : > { %v3287_v14 = vpop.permute.xlu1 %3286  ;;  %v3077_v43 = vrot.slane %v3075_v52, 1 }
 0x4b2   : > { %v3319_v44 = vpop.permute.xlu0 %3318 }
 0x4b3   : > { %3112 = vrot.lane.b32.xlu1 %v5950_v48, %s4900_s22 }
 0x4b4   : > { %3144 = vrot.lane.b32.xlu0 %v5855_v5, %s4897_s19  ;;  %v3415_v5 = vsel %vm3405_vm8, %v3382_v63, %v5723_v46  ;;  %v2968_v46 = vsel %vm2776_vm5, %v2963_v4, %v2967_v62 }
 0x4b5   : > { %v5974_v53 = vpop.permute.xlu1 %3098  ;;  %v3448_v42 = vsel %vm3438_vm9, %v3415_v5, %v3189_v10 }
 0x4b6   : > { %v5979_v0 = vpop.permute.xlu0 %3224  ;;  %v3481_v56 = vsel %vm3471_vm10, %v3448_v42, %v5852_v45 }
 0x4b7   : > { %3242 = vrot.lane.b32.xlu1 %v5982_v47, %s4899_s21  ;;  %v3514_v60 = vsel %vm3504_vm11, %v3481_v56, %v5795_v40 }
 0x4b8   : > { %3272 = vrot.lane.b32.xlu0 %v5867_v9, %s4898_s20  ;;  %v3516_v9 = vsel %vm3504_vm11, %v3483_v12, %v5740_v18 }
 0x4b9   : > { %v5992_v36 = vpop.permute.xlu1 %3134  ;;  %v3549_v11 = vsel %vm3537_vm12, %v3516_v9, %v3287_v14 }
 0x4ba   : > { %v5997_v38 = vpop.permute.xlu0 %3164 }
 0x4bb   : > { %3302 = vrot.lane.b32.xlu1 %v2968_v46, %s4903_s16 }
 0x4bc   : > { %3204 = vrot.lane.b32.xlu0 %v5898_v1, %s4902_s26  ;;  %v3582_v1 = vsel %vm3570_vm13, %v3549_v11, %v3319_v44  ;;  %v3081_v44 = vrot.slane %v5936_v30, 1  ;;  %v3355_v30 = vsel %vm565_vm1, %v5332_v57, %v5974_v53 }
 0x4bd   : > { %v6008_v10 = vpop.permute.xlu1 %3262  ;;  %v3388_v37 = vsel %vm3372_vm7, %v3355_v30, %v5871_v54 }
 0x4be   : > { %v3285_v45 = vpop.permute.xlu0 %3284  ;;  %v3083_v62 = vsel %vm3001_vm4, %v3081_v44, %v3082_v8  ;;  %v3421_v57 = vsel %vm3405_vm8, %v3388_v37, %v5806_v2 }
 0x4bf   : > { %v3547_v58 = vsel %vm3537_vm12, %v3514_v60, %v3285_v45  ;;  %3114 = vrot.lane.b32.xlu1 %v2968_v46, %s4900_s22  ;;  %s4378_s22 = sshll.u32 %s6329_s27, 1 }
 0x4c0   : > { %3334 = vrot.lane.b32.xlu0 %v5926_v61, %s4901_s23  ;;  %v3580_v18 = vsel %vm3570_vm13, %v3547_v58, %v5911_v39  ;;  %v3078_v39 = vsel %vm2776_vm5, %v3073_v22, %v3077_v43  ;;  %s509_s12 = scalar_lea.vmem %s6323_s8, %s4378_s22 }
 0x4c1   : > { %4577 = vmatprep.mubr.msk.bf16.mxu0 %vm3639_vm14, %v3580_v18  ;;  %v3195_v14 = vpop.permute.xlu1 %3194 }
 0x4c2   : > { %4578 = vmatmul.mubr.msk.bf16.gmra.mrb[16].mxu0 %vm3639_vm14, %v3582_v1  ;;  %v3321_v40 = vpop.permute.xlu0 %3320  ;;  %v3454_v12 = vsel %vm3438_vm9, %v3421_v57, %v3195_v14 }
 0x4c3   : > { %3210 = vrot.lane.b32.xlu1 %v3061_v25, %s4902_s26  ;;  %v3487_v54 = vsel %vm3471_vm10, %v3454_v12, %v5934_v3 }
 0x4c4   : > { %3240 = vrot.lane.b32.xlu0 %v5926_v61, %s4899_s21  ;;  %v3520_v2 = vsel %vm3504_vm11, %v3487_v54, %v5892_v21  ;;  %s6171_s21 = scalar_lea.vmem %s6322_s7, %s4450_s18 }
 0x4c5   : > { %v3101_v63 = vpop.permute.xlu1 %3100 }
 0x4c6   : > { %v3133_v41 = vpop.permute.xlu0 %3132  ;;  %v3357_v27 = vsel %vm565_vm1, %v5376_v29, %v3101_v63 }
 0x4c7   : > { %3306 = vrot.lane.b32.xlu1 %v3078_v39, %s4903_s16  ;;  %v3390_v14 = vsel %vm3372_vm7, %v3357_v27, %v3133_v41 }
 0x4c8   : > { %3300 = vrot.lane.b32.xlu0 %v5950_v48, %s4903_s16  ;;  %v3353_v48 = vsel %vm565_vm1, %v5279_v32, %v5919_v31 }
 0x4c9   : > { %v3231_v16 = vpop.permute.xlu1 %3230  ;;  %v3386_v13 = vsel %vm3372_vm7, %v3353_v48, %v5923_v24 }
 0x4ca   : > { %v3261_v4 = vpop.permute.xlu0 %3260  ;;  %v3419_v32 = vsel %vm3405_vm8, %v3386_v13, %v5875_v28 }
 0x4cb   : > { %3338 = vrot.lane.b32.xlu1 %v3083_v62, %s4901_s23 }
 0x4cc   : > { %3208 = vrot.lane.b32.xlu0 %v2968_v46, %s4902_s26 }
 0x4cd   : > { %v6035_v61 = vpop.permute.xlu1 %3170 }
 0x4ce   : > { %v3193_v6 = vpop.permute.xlu0 %3192 }
 0x4cf   : > { %v3452_v31 = vsel %vm3438_vm9, %v3419_v32, %v3193_v6 }
 0x4d0   : > { %3304 = vrot.lane.b32.xlu0 %v3061_v25, %s4903_s16 }
 0x4d1   : > { %v3291_v5 = vpop.permute.xlu1 %3290 }
 0x4d2   : > { %v3323_v42 = vpop.permute.xlu0 %3322  ;;  %v3553_v20 = vsel %vm3537_vm12, %v3520_v2, %v3291_v5 }
 0x4d3   : > { %v3586_v35 = vsel %vm3570_vm13, %v3553_v20, %v3323_v42 }
 0x4d4   : > { %3336 = vrot.lane.b32.xlu0 %v5982_v47, %s4901_s23  ;;  %v3485_v47 = vsel %vm3471_vm10, %v3452_v31, %v5979_v0 }
 0x4d5   : > { %v3103_v49 = vpop.permute.xlu1 %3102  ;;  %v3518_v28 = vsel %vm3504_vm11, %v3485_v47, %v5938_v26 }
 0x4d6   : > { %v3229_v53 = vpop.permute.xlu0 %3228  ;;  %v3359_v19 = vsel %vm565_vm1, %v5424_v59, %v3103_v49  ;;  %v3423_v59 = vsel %vm3405_vm8, %v3390_v14, %v5997_v38 }
 0x4d7   : > { %v3392_v1 = vsel %vm3372_vm7, %v3359_v19, %v5992_v36 }
 0x4d8   : > { %v3425_v25 = vsel %vm3405_vm8, %v3392_v1, %v5947_v7 }
 0x4d9   : > { %v3139_v46 = vpop.permute.xlu1 %3138 }
 0x4da   : > { %v6058_v24 = vpop.permute.xlu0 %3168 }
 0x4dd   : > { %v6064_v50 = vpop.permute.xlu1 %3266 }
 0x4de   : > { %v3289_v56 = vpop.permute.xlu0 %3288 }
 0x4df   : > { %v3551_v9 = vsel %vm3537_vm12, %v3518_v28, %v3289_v56 }
 0x4e0   : > { %v3584_v3 = vsel %vm3570_vm13, %v3551_v9, %v3321_v40 }
 0x4e1   : > { %4581 = vmatprep.mubr.msk.bf16.mxu0 %vm3639_vm14, %v3584_v3  ;;  %v3199_v0 = vpop.permute.xlu1 %3198 }
 0x4e2   : > { %4582 = vmatmul.mubr.msk.bf16.gmra.mrb[20].mxu0 %vm3639_vm14, %v3586_v35  ;;  %v3325_v21 = vpop.permute.xlu0 %3324  ;;  %v3458_v43 = vsel %vm3438_vm9, %v3425_v25, %v3199_v0 }
 0x4e3   : > { %v3491_v63 = vsel %vm3471_vm10, %v3458_v43, %v3231_v16 }
 0x4e4   : > { %v3524_v41 = vsel %vm3504_vm11, %v3491_v63, %v6008_v10 }
 0x4e5   : > { %v3105_v15 = vpop.permute.xlu1 %3104 }
 0x4e6   : > { %v3137_v52 = vpop.permute.xlu0 %3136 }
 0x4e9   : > { %v3235_v11 = vpop.permute.xlu1 %3234 }
 0x4ea   : > { %v3265_v60 = vpop.permute.xlu0 %3264 }
 0x4ed   : > { %v6074_v45 = vpop.permute.xlu1 %3174 }
 0x4ee   : > { %v3197_v26 = vpop.permute.xlu0 %3196 }
 0x4ef   : > { %v3456_v39 = vsel %vm3438_vm9, %v3423_v59, %v3197_v26 }
 0x4f0   : > { %v3489_v36 = vsel %vm3471_vm10, %v3456_v39, %v3229_v53  ;;  %v3361_v53 = vsel %vm565_vm1, %v5469_v23, %v3105_v15 }
 0x4f1   : > { %v3295_v58 = vpop.permute.xlu1 %3294  ;;  %v3522_v62 = vsel %vm3504_vm11, %v3489_v36, %v3261_v4  ;;  %v3394_v54 = vsel %vm3372_vm7, %v3361_v53, %v3137_v52 }
 0x4f2   : > { %v3327_v18 = vpop.permute.xlu0 %3326  ;;  %v3557_v7 = vsel %vm3537_vm12, %v3524_v41, %v3295_v58  ;;  %v3427_v56 = vsel %vm3405_vm8, %v3394_v54, %v6058_v24 }
 0x4f3   : > { %v3590_v48 = vsel %vm3570_vm13, %v3557_v7, %v3327_v18 }
 0x4f5   : > { %v3107_v40 = vpop.permute.xlu1 %3106 }
 0x4f6   : > { %v3233_v22 = vpop.permute.xlu0 %3232  ;;  %v3363_v4 = vsel %vm565_vm1, %v5521_v55, %v3107_v40 }
 0x4f7   : > { %v3396_v31 = vsel %vm3372_vm7, %v3363_v4, %v3139_v46 }
 0x4f8   : > { %v3429_v2 = vsel %vm3405_vm8, %v3396_v31, %v6035_v61 }
 0x4f9   : > { %v3143_v29 = vpop.permute.xlu1 %3142 }
 0x4fa   : > { %v3173_v44 = vpop.permute.xlu0 %3172 }
 0x4fd   : > { %v6093_v8 = vpop.permute.xlu1 %3270 }
 0x4fe   : > { %v3293_v6 = vpop.permute.xlu0 %3292 }
 0x4ff   : > { %v3555_v38 = vsel %vm3537_vm12, %v3522_v62, %v3293_v6 }
 0x500   : > { %v3588_v30 = vsel %vm3570_vm13, %v3555_v38, %v3325_v21 }
 0x501   : > { %4585 = vmatprep.mubr.msk.bf16.mxu0 %vm3639_vm14, %v3588_v30  ;;  %v3203_v16 = vpop.permute.xlu1 %3202 }
 0x502   : > { %4586 = vmatmul.mubr.msk.bf16.gmra.mrb[24].mxu0 %vm3639_vm14, %v3590_v48  ;;  %v3329_v5 = vpop.permute.xlu0 %3328  ;;  %v3462_v28 = vsel %vm3438_vm9, %v3429_v2, %v3203_v16 }
 0x503   : > { %v3495_v23 = vsel %vm3471_vm10, %v3462_v28, %v3235_v11 }
 0x504   : > { %v3528_v35 = vsel %vm3504_vm11, %v3495_v23, %v6064_v50 }
 0x505   : > { %v3109_v10 = vpop.permute.xlu1 %3108 }
 0x506   : > { %v3141_v42 = vpop.permute.xlu0 %3140 }
 0x509   : > { %v3239_v37 = vpop.permute.xlu1 %3238 }
 0x50a   : > { %v3269_v13 = vpop.permute.xlu0 %3268 }
 0x50d   : > { %v3179_v49 = vpop.permute.xlu1 %3178 }
 0x50e   : > { %v3201_v57 = vpop.permute.xlu0 %3200 }
 0x50f   : > { %v3460_v55 = vsel %vm3438_vm9, %v3427_v56, %v3201_v57 }
 0x510   : > { %v3493_v46 = vsel %vm3471_vm10, %v3460_v55, %v3233_v22 }
 0x511   : > { %v3299_v12 = vpop.permute.xlu1 %3298  ;;  %v3526_v21 = vsel %vm3504_vm11, %v3493_v46, %v3265_v60  ;;  %v3365_v60 = vsel %vm565_vm1, %v5582_v33, %v3109_v10 }
 0x512   : > { %v3331_v32 = vpop.permute.xlu0 %3330  ;;  %v3561_v61 = vsel %vm3537_vm12, %v3528_v35, %v3299_v12  ;;  %v3398_v25 = vsel %vm3372_vm7, %v3365_v60, %v3141_v42 }
 0x513   : > { %v3594_v26 = vsel %vm3570_vm13, %v3561_v61, %v3331_v32  ;;  %v3431_v39 = vsel %vm3405_vm8, %v3398_v25, %v3173_v44 }
 0x515   : > { %v3111_v47 = vpop.permute.xlu1 %3110 }
 0x516   : > { %v3237_v20 = vpop.permute.xlu0 %3236  ;;  %v3367_v14 = vsel %vm565_vm1, %v5643_v51, %v3111_v47 }
 0x517   : > { %v3400_v22 = vsel %vm3372_vm7, %v3367_v14, %v3143_v29 }
 0x518   : > { %v3433_v63 = vsel %vm3405_vm8, %v3400_v22, %v6074_v45 }
 0x519   : > { %v3147_v9 = vpop.permute.xlu1 %3146 }
 0x51a   : > { %v3177_v3 = vpop.permute.xlu0 %3176 }
 0x51d   : > { %v3275_v0 = vpop.permute.xlu1 %3274 }
 0x51e   : > { %v3297_v15 = vpop.permute.xlu0 %3296 }
 0x51f   : > { %v3559_v52 = vsel %vm3537_vm12, %v3526_v21, %v3297_v15 }
 0x520   : > { %v3592_v24 = vsel %vm3570_vm13, %v3559_v52, %v3329_v5 }
 0x521   : > { %4589 = vmatprep.mubr.msk.bf16.mxu1 %vm3639_vm14, %v3592_v24  ;;  %v3207_v11 = vpop.permute.xlu1 %3206 }
 0x522   : > { %4590 = vmatmul.mubr.msk.bf16.vlgmr.msra.gmra.mrb[20].mxu1 %vm3639_vm14, %v3594_v26  ;;  %v3333_v19 = vpop.permute.xlu0 %3332  ;;  %v3466_v33 = vsel %vm3438_vm9, %v3433_v63, %v3207_v11 }
 0x523   : > { %v3499_v62 = vsel %vm3471_vm10, %v3466_v33, %v3239_v37 }
 0x524   : > { %v3532_v48 = vsel %vm3504_vm11, %v3499_v62, %v6093_v8 }
 0x525   : > { %v3113_v27 = vpop.permute.xlu1 %3112 }
 0x526   : > { %v3145_v50 = vpop.permute.xlu0 %3144  ;;  %v3369_v29 = vsel %vm565_vm1, %v5716_v17, %v3113_v27 }
 0x527   : > { %v3402_v30 = vsel %vm3372_vm7, %v3369_v29, %v3145_v50 }
 0x528   : > { %v3435_v37 = vsel %vm3405_vm8, %v3402_v30, %v3177_v3 }
 0x529   : > { %v3243_v58 = vpop.permute.xlu1 %3242 }
 0x52a   : > { %v3273_v18 = vpop.permute.xlu0 %3272 }
 0x52d   : > { %v3303_v1 = vpop.permute.xlu1 %3302 }
 0x52e   : > { %v3205_v40 = vpop.permute.xlu0 %3204  ;;  %v3565_v5 = vsel %vm3537_vm12, %v3532_v48, %v3303_v1 }
 0x52f   : > { %v3464_v36 = vsel %vm3438_vm9, %v3431_v39, %v3205_v40 }
 0x530   : > { %v3497_v7 = vsel %vm3471_vm10, %v3464_v36, %v3237_v20 }
 0x531   : > { %v3115_v43 = vpop.permute.xlu1 %3114  ;;  %v3530_v45 = vsel %vm3504_vm11, %v3497_v7, %v3269_v13 }
 0x532   : > { %v3335_v59 = vpop.permute.xlu0 %3334  ;;  %v3371_v41 = vsel %vm565_vm1, %v5789_v34, %v3115_v43 }
 0x533   : > { %v3404_v44 = vsel %vm3372_vm7, %v3371_v41, %v3147_v9  ;;  %v3598_v17 = vsel %vm3570_vm13, %v3565_v5, %v3335_v59 }
 0x534   : > { %v3437_v34 = vsel %vm3405_vm8, %v3404_v44, %v3179_v49 }
 0x535   : > { %v3211_v6 = vpop.permute.xlu1 %3210 }
 0x536   : > { %v3241_v51 = vpop.permute.xlu0 %3240  ;;  %v3470_v42 = vsel %vm3438_vm9, %v3437_v34, %v3211_v6 }
 0x537   : > { %v3503_v4 = vsel %vm3471_vm10, %v3470_v42, %v3243_v58 }
 0x538   : > { %v3536_v32 = vsel %vm3504_vm11, %v3503_v4, %v3275_v0 }
 0x539   : > { %v3307_v8 = vpop.permute.xlu1 %3306 }
 0x53a   : > { %v3301_v38 = vpop.permute.xlu0 %3300  ;;  %v3569_v2 = vsel %vm3537_vm12, %v3536_v32, %v3307_v8 }
 0x53b   : > { %v3563_v16 = vsel %vm3537_vm12, %v3530_v45, %v3301_v38 }
 0x53c   : > { %v3596_v10 = vsel %vm3570_vm13, %v3563_v16, %v3333_v19 }
 0x53d   : > { %4593 = vmatprep.mubr.msk.bf16.mxu1 %vm3639_vm14, %v3596_v10  ;;  %v3339_v31 = vpop.permute.xlu1 %3338 }
 0x53e   : > { %4594 = vmatmul.mubr.msk.bf16.gmra.mrb[24].mxu1 %vm3639_vm14, %v3598_v17  ;;  %v3209_v13 = vpop.permute.xlu0 %3208  ;;  %v3602_v28 = vsel %vm3570_vm13, %v3569_v2, %v3339_v31 }
 0x53f   : > { %v3468_v49 = vsel %vm3438_vm9, %v3435_v37, %v3209_v13 }
 0x540   : > { %v3501_v57 = vsel %vm3471_vm10, %v3468_v49, %v3241_v51 }
 0x541   : > { %v3534_v12 = vsel %vm3504_vm11, %v3501_v57, %v3273_v18 }
 0x542   : > { %v3305_v53 = vpop.permute.xlu0 %3304 }
 0x543   : > { %v3567_v54 = vsel %vm3537_vm12, %v3534_v12, %v3305_v53 }
 0x546   : > { %v3337_v47 = vpop.permute.xlu0 %3336 }
 0x547   : > { %v3600_v20 = vsel %vm3570_vm13, %v3567_v54, %v3337_v47 }
 0x548   : > { %4597 = vmatprep.mubr.msk.bf16.mxu1 %vm3639_vm14, %v3600_v20 }
 0x549   : > { %4598 = vmatmul.mubr.msk.bf16.gmra.mrb[28].mxu1 %vm3639_vm14, %v3602_v28 }
 0x555   : > { %v4571_v56 = vpop.f32.mrb[8].mxu0 }
 0x556   : > { %v4453_v55 = vpack.c.bf16 %v4571_v56, %v4571_v56  ;;  %v3710_v9 = vpop.f32.mrb[9].mxu0  ;;  %v4069_v35 = vmul.f32 %v4571_v56, %v4571_v56  ;;  %v4001_v11 = vsel %vm2522_vm2, %v4571_v56, 0.0 }
 0x557   : > { %v4451_v23 = vpack.c.bf16 %v3710_v9, %v3710_v9  ;;  %v4067_v3 = vmul.f32 %v3710_v9, %v3710_v9  ;;  %v4572_v46 = vpop.f32.mrb[10].mxu0  ;;  %v3998_v21 = vsel %vm2522_vm2, %v3710_v9, 0.0 }
 0x558   : > { %3968 = vst.msk [vmem:[%s6171_s21 + $0x8] sm:$0xf] %vm3965_vm15, %v4453_v55  ;;  %v4454_v0 = vpack.c.bf16 %v4572_v46, %v4572_v46  ;;  %v3713_v61 = vpop.f32.mrb[11].mxu0  ;;  %v4070_v27 = vmul.f32 %v4572_v46, %v4572_v46  ;;  %v4102_v60 = vsel %vm2522_vm2, %v4069_v35, 0.0  ;;  %v4003_v1 = vsel %vm2522_vm2, %v4572_v46, 0.0 }
 0x559   : > { %3966 = vst.msk [vmem:[%s6171_s21] sm:$0xf] %vm3965_vm15, %v4451_v23  ;;  %v4452_v15 = vpack.c.bf16 %v3713_v61, %v3713_v61  ;;  %v3999_v52 = vsel %vm2522_vm2, %v3713_v61, 0.0  ;;  %v4068_v24 = vmul.f32 %v3713_v61, %v3713_v61  ;;  %v4099_v19 = vsel %vm2522_vm2, %v4067_v3, 0.0 }
 0x55a   : > { %3969 = vst.msk [vmem:[%s6171_s21 + $0xc] sm:$0xf] %vm3965_vm15, %v4454_v0  ;;  %v4000_v26 = vadd.f32 %v3999_v52, %v3998_v21  ;;  %v4104_v25 = vsel %vm2522_vm2, %v4070_v27, 0.0 }
 0x55b   : > { %3967 = vst.msk [vmem:[%s6171_s21 + $0x4] sm:$0xf] %vm3965_vm15, %v4452_v15  ;;  %v4100_v50 = vsel %vm2522_vm2, %v4068_v24, 0.0 }
 0x55c   : > { %v4002_v58 = vadd.f32 %v4001_v11, %v4000_v26  ;;  %v4101_v18 = vadd.f32 %v4100_v50, %v4099_v19 }
 0x55e   : > { %v4103_v14 = vadd.f32 %v4102_v60, %v4101_v18  ;;  %v4004_v40 = vadd.f32 %v4003_v1, %v4002_v58 }
 0x560   : > { %v4105_v22 = vadd.f32 %v4104_v25, %v4103_v14 }
 0x575   : > { %v4575_v43 = vpop.f32.mrb[12].mxu0 }
 0x576   : > { %v4457_v59 = vpack.c.bf16 %v4575_v43, %v4575_v43  ;;  %v3726_v39 = vpop.f32.mrb[13].mxu0  ;;  %v4073_v45 = vmul.f32 %v4575_v43, %v4575_v43  ;;  %v4009_v34 = vsel %vm2522_vm2, %v4575_v43, 0.0 }
 0x577   : > { %v4455_v63 = vpack.c.bf16 %v3726_v39, %v3726_v39  ;;  %v4005_v36 = vsel %vm2522_vm2, %v3726_v39, 0.0  ;;  %v4071_v33 = vmul.f32 %v3726_v39, %v3726_v39  ;;  %v4576_v41 = vpop.f32.mrb[14].mxu0 }
 0x578   : > { %3972 = vst.msk [vmem:[%s6171_s21 + $0x18] sm:$0xf] %vm3965_vm15, %v4457_v59  ;;  %v4006_v51 = vadd.f32 %v4005_v36, %v4004_v40  ;;  %v4458_v7 = vpack.c.bf16 %v4576_v41, %v4576_v41  ;;  %v3729_v62 = vpop.f32.mrb[15].mxu0  ;;  %v4074_v16 = vmul.f32 %v4576_v41, %v4576_v41  ;;  %v4011_v17 = vsel %vm2522_vm2, %v4576_v41, 0.0 }
 0x579   : > { %3970 = vst.msk [vmem:[%s6171_s21 + $0x10] sm:$0xf] %vm3965_vm15, %v4455_v63  ;;  %v4106_v29 = vsel %vm2522_vm2, %v4071_v33, 0.0  ;;  %v4456_v44 = vpack.c.bf16 %v3729_v62, %v3729_v62  ;;  %v4007_v6 = vsel %vm2522_vm2, %v3729_v62, 0.0  ;;  %v4072_v48 = vmul.f32 %v3729_v62, %v3729_v62 }
 0x57a   : > { %v4107_v38 = vadd.f32 %v4106_v29, %v4105_v22  ;;  %3973 = vst.msk [vmem:[%s6171_s21 + $0x1c] sm:$0xf] %vm3965_vm15, %v4458_v7  ;;  %v4008_v30 = vadd.f32 %v4007_v6, %v4006_v51  ;;  %v4110_v37 = vsel %vm2522_vm2, %v4073_v45, 0.0  ;;  %v4112_v49 = vsel %vm2522_vm2, %v4074_v16, 0.0 }
 0x57b   : > { %3971 = vst.msk [vmem:[%s6171_s21 + $0x14] sm:$0xf] %vm3965_vm15, %v4456_v44  ;;  %v4108_v10 = vsel %vm2522_vm2, %v4072_v48, 0.0 }
 0x57c   : > { %v4010_v5 = vadd.f32 %v4009_v34, %v4008_v30  ;;  %v4109_v42 = vadd.f32 %v4108_v10, %v4107_v38 }
 0x57e   : > { %v4012_v13 = vadd.f32 %v4011_v17, %v4010_v5  ;;  %v4111_v8 = vadd.f32 %v4110_v37, %v4109_v42 }
 0x580   : > { %v4113_v57 = vadd.f32 %v4112_v49, %v4111_v8 }
 0x595   : > { %v4579_v4 = vpop.f32.mrb[16].mxu0 }
 0x596   : > { %v4461_v53 = vpack.c.bf16 %v4579_v4, %v4579_v4  ;;  %v3742_v12 = vpop.f32.mrb[17].mxu0  ;;  %v4077_v23 = vmul.f32 %v4579_v4, %v4579_v4  ;;  %v4017_v0 = vsel %vm2522_vm2, %v4579_v4, 0.0 }
 0x597   : > { %v4459_v32 = vpack.c.bf16 %v3742_v12, %v3742_v12  ;;  %v4013_v31 = vsel %vm2522_vm2, %v3742_v12, 0.0  ;;  %v4075_v54 = vmul.f32 %v3742_v12, %v3742_v12  ;;  %v4580_v47 = vpop.f32.mrb[18].mxu0 }
 0x598   : > { %3976 = vst.msk [vmem:[%s6171_s21 + $0x28] sm:$0xf] %vm3965_vm15, %v4461_v53  ;;  %v4014_v2 = vadd.f32 %v4013_v31, %v4012_v13  ;;  %v4462_v20 = vpack.c.bf16 %v4580_v47, %v4580_v47  ;;  %v3745_v28 = vpop.f32.mrb[19].mxu0  ;;  %v4078_v61 = vmul.f32 %v4580_v47, %v4580_v47  ;;  %v4019_v52 = vsel %vm2522_vm2, %v4580_v47, 0.0 }
 0x599   : > { %3974 = vst.msk [vmem:[%s6171_s21 + $0x20] sm:$0xf] %vm3965_vm15, %v4459_v32  ;;  %v4114_v56 = vsel %vm2522_vm2, %v4075_v54, 0.0  ;;  %v4460_v55 = vpack.c.bf16 %v3745_v28, %v3745_v28  ;;  %v4015_v9 = vsel %vm2522_vm2, %v3745_v28, 0.0  ;;  %v4076_v35 = vmul.f32 %v3745_v28, %v3745_v28 }
 0x59a   : > { %v4115_v3 = vadd.f32 %v4114_v56, %v4113_v57  ;;  %3977 = vst.msk [vmem:[%s6171_s21 + $0x2c] sm:$0xf] %vm3965_vm15, %v4462_v20  ;;  %v4016_v46 = vadd.f32 %v4015_v9, %v4014_v2  ;;  %v4118_v26 = vsel %vm2522_vm2, %v4077_v23, 0.0  ;;  %v4120_v27 = vsel %vm2522_vm2, %v4078_v61, 0.0 }
 0x59b   : > { %3975 = vst.msk [vmem:[%s6171_s21 + $0x24] sm:$0xf] %vm3965_vm15, %v4460_v55  ;;  %v4116_v15 = vsel %vm2522_vm2, %v4076_v35, 0.0 }
 0x59c   : > { %v4018_v21 = vadd.f32 %v4017_v0, %v4016_v46  ;;  %v4117_v24 = vadd.f32 %v4116_v15, %v4115_v3 }
 0x59e   : > { %v4020_v11 = vadd.f32 %v4019_v52, %v4018_v21  ;;  %v4119_v19 = vadd.f32 %v4118_v26, %v4117_v24 }
 0x5a0   : > { %v4121_v50 = vadd.f32 %v4120_v27, %v4119_v19 }
 0x5b5   : > { %v4583_v58 = vpop.f32.mrb[20].mxu0 }
 0x5b6   : > { %v4465_v18 = vpack.c.bf16 %v4583_v58, %v4583_v58  ;;  %v3758_v60 = vpop.f32.mrb[21].mxu0  ;;  %v4081_v33 = vmul.f32 %v4583_v58, %v4583_v58  ;;  %v4025_v62 = vsel %vm2522_vm2, %v4583_v58, 0.0 }
 0x5b7   : > { %v4463_v1 = vpack.c.bf16 %v3758_v60, %v3758_v60  ;;  %v4021_v14 = vsel %vm2522_vm2, %v3758_v60, 0.0  ;;  %v4079_v40 = vmul.f32 %v3758_v60, %v3758_v60  ;;  %v4584_v25 = vpop.f32.mrb[22].mxu0 }
 0x5b8   : > { %3980 = vst.msk [vmem:[%s6171_s21 + $0x38] sm:$0xf] %vm3965_vm15, %v4465_v18  ;;  %v4022_v22 = vadd.f32 %v4021_v14, %v4020_v11  ;;  %v4466_v43 = vpack.c.bf16 %v4584_v25, %v4584_v25  ;;  %v3761_v59 = vpop.f32.mrb[23].mxu0  ;;  %v4082_v29 = vmul.f32 %v4584_v25, %v4584_v25  ;;  %v4027_v45 = vsel %vm2522_vm2, %v4584_v25, 0.0 }
 0x5b9   : > { %3978 = vst.msk [vmem:[%s6171_s21 + $0x30] sm:$0xf] %vm3965_vm15, %v4463_v1  ;;  %v4122_v39 = vsel %vm2522_vm2, %v4079_v40, 0.0  ;;  %v4464_v63 = vpack.c.bf16 %v3761_v59, %v3761_v59  ;;  %v4023_v36 = vsel %vm2522_vm2, %v3761_v59, 0.0  ;;  %v4080_v7 = vmul.f32 %v3761_v59, %v3761_v59 }
 0x5ba   : > { %v4123_v41 = vadd.f32 %v4122_v39, %v4121_v50  ;;  %3981 = vst.msk [vmem:[%s6171_s21 + $0x3c] sm:$0xf] %vm3965_vm15, %v4466_v43  ;;  %v4024_v51 = vadd.f32 %v4023_v36, %v4022_v22  ;;  %v4126_v30 = vsel %vm2522_vm2, %v4081_v33, 0.0  ;;  %v4128_v16 = vsel %vm2522_vm2, %v4082_v29, 0.0 }
 0x5bb   : > { %3979 = vst.msk [vmem:[%s6171_s21 + $0x34] sm:$0xf] %vm3965_vm15, %v4464_v63  ;;  %v4124_v6 = vsel %vm2522_vm2, %v4080_v7, 0.0 }
 0x5bc   : > { %v4026_v44 = vadd.f32 %v4025_v62, %v4024_v51  ;;  %v4125_v38 = vadd.f32 %v4124_v6, %v4123_v41 }
 0x5be   : > { %v4028_v48 = vadd.f32 %v4027_v45, %v4026_v44  ;;  %v4127_v34 = vadd.f32 %v4126_v30, %v4125_v38 }
 0x5c0   : > { %v4129_v5 = vadd.f32 %v4128_v16, %v4127_v34 }
 0x5d5   : > { %v4587_v10 = vpop.f32.mrb[24].mxu0 }
 0x5d6   : > { %v4469_v17 = vpack.c.bf16 %v4587_v10, %v4587_v10  ;;  %v3774_v42 = vpop.f32.mrb[25].mxu0  ;;  %v4085_v54 = vmul.f32 %v4587_v10, %v4587_v10  ;;  %v4033_v28 = vsel %vm2522_vm2, %v4587_v10, 0.0 }
 0x5d7   : > { %v4467_v37 = vpack.c.bf16 %v3774_v42, %v3774_v42  ;;  %v4029_v13 = vsel %vm2522_vm2, %v3774_v42, 0.0  ;;  %v4083_v8 = vmul.f32 %v3774_v42, %v3774_v42  ;;  %v4588_v49 = vpop.f32.mrb[26].mxu0 }
 0x5d8   : > { %3984 = vst.msk [vmem:[%s6171_s21 + $0x48] sm:$0xf] %vm3965_vm15, %v4469_v17  ;;  %v4030_v57 = vadd.f32 %v4029_v13, %v4028_v48  ;;  %v4470_v4 = vpack.c.bf16 %v4588_v49, %v4588_v49  ;;  %v3777_v53 = vpop.f32.mrb[27].mxu0  ;;  %v4086_v56 = vmul.f32 %v4588_v49, %v4588_v49  ;;  %v4035_v23 = vsel %vm2522_vm2, %v4588_v49, 0.0 }
 0x5d9   : > { %3982 = vst.msk [vmem:[%s6171_s21 + $0x40] sm:$0xf] %vm3965_vm15, %v4467_v37  ;;  %v4130_v12 = vsel %vm2522_vm2, %v4083_v8, 0.0  ;;  %v4468_v32 = vpack.c.bf16 %v3777_v53, %v3777_v53  ;;  %v4031_v31 = vsel %vm2522_vm2, %v3777_v53, 0.0  ;;  %v4084_v20 = vmul.f32 %v3777_v53, %v3777_v53 }
 0x5da   : > { %v4131_v47 = vadd.f32 %v4130_v12, %v4129_v5  ;;  %3985 = vst.msk [vmem:[%s6171_s21 + $0x4c] sm:$0xf] %vm3965_vm15, %v4470_v4  ;;  %v4032_v2 = vadd.f32 %v4031_v31, %v4030_v57  ;;  %v4134_v46 = vsel %vm2522_vm2, %v4085_v54, 0.0  ;;  %v4136_v61 = vsel %vm2522_vm2, %v4086_v56, 0.0 }
 0x5db   : > { %3983 = vst.msk [vmem:[%s6171_s21 + $0x44] sm:$0xf] %vm3965_vm15, %v4468_v32  ;;  %v4132_v9 = vsel %vm2522_vm2, %v4084_v20, 0.0 }
 0x5dc   : > { %v4034_v55 = vadd.f32 %v4033_v28, %v4032_v2  ;;  %v4133_v3 = vadd.f32 %v4132_v9, %v4131_v47 }
 0x5de   : > { %v4036_v35 = vadd.f32 %v4035_v23, %v4034_v55  ;;  %v4135_v0 = vadd.f32 %v4134_v46, %v4133_v3 }
 0x5e0   : > { %v4137_v21 = vadd.f32 %v4136_v61, %v4135_v0 }
 0x5f5   : > { %v4591_v15 = vpop.f32.mrb[20].mxu1 }
 0x5f6   : > { %v4473_v52 = vpack.c.bf16 %v4591_v15, %v4591_v15  ;;  %v3790_v24 = vpop.f32.mrb[21].mxu1  ;;  %v4089_v40 = vmul.f32 %v4591_v15, %v4591_v15  ;;  %v4041_v59 = vsel %vm2522_vm2, %v4591_v15, 0.0 }
 0x5f7   : > { %v4471_v26 = vpack.c.bf16 %v3790_v24, %v3790_v24  ;;  %v4037_v11 = vsel %vm2522_vm2, %v3790_v24, 0.0  ;;  %v4087_v19 = vmul.f32 %v3790_v24, %v3790_v24  ;;  %v4592_v27 = vpop.f32.mrb[22].mxu1 }
 0x5f8   : > { %3988 = vst.msk [vmem:[%s6171_s21 + $0x58] sm:$0xf] %vm3965_vm15, %v4473_v52  ;;  %v4038_v50 = vadd.f32 %v4037_v11, %v4036_v35  ;;  %v4474_v58 = vpack.c.bf16 %v4592_v27, %v4592_v27  ;;  %v3793_v18 = vpop.f32.mrb[23].mxu1  ;;  %v4090_v39 = vmul.f32 %v4592_v27, %v4592_v27  ;;  %v4043_v33 = vsel %vm2522_vm2, %v4592_v27, 0.0 }
 0x5f9   : > { %3986 = vst.msk [vmem:[%s6171_s21 + $0x50] sm:$0xf] %vm3965_vm15, %v4471_v26  ;;  %v4138_v60 = vsel %vm2522_vm2, %v4087_v19, 0.0  ;;  %v4472_v1 = vpack.c.bf16 %v3793_v18, %v3793_v18  ;;  %v4039_v14 = vsel %vm2522_vm2, %v3793_v18, 0.0  ;;  %v4088_v43 = vmul.f32 %v3793_v18, %v3793_v18 }
 0x5fa   : > { %v4139_v25 = vadd.f32 %v4138_v60, %v4137_v21  ;;  %3989 = vst.msk [vmem:[%s6171_s21 + $0x5c] sm:$0xf] %vm3965_vm15, %v4474_v58  ;;  %v4040_v22 = vadd.f32 %v4039_v14, %v4038_v50  ;;  %v4142_v51 = vsel %vm2522_vm2, %v4089_v40, 0.0  ;;  %v4144_v29 = vsel %vm2522_vm2, %v4090_v39, 0.0 }
 0x5fb   : > { %3987 = vst.msk [vmem:[%s6171_s21 + $0x54] sm:$0xf] %vm3965_vm15, %v4472_v1  ;;  %v4140_v36 = vsel %vm2522_vm2, %v4088_v43, 0.0 }
 0x5fc   : > { %v4042_v63 = vadd.f32 %v4041_v59, %v4040_v22  ;;  %v4141_v41 = vadd.f32 %v4140_v36, %v4139_v25 }
 0x5fe   : > { %v4044_v7 = vadd.f32 %v4043_v33, %v4042_v63  ;;  %v4143_v62 = vadd.f32 %v4142_v51, %v4141_v41 }
 0x600   : > { %v4145_v44 = vadd.f32 %v4144_v29, %v4143_v62 }
 0x611   : > { %v4595_v6 = vpop.f32.mrb[24].mxu1 }
 0x612   : > { %v4477_v45 = vpack.c.bf16 %v4595_v6, %v4595_v6  ;;  %v3806_v38 = vpop.f32.mrb[25].mxu1  ;;  %v4093_v8 = vmul.f32 %v4595_v6, %v4595_v6  ;;  %v4049_v53 = vsel %vm2522_vm2, %v4595_v6, 0.0 }
 0x613   : > { %v4475_v30 = vpack.c.bf16 %v3806_v38, %v3806_v38  ;;  %v4045_v48 = vsel %vm2522_vm2, %v3806_v38, 0.0  ;;  %v4091_v34 = vmul.f32 %v3806_v38, %v3806_v38  ;;  %v4596_v16 = vpop.f32.mrb[26].mxu1 }
 0x614   : > { %3992 = vst.msk [vmem:[%s6171_s21 + $0x68] sm:$0xf] %vm3965_vm15, %v4477_v45  ;;  %v4046_v5 = vadd.f32 %v4045_v48, %v4044_v7  ;;  %v4478_v10 = vpack.c.bf16 %v4596_v16, %v4596_v16  ;;  %v3809_v17 = vpop.f32.mrb[27].mxu1  ;;  %v4094_v12 = vmul.f32 %v4596_v16, %v4596_v16  ;;  %v4051_v54 = vsel %vm2522_vm2, %v4596_v16, 0.0 }
 0x615   : > { %3990 = vst.msk [vmem:[%s6171_s21 + $0x60] sm:$0xf] %vm3965_vm15, %v4475_v30  ;;  %v4146_v42 = vsel %vm2522_vm2, %v4091_v34, 0.0  ;;  %v4476_v37 = vpack.c.bf16 %v3809_v17, %v3809_v17  ;;  %v4047_v13 = vsel %vm2522_vm2, %v3809_v17, 0.0  ;;  %v4092_v4 = vmul.f32 %v3809_v17, %v3809_v17 }
 0x616   : > { %v4147_v49 = vadd.f32 %v4146_v42, %v4145_v44  ;;  %3993 = vst.msk [vmem:[%s6171_s21 + $0x6c] sm:$0xf] %vm3965_vm15, %v4478_v10  ;;  %v4048_v57 = vadd.f32 %v4047_v13, %v4046_v5  ;;  %v4150_v2 = vsel %vm2522_vm2, %v4093_v8, 0.0  ;;  %v4152_v56 = vsel %vm2522_vm2, %v4094_v12, 0.0 }
 0x617   : > { %3991 = vst.msk [vmem:[%s6171_s21 + $0x64] sm:$0xf] %vm3965_vm15, %v4476_v37  ;;  %v4148_v31 = vsel %vm2522_vm2, %v4092_v4, 0.0 }
 0x618   : > { %v4050_v32 = vadd.f32 %v4049_v53, %v4048_v57  ;;  %v4149_v47 = vadd.f32 %v4148_v31, %v4147_v49 }
 0x61a   : > { %v4052_v20 = vadd.f32 %v4051_v54, %v4050_v32  ;;  %v4151_v28 = vadd.f32 %v4150_v2, %v4149_v47 }
 0x61c   : > { %v4599_v55 = vpop.f32.mrb[28].mxu1  ;;  %v4153_v3 = vadd.f32 %v4152_v56, %v4151_v28 }
 0x61d   : > { %v4481_v9 = vpack.c.bf16 %v4599_v55, %v4599_v55  ;;  %v3822_v23 = vpop.f32.mrb[29].mxu1  ;;  %v4097_v19 = vmul.f32 %v4599_v55, %v4599_v55  ;;  %v4057_v18 = vsel %vm2522_vm2, %v4599_v55, 0.0 }
 0x61e   : > { %v4479_v46 = vpack.c.bf16 %v3822_v23, %v3822_v23  ;;  %v4053_v35 = vsel %vm2522_vm2, %v3822_v23, 0.0  ;;  %v4095_v0 = vmul.f32 %v3822_v23, %v3822_v23  ;;  %v4600_v61 = vpop.f32.mrb[30].mxu1 }
 0x61f   : > { %3996 = vst.msk [vmem:[%s6171_s21 + $0x78] sm:$0xf] %vm3965_vm15, %v4481_v9  ;;  %v4054_v21 = vadd.f32 %v4053_v35, %v4052_v20  ;;  %v4482_v15 = vpack.c.bf16 %v4600_v61, %v4600_v61  ;;  %v3825_v52 = vpop.f32.mrb[31].mxu1  ;;  %v4098_v60 = vmul.f32 %v4600_v61, %v4600_v61  ;;  %v4059_v40 = vsel %vm2522_vm2, %v4600_v61, 0.0 }
 0x620   : > { %3994 = vst.msk [vmem:[%s6171_s21 + $0x70] sm:$0xf] %vm3965_vm15, %v4479_v46  ;;  %v4154_v24 = vsel %vm2522_vm2, %v4095_v0, 0.0  ;;  %v4480_v26 = vpack.c.bf16 %v3825_v52, %v3825_v52  ;;  %v4055_v11 = vsel %vm2522_vm2, %v3825_v52, 0.0  ;;  %v4096_v58 = vmul.f32 %v3825_v52, %v3825_v52 }
 0x621   : > { %v4155_v27 = vadd.f32 %v4154_v24, %v4153_v3  ;;  %3997 = vst.msk [vmem:[%s6171_s21 + $0x7c] sm:$0xf] %vm3965_vm15, %v4482_v15  ;;  %v4056_v50 = vadd.f32 %v4055_v11, %v4054_v21  ;;  %v4158_v22 = vsel %vm2522_vm2, %v4097_v19, 0.0  ;;  %v4160_v39 = vsel %vm2522_vm2, %v4098_v60, 0.0 }
 0x622   : > { %3995 = vst.msk [vmem:[%s6171_s21 + $0x74] sm:$0xf] %vm3965_vm15, %v4480_v26  ;;  %v4156_v14 = vsel %vm2522_vm2, %v4096_v58, 0.0 }
 0x623   : > { %v4058_v1 = vadd.f32 %v4057_v18, %v4056_v50  ;;  %v4157_v25 = vadd.f32 %v4156_v14, %v4155_v27 }
 0x625   : > { %v4060_v43 = vadd.f32 %v4059_v40, %v4058_v1  ;;  %v4159_v59 = vadd.f32 %v4158_v22, %v4157_v25 }
 0x627   : > { %v4061_v63 = vrot.slane %v4060_v43, 4  ;;  %v4161_v36 = vadd.f32 %v4160_v39, %v4159_v59 }
 0x629   : > { %v4062_v33 = vadd.f32 %v4061_v63, %v4060_v43  ;;  %v4162_v41 = vrot.slane %v4161_v36, 4 }
 0x62b   : > { %v4063_v51 = vrot.slane %v4062_v33, 2  ;;  %v4163_v7 = vadd.f32 %v4162_v41, %v4161_v36 }
 0x62d   : > { %v4064_v62 = vadd.f32 %v4063_v51, %v4062_v33  ;;  %v4164_v29 = vrot.slane %v4163_v7, 2 }
 0x62f   : > { %v4065_v44 = vrot.slane %v4064_v62, 1  ;;  %v4165_v6 = vadd.f32 %v4164_v29, %v4163_v7 }
 0x631   : > { %v4166_v45 = vrot.slane %v4165_v6, 1  ;;  %v4066_v38 = vadd.f32 %v4065_v44, %v4064_v62 }
 0x633   : > { %v4167_v30 = vadd.f32 %v4166_v45, %v4165_v6 }
 0x635   : > { %v4168_v48 = vsel %vm2595_vm3, %v4066_v38, %v4167_v30 }
 0x636   : > { %4170 = vst.msk [vmem:[%s509_s12] sm:$0x3] %vm4169_vm0, %v4168_v48 }
 0x637 PF: > { %s19_s29 = sadd.s32 1, %s4882_s29   ;;  %s6324_s27 = smov %s4878_s28 }
 0x638   : > { %p16_p5 = scmp.ge.s32.totalorder %s19_s29, 4   ;;  %s6325_s28 = smov %s6327_s30 }
 0x63a   :  { %18 = sbr.rel (!%p16_p5) target bundleno = 2 (0x2), region = 100 }

</bundles_post_ra>
